<compile_context>
chip_gen: v6e
topology: v6e:2x2x1
jax: 0.10.0
libtpu: 0.0.40
codegen_flags: <defaults>
</compile_context>

<pallas_src>
import functools

import jax
import jax.numpy as jnp
from jax.experimental import pallas as pl
from jax.experimental.pallas import tpu as pltpu


def _round_up(a, b):
    return (a + b - 1) // b * b


def _vmem_limit_bytes():
    """Generation-aware VMEM cap (v5e/v6e: 128 MiB physical, v7x: 64 MiB)."""
    cap = None
    try:
        cap = getattr(pltpu.get_tpu_info(), "vmem_capacity_bytes", None)
    except Exception:
        cap = None
    if not cap:
        cap = 64 * 1024 * 1024  # conservative (v7x-sized) fallback
    return int(max(32 * 1024 * 1024, min(cap * 3 // 4, 96 * 1024 * 1024)))


def _conv_bn_relu_kernel(x_ref, w_ref, shift_ref, o_ref, *, kh, kw, stride,
                         tile_oh, w_out, apply_relu):
    """One (batch, C_out-tile, row-tile) grid step.

    x_ref:     (H_slab, W_pad, C_in)      bf16 whole padded image of the
                                          current batch element (VMEM-resident
                                          across row / C_out tiles).
    w_ref:     (KH*KW, C_in, tile_co)     bf16, BN scale pre-folded.
    shift_ref: (1, tile_co)               f32 folded BN shift.
    o_ref:     (tile_oh * w_out, tile_co) f32, lane-dense store.
    """
    i = pl.program_id(2)
    row0 = pl.multiple_of(i * (tile_oh * stride), tile_oh * stride)
    span_h = (tile_oh - 1) * stride + 1
    span_w = (w_out - 1) * stride + 1
    tile_m = tile_oh * w_out

    acc = jnp.zeros((tile_m, o_ref.shape[-1]), jnp.float32)
    # Taps are formed on-chip from the resident slab (no HBM im2col).
    for t in range(kh * kw):
        ki, kj = divmod(t, kw)
        tap = x_ref[pl.ds(row0 + ki, span_h), kj:kj + span_w, :]
        if stride > 1:
            tap = tap[::stride, ::stride, :]
        acc = acc + jnp.dot(tap.reshape(tile_m, tap.shape[-1]), w_ref[t],
                            preferred_element_type=jnp.float32)

    y = acc + shift_ref[...]
    if apply_relu:
        y = jnp.maximum(y, 0.0)
    o_ref[...] = y.astype(o_ref.dtype)


def basic_conv_nhwc(x_nhwc, weight_oihw, gamma, beta, running_mean,
                    running_var, *, stride=1, padding=0, eps=1e-5, relu=True,
                    bn=True, compute_dtype=jnp.bfloat16):
    """BasicConv forward on NHWC activations (hot-path entry). Returns NHWC."""
    n, h, w, c_in = x_nhwc.shape
    c_out, c_in_w, kh, kw = weight_oihw.shape
    assert c_in == c_in_w, "groups != 1 not supported"

    h_out = (h + 2 * padding - kh) // stride + 1
    w_out = (w + 2 * padding - kw) // stride + 1

    # ---- tiling ----
    c_out_p = _round_up(c_out, 128)              # lane-dense output channels
    tile_co = 128
    for cand in (512, 256, 128):
        if c_out_p % cand == 0:
            tile_co = cand
            break
    grid_co = c_out_p // tile_co

    # Row tile sized so the GEMM M tile (tile_oh * w_out) is ~512 rows.
    tile_oh = max(1, min(h_out, 512 // max(1, w_out)))
    if tile_oh < h_out and (tile_oh * w_out) % 8 != 0:
        tile_oh = min(_round_up(tile_oh, 8), h_out)
    h_out_pad = _round_up(h_out, tile_oh)
    grid_oh = h_out_pad // tile_oh
    tile_m = tile_oh * w_out
    m_pad = h_out_pad * w_out

    # ---- input: spatial pad (+ extra bottom rows for the padded row tiles) ----
    x_pad = jnp.pad(x_nhwc, ((0, 0), (padding, padding),
                             (padding, padding), (0, 0)))
    h_needed = (h_out_pad - 1) * stride + kh
    extra_h = max(0, h_needed - x_pad.shape[1])
    if extra_h:
        x_pad = jnp.pad(x_pad, ((0, 0), (0, extra_h), (0, 0), (0, 0)))
    x_pad = x_pad.astype(compute_dtype)
    h_slab, w_slab = x_pad.shape[1], x_pad.shape[2]

    # ---- weights: fold BN scale, reshape (KH*KW, C_in, C_out_p), cast bf16 ----
    if bn:
        scale = gamma.astype(jnp.float32) / jnp.sqrt(
            running_var.astype(jnp.float32) + eps)
        shift = beta.astype(jnp.float32) - running_mean.astype(jnp.float32) * scale
    else:
        scale = jnp.ones((c_out,), jnp.float32)
        shift = jnp.zeros((c_out,), jnp.float32)
    w_mat = jnp.transpose(weight_oihw, (2, 3, 1, 0)).astype(jnp.float32)
    w_mat = w_mat * scale[None, None, None, :]       # fold BN scale into weights
    w_mat = w_mat.reshape(kh * kw, c_in, c_out)
    w_mat = jnp.pad(w_mat, ((0, 0), (0, 0), (0, c_out_p - c_out)))
    w_mat = w_mat.astype(compute_dtype)
    shift = jnp.pad(shift, (0, c_out_p - c_out)).reshape(1, c_out_p)

    kernel = functools.partial(_conv_bn_relu_kernel, kh=kh, kw=kw,
                               stride=stride, tile_oh=tile_oh, w_out=w_out,
                               apply_relu=relu)

    out_flat = pl.pallas_call(
        kernel,
        out_shape=jax.ShapeDtypeStruct((n, m_pad, c_out_p), jnp.float32),
        grid=(n, grid_co, grid_oh),
        in_specs=[
            # Whole padded image of one batch element; constant block index
            # across (co, row) tiles -> DMA'd from HBM once per batch element.
            pl.BlockSpec((None, h_slab, w_slab, c_in),
                         lambda b, j, i: (b, 0, 0, 0)),
            pl.BlockSpec((kh * kw, c_in, tile_co), lambda b, j, i: (0, 0, j)),
            pl.BlockSpec((1, tile_co), lambda b, j, i: (0, j)),
        ],
        out_specs=pl.BlockSpec((None, tile_m, tile_co),
                               lambda b, j, i: (b, i, j)),
        compiler_params=pltpu.CompilerParams(
            dimension_semantics=("parallel", "parallel", "parallel"),
            vmem_limit_bytes=_vmem_limit_bytes()),
    )(x_pad, w_mat, shift)

    out = out_flat.reshape(n, h_out_pad, w_out, c_out_p)[:, :h_out, :, :c_out]
    return out                                       # NHWC


def basic_conv(x_nchw, weight_oihw, gamma, beta, running_mean, running_var,
               *, stride=1, padding=0, eps=1e-5, relu=True, bn=True,
               compute_dtype=jnp.bfloat16):
    """nn.Conv2d-interface (NCHW) wrapper.  Hot-path callers should use
    basic_conv_nhwc directly to avoid the two full-tensor transposes here."""
    x_nhwc = jnp.transpose(x_nchw, (0, 2, 3, 1))
    out = basic_conv_nhwc(x_nhwc, weight_oihw, gamma, beta, running_mean,
                          running_var, stride=stride, padding=padding, eps=eps,
                          relu=relu, bn=bn, compute_dtype=compute_dtype)
    return jnp.transpose(out, (0, 3, 1, 2))          # back to NCHW


def _reference(x_nchw, weight_oihw, gamma, beta, running_mean, running_var,
               *, stride, padding, eps=1e-5):
    y = jax.lax.conv_general_dilated(
        x_nchw, weight_oihw, window_strides=(stride, stride),
        padding=[(padding, padding), (padding, padding)],
        dimension_numbers=("NCHW", "OIHW", "NCHW"))
    y = (y - running_mean[None, :, None, None]) / jnp.sqrt(
        running_var[None, :, None, None] + eps)
    y = y * gamma[None, :, None, None] + beta[None, :, None, None]
    return jnp.maximum(y, 0.0)


if __name__ == "__main__":
    # BasicConv(in_planes=4, out_planes=8, kernel_size=3, stride=1, padding=1)
    N, C_IN, H, W = 2, 4, 16, 16
    C_OUT, K, STRIDE, PAD = 8, 3, 1, 1

    key = jax.random.PRNGKey(0)
    kx, kw_, kg, kb, km, kv = jax.random.split(key, 6)
    x = jax.random.normal(kx, (N, C_IN, H, W), dtype=jnp.float32)
    weight = jax.random.normal(kw_, (C_OUT, C_IN, K, K), dtype=jnp.float32) * 0.1
    gamma = 1.0 + 0.1 * jax.random.normal(kg, (C_OUT,), dtype=jnp.float32)
    beta = 0.1 * jax.random.normal(kb, (C_OUT,), dtype=jnp.float32)
    running_mean = 0.1 * jax.random.normal(km, (C_OUT,), dtype=jnp.float32)
    running_var = jnp.abs(jax.random.normal(kv, (C_OUT,), dtype=jnp.float32)) + 0.5

    out = basic_conv(x, weight, gamma, beta, running_mean, running_var,
                     stride=STRIDE, padding=PAD)
    out = jax.block_until_ready(out)

    ref = _reference(x, weight, gamma, beta, running_mean, running_var,
                     stride=STRIDE, padding=PAD)
    assert out.shape == (N, C_OUT, H, W), out.shape
    # bf16 MXU operands (f32 accumulation) -> loosened tolerance vs f32 ref.
    assert jnp.allclose(out, ref, atol=3e-2, rtol=3e-2), \
        float(jnp.max(jnp.abs(out - ref)))
    print("KERNEL_OK")
</pallas_src>

<mosaic_0001>
module attributes {stable_mosaic.version = 11 : i64} {
  func.func @_conv_bn_relu_kernel(%arg0: i32, %arg1: i32, %arg2: i32, %arg3: memref<1x18x18x4xbf16, #tpu.memory_space<vmem>>, %arg4: memref<9x4x128xbf16, #tpu.memory_space<vmem>>, %arg5: memref<1x128xf32, #tpu.memory_space<vmem>>, %arg6: memref<1x256x128xf32, #tpu.memory_space<vmem>>) attributes {dimension_semantics = [#tpu.dimension_semantics<parallel>, #tpu.dimension_semantics<parallel>, #tpu.dimension_semantics<parallel>], iteration_bounds = array<i64: 2, 1, 1>, scalar_prefetch = 0 : i64, scratch_operands = 0 : i64, tpu.core_type = #tpu.core_type<tc>, window_params = [{transform_indices = @transform_0, window_bounds = array<i64: 1, 18, 18, 4>}, {transform_indices = @transform_1, window_bounds = array<i64: 9, 4, 128>}, {transform_indices = @transform_2, window_bounds = array<i64: 1, 128>}, {transform_indices = @transform_3, window_bounds = array<i64: 1, 256, 128>}]} {
    %c16_i32 = arith.constant 16 : i32
    %0 = arith.muli %arg2, %c16_i32 : i32
    %1 = tpu.assume_multiple %0, 16 : i32
    %cst = arith.constant 0.000000e+00 : f32
    %2 = vector.broadcast %cst : f32 to vector<256x128xf32>
    %c0_i32 = arith.constant 0 : i32
    %3 = arith.addi %1, %c0_i32 : i32
    %c0 = arith.constant 0 : index
    %4 = arith.index_cast %3 : i32 to index
    %c0_0 = arith.constant 0 : index
    %c0_1 = arith.constant 0 : index
    %5 = vector.load %arg3[%c0, %4, %c0_0, %c0_1] : memref<1x18x18x4xbf16, #tpu.memory_space<vmem>>, vector<1x16x16x4xbf16>
    %6 = vector.shape_cast %5 : vector<1x16x16x4xbf16> to vector<16x16x4xbf16>
    %7 = vector.shape_cast %6 : vector<16x16x4xbf16> to vector<256x4xbf16>
    %c0_2 = arith.constant 0 : index
    %c0_3 = arith.constant 0 : index
    %c0_4 = arith.constant 0 : index
    %8 = vector.load %arg4[%c0_2, %c0_3, %c0_4] : memref<9x4x128xbf16, #tpu.memory_space<vmem>>, vector<1x4x128xbf16>
    %9 = vector.shape_cast %8 : vector<1x4x128xbf16> to vector<4x128xbf16>
    %cst_5 = arith.constant dense<0.000000e+00> : vector<256x128xf32>
    %10 = tpu.matmul %7, %9, %cst_5 {dimension_numbers = #tpu.dot_dimension_numbers<[1], [0], [0], [1], [0, 0, 1, 1], [], []>} : vector<256x4xbf16>, vector<4x128xbf16>, vector<256x128xf32> -> vector<256x128xf32>
    %11 = arith.addf %2, %10 : vector<256x128xf32>
    %c0_i32_6 = arith.constant 0 : i32
    %12 = arith.addi %1, %c0_i32_6 : i32
    %c0_7 = arith.constant 0 : index
    %13 = arith.index_cast %12 : i32 to index
    %c1 = arith.constant 1 : index
    %c0_8 = arith.constant 0 : index
    %14 = vector.load %arg3[%c0_7, %13, %c1, %c0_8] : memref<1x18x18x4xbf16, #tpu.memory_space<vmem>>, vector<1x16x16x4xbf16>
    %15 = vector.shape_cast %14 : vector<1x16x16x4xbf16> to vector<16x16x4xbf16>
    %16 = vector.shape_cast %15 : vector<16x16x4xbf16> to vector<256x4xbf16>
    %c1_9 = arith.constant 1 : index
    %c0_10 = arith.constant 0 : index
    %c0_11 = arith.constant 0 : index
    %17 = vector.load %arg4[%c1_9, %c0_10, %c0_11] : memref<9x4x128xbf16, #tpu.memory_space<vmem>>, vector<1x4x128xbf16>
    %18 = vector.shape_cast %17 : vector<1x4x128xbf16> to vector<4x128xbf16>
    %cst_12 = arith.constant dense<0.000000e+00> : vector<256x128xf32>
    %19 = tpu.matmul %16, %18, %cst_12 {dimension_numbers = #tpu.dot_dimension_numbers<[1], [0], [0], [1], [0, 0, 1, 1], [], []>} : vector<256x4xbf16>, vector<4x128xbf16>, vector<256x128xf32> -> vector<256x128xf32>
    %20 = arith.addf %11, %19 : vector<256x128xf32>
    %c0_i32_13 = arith.constant 0 : i32
    %21 = arith.addi %1, %c0_i32_13 : i32
    %c0_14 = arith.constant 0 : index
    %22 = arith.index_cast %21 : i32 to index
    %c2 = arith.constant 2 : index
    %c0_15 = arith.constant 0 : index
    %23 = vector.load %arg3[%c0_14, %22, %c2, %c0_15] : memref<1x18x18x4xbf16, #tpu.memory_space<vmem>>, vector<1x16x16x4xbf16>
    %24 = vector.shape_cast %23 : vector<1x16x16x4xbf16> to vector<16x16x4xbf16>
    %25 = vector.shape_cast %24 : vector<16x16x4xbf16> to vector<256x4xbf16>
    %c2_16 = arith.constant 2 : index
    %c0_17 = arith.constant 0 : index
    %c0_18 = arith.constant 0 : index
    %26 = vector.load %arg4[%c2_16, %c0_17, %c0_18] : memref<9x4x128xbf16, #tpu.memory_space<vmem>>, vector<1x4x128xbf16>
    %27 = vector.shape_cast %26 : vector<1x4x128xbf16> to vector<4x128xbf16>
    %cst_19 = arith.constant dense<0.000000e+00> : vector<256x128xf32>
    %28 = tpu.matmul %25, %27, %cst_19 {dimension_numbers = #tpu.dot_dimension_numbers<[1], [0], [0], [1], [0, 0, 1, 1], [], []>} : vector<256x4xbf16>, vector<4x128xbf16>, vector<256x128xf32> -> vector<256x128xf32>
    %29 = arith.addf %20, %28 : vector<256x128xf32>
    %c1_i32 = arith.constant 1 : i32
    %30 = arith.addi %1, %c1_i32 : i32
    %c0_20 = arith.constant 0 : index
    %31 = arith.index_cast %30 : i32 to index
    %c0_21 = arith.constant 0 : index
    %c0_22 = arith.constant 0 : index
    %32 = vector.load %arg3[%c0_20, %31, %c0_21, %c0_22] : memref<1x18x18x4xbf16, #tpu.memory_space<vmem>>, vector<1x16x16x4xbf16>
    %33 = vector.shape_cast %32 : vector<1x16x16x4xbf16> to vector<16x16x4xbf16>
    %34 = vector.shape_cast %33 : vector<16x16x4xbf16> to vector<256x4xbf16>
    %c3 = arith.constant 3 : index
    %c0_23 = arith.constant 0 : index
    %c0_24 = arith.constant 0 : index
    %35 = vector.load %arg4[%c3, %c0_23, %c0_24] : memref<9x4x128xbf16, #tpu.memory_space<vmem>>, vector<1x4x128xbf16>
    %36 = vector.shape_cast %35 : vector<1x4x128xbf16> to vector<4x128xbf16>
    %cst_25 = arith.constant dense<0.000000e+00> : vector<256x128xf32>
    %37 = tpu.matmul %34, %36, %cst_25 {dimension_numbers = #tpu.dot_dimension_numbers<[1], [0], [0], [1], [0, 0, 1, 1], [], []>} : vector<256x4xbf16>, vector<4x128xbf16>, vector<256x128xf32> -> vector<256x128xf32>
    %38 = arith.addf %29, %37 : vector<256x128xf32>
    %c1_i32_26 = arith.constant 1 : i32
    %39 = arith.addi %1, %c1_i32_26 : i32
    %c0_27 = arith.constant 0 : index
    %40 = arith.index_cast %39 : i32 to index
    %c1_28 = arith.constant 1 : index
    %c0_29 = arith.constant 0 : index
    %41 = vector.load %arg3[%c0_27, %40, %c1_28, %c0_29] : memref<1x18x18x4xbf16, #tpu.memory_space<vmem>>, vector<1x16x16x4xbf16>
    %42 = vector.shape_cast %41 : vector<1x16x16x4xbf16> to vector<16x16x4xbf16>
    %43 = vector.shape_cast %42 : vector<16x16x4xbf16> to vector<256x4xbf16>
    %c4 = arith.constant 4 : index
    %c0_30 = arith.constant 0 : index
    %c0_31 = arith.constant 0 : index
    %44 = vector.load %arg4[%c4, %c0_30, %c0_31] : memref<9x4x128xbf16, #tpu.memory_space<vmem>>, vector<1x4x128xbf16>
    %45 = vector.shape_cast %44 : vector<1x4x128xbf16> to vector<4x128xbf16>
    %cst_32 = arith.constant dense<0.000000e+00> : vector<256x128xf32>
    %46 = tpu.matmul %43, %45, %cst_32 {dimension_numbers = #tpu.dot_dimension_numbers<[1], [0], [0], [1], [0, 0, 1, 1], [], []>} : vector<256x4xbf16>, vector<4x128xbf16>, vector<256x128xf32> -> vector<256x128xf32>
    %47 = arith.addf %38, %46 : vector<256x128xf32>
    %c1_i32_33 = arith.constant 1 : i32
    %48 = arith.addi %1, %c1_i32_33 : i32
    %c0_34 = arith.constant 0 : index
    %49 = arith.index_cast %48 : i32 to index
    %c2_35 = arith.constant 2 : index
    %c0_36 = arith.constant 0 : index
    %50 = vector.load %arg3[%c0_34, %49, %c2_35, %c0_36] : memref<1x18x18x4xbf16, #tpu.memory_space<vmem>>, vector<1x16x16x4xbf16>
    %51 = vector.shape_cast %50 : vector<1x16x16x4xbf16> to vector<16x16x4xbf16>
    %52 = vector.shape_cast %51 : vector<16x16x4xbf16> to vector<256x4xbf16>
    %c5 = arith.constant 5 : index
    %c0_37 = arith.constant 0 : index
    %c0_38 = arith.constant 0 : index
    %53 = vector.load %arg4[%c5, %c0_37, %c0_38] : memref<9x4x128xbf16, #tpu.memory_space<vmem>>, vector<1x4x128xbf16>
    %54 = vector.shape_cast %53 : vector<1x4x128xbf16> to vector<4x128xbf16>
    %cst_39 = arith.constant dense<0.000000e+00> : vector<256x128xf32>
    %55 = tpu.matmul %52, %54, %cst_39 {dimension_numbers = #tpu.dot_dimension_numbers<[1], [0], [0], [1], [0, 0, 1, 1], [], []>} : vector<256x4xbf16>, vector<4x128xbf16>, vector<256x128xf32> -> vector<256x128xf32>
    %56 = arith.addf %47, %55 : vector<256x128xf32>
    %c2_i32 = arith.constant 2 : i32
    %57 = arith.addi %1, %c2_i32 : i32
    %c0_40 = arith.constant 0 : index
    %58 = arith.index_cast %57 : i32 to index
    %c0_41 = arith.constant 0 : index
    %c0_42 = arith.constant 0 : index
    %59 = vector.load %arg3[%c0_40, %58, %c0_41, %c0_42] : memref<1x18x18x4xbf16, #tpu.memory_space<vmem>>, vector<1x16x16x4xbf16>
    %60 = vector.shape_cast %59 : vector<1x16x16x4xbf16> to vector<16x16x4xbf16>
    %61 = vector.shape_cast %60 : vector<16x16x4xbf16> to vector<256x4xbf16>
    %c6 = arith.constant 6 : index
    %c0_43 = arith.constant 0 : index
    %c0_44 = arith.constant 0 : index
    %62 = vector.load %arg4[%c6, %c0_43, %c0_44] : memref<9x4x128xbf16, #tpu.memory_space<vmem>>, vector<1x4x128xbf16>
    %63 = vector.shape_cast %62 : vector<1x4x128xbf16> to vector<4x128xbf16>
    %cst_45 = arith.constant dense<0.000000e+00> : vector<256x128xf32>
    %64 = tpu.matmul %61, %63, %cst_45 {dimension_numbers = #tpu.dot_dimension_numbers<[1], [0], [0], [1], [0, 0, 1, 1], [], []>} : vector<256x4xbf16>, vector<4x128xbf16>, vector<256x128xf32> -> vector<256x128xf32>
    %65 = arith.addf %56, %64 : vector<256x128xf32>
    %c2_i32_46 = arith.constant 2 : i32
    %66 = arith.addi %1, %c2_i32_46 : i32
    %c0_47 = arith.constant 0 : index
    %67 = arith.index_cast %66 : i32 to index
    %c1_48 = arith.constant 1 : index
    %c0_49 = arith.constant 0 : index
    %68 = vector.load %arg3[%c0_47, %67, %c1_48, %c0_49] : memref<1x18x18x4xbf16, #tpu.memory_space<vmem>>, vector<1x16x16x4xbf16>
    %69 = vector.shape_cast %68 : vector<1x16x16x4xbf16> to vector<16x16x4xbf16>
    %70 = vector.shape_cast %69 : vector<16x16x4xbf16> to vector<256x4xbf16>
    %c7 = arith.constant 7 : index
    %c0_50 = arith.constant 0 : index
    %c0_51 = arith.constant 0 : index
    %71 = vector.load %arg4[%c7, %c0_50, %c0_51] : memref<9x4x128xbf16, #tpu.memory_space<vmem>>, vector<1x4x128xbf16>
    %72 = vector.shape_cast %71 : vector<1x4x128xbf16> to vector<4x128xbf16>
    %cst_52 = arith.constant dense<0.000000e+00> : vector<256x128xf32>
    %73 = tpu.matmul %70, %72, %cst_52 {dimension_numbers = #tpu.dot_dimension_numbers<[1], [0], [0], [1], [0, 0, 1, 1], [], []>} : vector<256x4xbf16>, vector<4x128xbf16>, vector<256x128xf32> -> vector<256x128xf32>
    %74 = arith.addf %65, %73 : vector<256x128xf32>
    %c2_i32_53 = arith.constant 2 : i32
    %75 = arith.addi %1, %c2_i32_53 : i32
    %c0_54 = arith.constant 0 : index
    %76 = arith.index_cast %75 : i32 to index
    %c2_55 = arith.constant 2 : index
    %c0_56 = arith.constant 0 : index
    %77 = vector.load %arg3[%c0_54, %76, %c2_55, %c0_56] : memref<1x18x18x4xbf16, #tpu.memory_space<vmem>>, vector<1x16x16x4xbf16>
    %78 = vector.shape_cast %77 : vector<1x16x16x4xbf16> to vector<16x16x4xbf16>
    %79 = vector.shape_cast %78 : vector<16x16x4xbf16> to vector<256x4xbf16>
    %c8 = arith.constant 8 : index
    %c0_57 = arith.constant 0 : index
    %c0_58 = arith.constant 0 : index
    %80 = vector.load %arg4[%c8, %c0_57, %c0_58] : memref<9x4x128xbf16, #tpu.memory_space<vmem>>, vector<1x4x128xbf16>
    %81 = vector.shape_cast %80 : vector<1x4x128xbf16> to vector<4x128xbf16>
    %cst_59 = arith.constant dense<0.000000e+00> : vector<256x128xf32>
    %82 = tpu.matmul %79, %81, %cst_59 {dimension_numbers = #tpu.dot_dimension_numbers<[1], [0], [0], [1], [0, 0, 1, 1], [], []>} : vector<256x4xbf16>, vector<4x128xbf16>, vector<256x128xf32> -> vector<256x128xf32>
    %83 = arith.addf %74, %82 : vector<256x128xf32>
    %c0_60 = arith.constant 0 : index
    %c0_61 = arith.constant 0 : index
    %84 = vector.load %arg5[%c0_60, %c0_61] : memref<1x128xf32, #tpu.memory_space<vmem>>, vector<1x128xf32>
    %85 = vector.broadcast %84 : vector<1x128xf32> to vector<256x128xf32>
    %86 = arith.addf %83, %85 : vector<256x128xf32>
    %cst_62 = arith.constant 0.000000e+00 : f32
    %87 = vector.broadcast %cst_62 : f32 to vector<256x128xf32>
    %88 = arith.maximumf %86, %87 : vector<256x128xf32>
    %c0_63 = arith.constant 0 : index
    %c0_64 = arith.constant 0 : index
    %c0_65 = arith.constant 0 : index
    %89 = vector.load %arg6[%c0_63, %c0_64, %c0_65] : memref<1x256x128xf32, #tpu.memory_space<vmem>>, vector<1x256x128xf32>
    %90 = vector.shape_cast %89 : vector<1x256x128xf32> to vector<256x128xf32>
    %91 = vector.shape_cast %88 : vector<256x128xf32> to vector<1x256x128xf32>
    tpu.vector_store %arg6[%c0_63, %c0_64, %c0_65], %91 {strides = array<i32>} : memref<1x256x128xf32, #tpu.memory_space<vmem>>, vector<1x256x128xf32>,
    return
  }
  func.func @transform_0(%arg0: i32, %arg1: i32, %arg2: i32) -> (i32, i32, i32, i32) {
    %c0_i32 = arith.constant 0 : i32
    %c0_i32_0 = arith.constant 0 : i32
    %c0_i32_1 = arith.constant 0 : i32
    %c0_i32_2 = arith.constant 0 : i32
    return %arg0, %c0_i32, %c0_i32_0, %c0_i32_1 : i32, i32, i32, i32
  }
  func.func @transform_1(%arg0: i32, %arg1: i32, %arg2: i32) -> (i32, i32, i32) {
    %c0_i32 = arith.constant 0 : i32
    %c0_i32_0 = arith.constant 0 : i32
    %c0_i32_1 = arith.constant 0 : i32
    return %c0_i32, %c0_i32_0, %arg1 : i32, i32, i32
  }
  func.func @transform_2(%arg0: i32, %arg1: i32, %arg2: i32) -> (i32, i32) {
    %c0_i32 = arith.constant 0 : i32
    %c0_i32_0 = arith.constant 0 : i32
    return %c0_i32, %arg1 : i32, i32
  }
  func.func @transform_3(%arg0: i32, %arg1: i32, %arg2: i32) -> (i32, i32, i32) {
    %c0_i32 = arith.constant 0 : i32
    return %arg0, %arg2, %arg1 : i32, i32, i32
  }
}

</mosaic_0001>

<bundles_post_ra>
// kernel: tpu_custom_call.1
= control target key start
LH: loop header
LB: loop body
LE: loop exit
PB: predicated region body
PF: predicated region fallthrough
CT: control target
= control target key end

     0   :  { %8 = vsyncpa [#allocation3], 0  ;;  %s9003_s0 = inlined_call_operand.vmem [shape: bf16[2,18,18,4], index: 0, kind: input, shape index: {}]   ;;  %s9004_s1 = inlined_call_operand.vmem [shape: bf16[9,4,128], index: 1, kind: input, shape index: {}]   ;;  %s9005_s2 = inlined_call_operand.vmem [shape: f32[1,128], index: 2, kind: input, shape index: {}]   ;;  %s9006_s3 = inlined_call_operand.hbm [shape: f32[2,256,128], index: 3, kind: output, shape index: {}]  }
   0x1   :  { %10 = vsyncpa [#allocation3 + $0x1], 0  ;;  %s6260_s12 = smov 0   ;;  %s6262_s13 = smov 0  }
   0x2   :  { %s6264_s14 = smov 0   ;;  %s6266_s15 = smov 0  }
   0x3   :  { %s6268_s16 = smov 0   ;;  %s6270_s17 = smov 0  }
   0x4 LB: > { %s5028_s18 = sadd.s32 4294967295, %s6235_s17   ;;  %s5029_s19 = sadd.s32 4294967294, %s6235_s17   ;;  %s6235_s17 = sphi %s6270_s17, %s16_s17   ;;  %s6231_s16 = sphi %s6268_s16, %s9287_s16   ;;  %s6227_s15 = sphi %s6266_s15, %s9286_s15   ;;  %s6223_s14 = sphi %s6264_s14, %s9285_s14   ;;  %s6219_s13 = sphi %s6262_s13, %s9284_s13   ;;  %s6215_s12 = sphi %s6260_s12, %s9283_s12  }
   0x5   : > { %s35_s20 = sadd.s32 1, %s6231_s16  ;;  %s124_s21 = sadd.s32 1, %s6223_s14 }
   0x6   : > { %p37_p0 = scmp.ge.s32.totalorder %s35_s20, 2  ;;  %p134_p1 = scmp.ne.s32.totalorder %s6223_s14, %s6219_s13 }
   0x7   : > { %p135_p2 = scmp.eq.s32.totalorder %s5028_s18, 1  ;;  %p140_p3 = scmp.ne.s32.totalorder %s6219_s13, %s6215_s12 }
   0x8   : > { %s9289_s20 = smov (%p37_p0, %s35_s20), 0  ;;  %p141_p5 = scmp.eq.s32.totalorder %s5029_s19, 1 }
   0x9   : > { %p6300_p4 = por %p135_p2, %p134_p1  ;;  %s117_s23 = ssub.s32 %s6231_s16, %s9289_s20 }
   0xa   : > { %p5034_p6 = scmp.ge.s32.totalorder %s6235_s17, 1  ;;  %p122_p7 = scmp.eq.s32.totalorder %s117_s23, 0 }
   0xb   : > { %p6307_p8 = por %p141_p5, %p140_p3  ;;  %p180_p9 = scmp.lt.s32.totalorder %s6235_s17, 3 }
   0xc   : > { %s6313_s25 = scalar_select %p122_p7, %s6223_s14, %s124_s21  }
   0xd   : > { %p181_p10 = pnand %p5034_p6, %p180_p9 }
   0xf   : > { %184 = sbr.rel (%p181_p10) target bundleno = 579 (0x243), region = 32 }
  0x14   : > { %v5037_v0 = vld [vmem:[%s9004_s1 + $0x2] sm:$0x3]  ;;  %vm764_vm0 = vcmask 1041408   ;;  %p211_p11 = scmp.lt.s32.totalorder %s6227_s15, 1  ;;  %v261_v2 = vld [vmem:[%s9004_s1] sm:$0x3] }
  0x15   : > { %6042 = vmatprep.subr.msk.bf16.mxu1 %vm764_vm0, %v5037_v0  ;;  %6041 = vmatprep.subr.msk.bf16.mxu0 %vm764_vm0, %v5037_v0  ;;  %v766_v1 = vsel %vm764_vm0, %v5037_v0, 0  ;;  %v5118_v3 = vld [vmem:[%s9004_s1 + $0x4] sm:$0x3]  ;;  %vm278_vm1 = vsmask.f32 3328  ;;  %v6337_v4 = vsel %vm764_vm0, %v261_v2, 0 }
  0x16   : > { %6040 = vmatpush3.bf16.msra.mxu1 %v766_v1  ;;  %5734 = vmatpush3.bf16.msra.mxu0 %v766_v1  ;;  %s212_s30 = scalar_select %p211_p11, %s6227_s15, 1  ;;  %vm279_vm2 = vsmask.f32 7440  ;;  %vm715_vm3 = vcmask 31744   ;;  %v6363_v16 = vsel %vm764_vm0, %v5118_v3, 0  ;;  %vm1269_vm5 = vcmask 1042432  }
  0x17   : > { %6043 = vmatprep.subr.msk.bf16.mxu1 %vm764_vm0, %v261_v2  ;;  %6044 = vmatprep.subr.msk.bf16.mxu0 %vm764_vm0, %v5118_v3  ;;  %vm6378_vm4 = vmor %vm278_vm1, %vm279_vm2  ;;  %vm1270_vm6 = vcmask 1046532   ;;  %s208_s5 = sand.u32 1, %s6219_s13   ;;  %s5579_s10 = sshll.u32 %s6227_s15, 12 }
  0x18   : > { %s6051_s6 = smul.u32 216, %s212_s30  ;;  %vm6664_vm7 = vmor %vm1269_vm5, %vm1270_vm6  ;;  %s5035_s8 = sshll.u32 %s208_s5, 8 }
  0x19   : > { %s8950_s21 = scalar_lea.hbm %s9006_s3, %s5579_s10  ;;  %s8958_s15 = scalar_lea.sflag [#allocation3], %s208_s5 }
  0x1a   : > { %s6334_s9 = scalar_lea.vmem %s9003_s0, %s6051_s6  ;;  %s6237_s26 = smov [#allocation2]  }
  0x1b   : > { %v6340_v5 = vld [vmem:[%s6334_s9] sm:$0xf]  ;;  %v6343_v6 = vld [vmem:[%s6334_s9 + $0x4] sm:$0xf]  ;;  %v6346_v7 = vld [vmem:[%s6334_s9 + $0x8] sm:$0x1] }
  0x1c   : > { %v282_v8 = vshrl.u32 %v6340_v5, 16  ;;  %v285_v9 = vshll.u32 %v6340_v5, 16  ;;  %v291_v10 = vshll.u32 %v6343_v6, 16  ;;  %v295_v11 = vshrl.u32 %v6343_v6, 16  ;;  %v6353_v12 = vld [vmem:[%s6334_s9 + $0x60] sm:$0xf] }
  0x1d   : > { %v301_v13 = vshll.u32 %v6346_v7, 16  ;;  %v6357_v14 = vld [vmem:[%s6334_s9 + $0x64] sm:$0xf]  ;;  %v6360_v15 = vld [vmem:[%s6334_s9 + $0x68] sm:$0x1]  ;;  %v474_v22 = vshrl.u32 %v6353_v12, 16 }
  0x1e   : > { %v284_v17 = vrot.slane %v282_v8, 4  ;;  %v287_v18 = vrot.slane %v285_v9, 5  ;;  %v293_v19 = vrot.slane %v291_v10, 5  ;;  %v297_v20 = vrot.slane %v295_v11, 4  ;;  %v6371_v29 = vld [vmem:[%s6334_s9 + $0xc] sm:$0xf] }
  0x1f   : > { %v303_v21 = vrot.slane %v301_v13, 5  ;;  %v477_v23 = vshll.u32 %v6353_v12, 16  ;;  %v483_v24 = vshll.u32 %v6357_v14, 16  ;;  %v487_v27 = vshrl.u32 %v6357_v14, 16  ;;  %v6374_v30 = vld [vmem:[%s6334_s9 + $0x10] sm:$0xf] }
  0x20   : > { %v288_v25 = vor.u32 %v287_v18, %v284_v17  ;;  %v298_v26 = vor.u32 %v297_v20, %v293_v19  ;;  %v493_v28 = vshll.u32 %v6360_v15, 16  ;;  %v476_v33 = vrot.slane %v474_v22, 4  ;;  %v6384_v41 = vld [vmem:[%s6334_s9 + $0x14] sm:$0x1]  ;;  %v6395_v53 = vld [vmem:[%s6334_s9 + $0x6c] sm:$0xf] }
  0x21   : > { %v479_v34 = vrot.slane %v477_v23, 5  ;;  %v485_v35 = vrot.slane %v483_v24, 5  ;;  %v489_v38 = vrot.slane %v487_v27, 4  ;;  %v306_v42 = vshrl.u32 %v6371_v29, 16  ;;  %v6399_v58 = vld [vmem:[%s6334_s9 + $0x70] sm:$0xf] }
  0x22   : > { %v289_v36 = vrot.slane %v288_v25, 4  ;;  %v299_v37 = vrot.slane %v298_v26, 4  ;;  %v495_v39 = vrot.slane %v493_v28, 5  ;;  %v309_v43 = vshll.u32 %v6371_v29, 16  ;;  %v6407_v63 = vld [vmem:[%s6334_s9 + $0x74] sm:$0x1] }
  0x23   : > { %v480_v40 = vor.u32 %v479_v34, %v476_v33  ;;  %v315_v44 = vshll.u32 %v6374_v30, 16  ;;  %v490_v47 = vor.u32 %v489_v38, %v485_v35  ;;  %v319_v48 = vshrl.u32 %v6374_v30, 16  ;;  %v6413_v8 = vld [vmem:[%s6334_s9 + $0x18] sm:$0xf]  ;;  %v6426_v25 = vld [vmem:[%s6334_s9 + $0x20] sm:$0x1] }
  0x24   : > { %v294_v45 = vsel %vm6378_vm4, %v289_v36, %v293_v19  ;;  %v304_v46 = vsel %vm6378_vm4, %v299_v37, %v303_v21  ;;  %v308_v51 = vrot.slane %v306_v42, 4  ;;  %v311_v52 = vrot.slane %v309_v43, 5  ;;  %v6420_v21 = vld [vmem:[%s6334_s9 + $0x1c] sm:$0xf]  ;;  %s6163_s27 = sshll.u32 %s6237_s26, 4  ;;  %s6164_s27 = int_to_ptr.vmem [resolvable:$false] %s6163_s27 }
  0x25   : > { %v5038_v49 = vcombine.low %v294_v45, %v304_v46  ;;  %v481_v50 = vrot.slane %v480_v40, 4  ;;  %v491_v54 = vrot.slane %v490_v47, 4  ;;  %v317_v55 = vrot.slane %v315_v44, 5  ;;  %v6439_v40 = vld [vmem:[%s9004_s1 + $0x8] sm:$0x3]  ;;  %s6165_s28 = scalar_lea.vmem %s6164_s27, 8192 }
  0x26   : > { %v321_v56 = vrot.slane %v319_v48, 4  ;;  %v325_v57 = vshll.u32 %v6384_v41, 16  ;;  %v312_v60 = vor.u32 %v311_v52, %v308_v51  ;;  %v498_v3 = vshrl.u32 %v6395_v53, 16  ;;  %v6444_v46 = vld [vmem:[%s6334_s9 + $0x7c] sm:$0xf] }
  0x27   : > { %5735 = vmatprep.mubr.msk.bf16.mxu0 %vm715_vm3, %v5038_v49  ;;  %v486_v59 = vsel %vm6378_vm4, %v481_v50, %v485_v35  ;;  %v496_v0 = vsel %vm6378_vm4, %v491_v54, %v495_v39  ;;  %v501_v11 = vshll.u32 %v6395_v53, 16  ;;  %v507_v13 = vshll.u32 %v6399_v58, 16  ;;  %v6433_v35 = vld [vmem:[%s6334_s9 + $0x78] sm:$0xf] }
  0x28   : > { %v322_v1 = vor.u32 %v321_v56, %v317_v55  ;;  %v327_v2 = vrot.slane %v325_v57, 5  ;;  %v5046_v9 = vcombine.low %v486_v59, %v496_v0  ;;  %v313_v10 = vrot.slane %v312_v60, 4  ;;  %v6451_v56 = vld [vmem:[%s6334_s9 + $0x80] sm:$0x1] }
  0x29   : > { %v500_v18 = vrot.slane %v498_v3, 4  ;;  %v511_v19 = vshrl.u32 %v6399_v58, 16  ;;  %v517_v20 = vshll.u32 %v6407_v63, 16  ;;  %v503_v23 = vrot.slane %v501_v11, 5  ;;  %9044 = vst [vmem:[#allocation5_spill] sm:$0xff] %v6451_v56 }
  0x2a   : > { %v323_v17 = vrot.slane %v322_v1, 4  ;;  %5751 = vmatprep.mubr.msk.bf16.mxu1 %vm715_vm3, %v5046_v9  ;;  %v318_v22 = vsel %vm6378_vm4, %v313_v10, %v317_v55  ;;  %v509_v24 = vrot.slane %v507_v13, 5  ;;  %v330_v26 = vshrl.u32 %v6413_v8, 16  ;;  %v6457_v1 = vld [vmem:[%s6334_s9 + $0x24] sm:$0xf] }
  0x2b   : > { %v513_v28 = vrot.slane %v511_v19, 4  ;;  %v519_v33 = vrot.slane %v517_v20, 5  ;;  %v333_v34 = vshll.u32 %v6413_v8, 16  ;;  %v504_v37 = vor.u32 %v503_v23, %v500_v18  ;;  %v6465_v10 = vld [vmem:[%s6334_s9 + $0x28] sm:$0xf] }
  0x2c   : > { %v328_v27 = vsel %vm6378_vm4, %v323_v17, %v327_v2  ;;  %v332_v38 = vrot.slane %v330_v26, 4  ;;  %v339_v39 = vshll.u32 %v6420_v21, 16  ;;  %v343_v44 = vshrl.u32 %v6420_v21, 16  ;;  %v6471_v19 = vld [vmem:[%s9004_s1 + $0x6] sm:$0x3] }
  0x2d   : > { %v5039_v36 = vcombine.low %v318_v22, %v328_v27  ;;  %v514_v42 = vor.u32 %v513_v28, %v509_v24  ;;  %v335_v43 = vrot.slane %v333_v34, 5  ;;  %v349_v45 = vshll.u32 %v6426_v25, 16 }
  0x2e   : > { %v505_v47 = vrot.slane %v504_v37, 4  ;;  %v341_v48 = vrot.slane %v339_v39, 5  ;;  %v522_v49 = vshrl.u32 %v6433_v35, 16  ;;  %v525_v50 = vshll.u32 %v6433_v35, 16 }
  0x2f   : > { %5736 = vmatmul.mubr.msk.bf16.vlgmr.msra.gmra.mxu0 %vm715_vm3, %v5039_v36  ;;  %v515_v51 = vrot.slane %v514_v42, 4  ;;  %v336_v52 = vor.u32 %v335_v43, %v332_v38  ;;  %v345_v54 = vrot.slane %v343_v44, 4  ;;  %v351_v55 = vrot.slane %v349_v45, 5  ;;  %v6483_v36 = vld [vmem:[%s6334_s9 + $0x84] sm:$0xf] }
  0x30   : > { %5802 = vmatpush3.bf16.msra.mxu0 %v6363_v16  ;;  %v510_v57 = vsel %vm6378_vm4, %v505_v47, %v509_v24  ;;  %v524_v59 = vrot.slane %v522_v49, 4  ;;  %v527_v60 = vrot.slane %v525_v50, 5  ;;  %v531_v0 = vshll.u32 %v6444_v46, 16  ;;  %v6476_v24 = vld [vmem:[%s6334_s9 + $0x2c] sm:$0x1] }
  0x31   : > { %6046 = vmatprep.subr.msk.bf16.mxu0 %vm764_vm0, %v6439_v40  ;;  %v520_v16 = vsel %vm6378_vm4, %v515_v51, %v519_v33  ;;  %v337_v2 = vrot.slane %v336_v52, 4  ;;  %v346_v3 = vor.u32 %v345_v54, %v341_v48  ;;  %v535_v9 = vshrl.u32 %v6444_v46, 16  ;;  %v6490_v43 = vld [vmem:[%s6334_s9 + $0x88] sm:$0xf]  ;;  %v6498_v51 = vld [vmem:[%s6334_s9 + $0x8c] sm:$0x1] }
  0x32   : > { %v5047_v11 = vcombine.low %v510_v57, %v520_v16  ;;  %v528_v13 = vor.u32 %v527_v60, %v524_v59  ;;  %v533_v17 = vrot.slane %v531_v0, 5  ;;  %v541_v18 = vshll.u32 %v6451_v56, 16  ;;  %9045 = vst [vmem:[#allocation6_spill] sm:$0xff] %v6498_v51  ;;  %v6506_v60 = vld [vmem:[%s6334_s9 + $0x30] sm:$0xf] }
  0x33   : > { %v342_v20 = vsel %vm6378_vm4, %v337_v2, %v341_v48  ;;  %v347_v22 = vrot.slane %v346_v3, 4  ;;  %v537_v23 = vrot.slane %v535_v9, 4  ;;  %v354_v26 = vshrl.u32 %v6457_v1, 16  ;;  %v6511_v9 = vld [vmem:[%s6334_s9 + $0x34] sm:$0xf] }
  0x34   : > { %5752 = vmatmul.mubr.msk.bf16.vlgmr.msra.gmra.mxu1 %vm715_vm3, %v5047_v11  ;;  %v529_v27 = vrot.slane %v528_v13, 4  ;;  %v543_v28 = vrot.slane %v541_v18, 5  ;;  %v357_v33 = vshll.u32 %v6457_v1, 16  ;;  %v363_v34 = vshll.u32 %v6465_v10, 16 }
  0x35   : > { %5768 = vmatpush3.bf16.msra.mxu1 %v6337_v4  ;;  %v352_v37 = vsel %vm6378_vm4, %v347_v22, %v351_v55  ;;  %v538_v38 = vor.u32 %v537_v23, %v533_v17  ;;  %v356_v39 = vrot.slane %v354_v26, 4  ;;  %v367_v42 = vshrl.u32 %v6465_v10, 16 }
  0x36   : > { %v5040_v44 = vcombine.low %v342_v20, %v352_v37  ;;  %v534_v45 = vsel %vm6378_vm4, %v529_v27, %v533_v17  ;;  %v359_v47 = vrot.slane %v357_v33, 5  ;;  %v365_v48 = vrot.slane %v363_v34, 5  ;;  %6045 = vmatprep.subr.msk.bf16.mxu1 %vm764_vm0, %v6471_v19  ;;  %v6519_v33 = vld [vmem:[%s6334_s9 + $0x38] sm:$0x1] }
  0x37   : > { %v539_v4 = vrot.slane %v538_v38, 4  ;;  %v369_v49 = vrot.slane %v367_v42, 4  ;;  %v373_v50 = vshll.u32 %v6476_v24, 16  ;;  %v546_v52 = vshrl.u32 %v6483_v36, 16  ;;  %v6524_v38 = vld [vmem:[%s6334_s9 + $0x90] sm:$0xf] }
  0x38   : > { %5739 = vmatprep.mubr.msk.bf16.mxu0 %vm715_vm3, %v5040_v44  ;;  %v360_v54 = vor.u32 %v359_v47, %v356_v39  ;;  %v549_v55 = vshll.u32 %v6483_v36, 16  ;;  %v555_v57 = vshll.u32 %v6490_v43, 16  ;;  %v559_v59 = vshrl.u32 %v6490_v43, 16  ;;  %9046 = vst [vmem:[#allocation7_spill] sm:$0xff] %v6524_v38  ;;  %v6529_v47 = vld [vmem:[%s6334_s9 + $0x94] sm:$0xf] }
  0x39   : > { %v544_v0 = vsel %vm6378_vm4, %v539_v4, %v543_v28  ;;  %v370_v16 = vor.u32 %v369_v49, %v365_v48  ;;  %v375_v2 = vrot.slane %v373_v50, 5  ;;  %v548_v3 = vrot.slane %v546_v52, 4  ;;  %9047 = vst [vmem:[#allocation8_spill] sm:$0xff] %v6529_v47 }
  0x3a   : > { %v5048_v11 = vcombine.low %v534_v45, %v544_v0  ;;  %v361_v13 = vrot.slane %v360_v54, 4  ;;  %v551_v17 = vrot.slane %v549_v55, 5  ;;  %v557_v18 = vrot.slane %v555_v57, 5 }
  0x3b   : > { %v371_v20 = vrot.slane %v370_v16, 4  ;;  %v561_v22 = vrot.slane %v559_v59, 4  ;;  %v565_v23 = vshll.u32 %v6498_v51, 16  ;;  %v378_v26 = vshrl.u32 %v6506_v60, 16  ;;  %v6538_v16 = vld [vmem:[%s6334_s9 + $0x98] sm:$0x1] }
  0x3c   : > { %5755 = vmatprep.mubr.msk.bf16.mxu1 %vm715_vm3, %v5048_v11  ;;  %v366_v27 = vsel %vm6378_vm4, %v361_v13, %v365_v48  ;;  %v552_v28 = vor.u32 %v551_v17, %v548_v3  ;;  %v381_v34 = vshll.u32 %v6506_v60, 16  ;;  %v387_v37 = vshll.u32 %v6511_v9, 16  ;;  %9048 = vst [vmem:[#allocation9_spill] sm:$0xff] %v6538_v16  ;;  %v6543_v11 = vld [vmem:[%s6334_s9 + $0x3c] sm:$0xf] }
  0x3d   : > { %v376_v39 = vsel %vm6378_vm4, %v371_v20, %v375_v2  ;;  %v562_v42 = vor.u32 %v561_v22, %v557_v18  ;;  %v567_v44 = vrot.slane %v565_v23, 5  ;;  %v380_v45 = vrot.slane %v378_v26, 4  ;;  %v6548_v23 = vld [vmem:[%s6334_s9 + $0x40] sm:$0xf]  ;;  %v1222_v51 = vld [vmem:[%s6334_s9 + $0xc] sm:$0xe] }
  0x3e   : > { %v5041_v48 = vcombine.low %v366_v27, %v376_v39  ;;  %v553_v4 = vrot.slane %v552_v28, 4  ;;  %v383_v49 = vrot.slane %v381_v34, 5  ;;  %v389_v50 = vrot.slane %v387_v37, 5 }
  0x3f   : > { %v563_v52 = vrot.slane %v562_v42, 4  ;;  %v391_v54 = vshrl.u32 %v6511_v9, 16  ;;  %v397_v55 = vshll.u32 %v6519_v33, 16  ;;  %v570_v57 = vshrl.u32 %v6524_v38, 16 }
  0x40   : > { %5740 = vmatmul.mubr.msk.bf16.gmra.mxu0 %vm715_vm3, %v5041_v48  ;;  %v558_v59 = vsel %vm6378_vm4, %v553_v4, %v557_v18  ;;  %v384_v0 = vor.u32 %v383_v49, %v380_v45  ;;  %v573_v2 = vshll.u32 %v6524_v38, 16  ;;  %v579_v3 = vshll.u32 %v6529_v47, 16  ;;  %v6557_v48 = vld [vmem:[%s6334_s9 + $0x44] sm:$0x1] }
  0x41   : > { %v568_v13 = vsel %vm6378_vm4, %v563_v52, %v567_v44  ;;  %v393_v17 = vrot.slane %v391_v54, 4  ;;  %v399_v20 = vrot.slane %v397_v55, 5  ;;  %v572_v22 = vrot.slane %v570_v57, 4  ;;  %v6562_v52 = vld [vmem:[%s6334_s9 + $0x9c] sm:$0xf] }
  0x42   : > { %v5049_v18 = vcombine.low %v558_v59, %v568_v13  ;;  %v385_v26 = vrot.slane %v384_v0, 4  ;;  %v575_v27 = vrot.slane %v573_v2, 5  ;;  %v581_v28 = vrot.slane %v579_v3, 5  ;;  %9049 = vst [vmem:[#allocation10_spill] sm:$0xff] %v6562_v52  ;;  %v6566_v13 = vld [vmem:[%s6334_s9 + $0xa0] sm:$0xf] }
  0x43   : > { %v394_v34 = vor.u32 %v393_v17, %v389_v50  ;;  %v583_v37 = vshrl.u32 %v6529_v47, 16  ;;  %v589_v39 = vshll.u32 %v6538_v16, 16  ;;  %v402_v42 = vshrl.u32 %v6543_v11, 16  ;;  %9050 = vst [vmem:[#allocation11_spill] sm:$0xff] %v6566_v13 }
  0x44   : > { %5756 = vmatmul.mubr.msk.bf16.gmra.mxu1 %vm715_vm3, %v5049_v18  ;;  %v390_v44 = vsel %vm6378_vm4, %v385_v26, %v389_v50  ;;  %v576_v45 = vor.u32 %v575_v27, %v572_v22  ;;  %v405_v4 = vshll.u32 %v6543_v11, 16  ;;  %v411_v49 = vshll.u32 %v6548_v23, 16  ;;  %v6572_v26 = vld [vmem:[%s6334_s9 + $0xa4] sm:$0x1] }
  0x45   : > { %v395_v54 = vrot.slane %v394_v34, 4  ;;  %v585_v55 = vrot.slane %v583_v37, 4  ;;  %v591_v57 = vrot.slane %v589_v39, 5  ;;  %v404_v59 = vrot.slane %v402_v42, 4  ;;  %9051 = vst [vmem:[#allocation12_spill] sm:$0xff] %v6572_v26 }
  0x46   : > { %v577_v0 = vrot.slane %v576_v45, 4  ;;  %v407_v2 = vrot.slane %v405_v4, 5  ;;  %v413_v3 = vrot.slane %v411_v49, 5  ;;  %v415_v50 = vshrl.u32 %v6548_v23, 16  ;;  %v6576_v34 = vld [vmem:[%s6334_s9 + $0x48] sm:$0xf] }
  0x47   : > { %v400_v17 = vsel %vm6378_vm4, %v395_v54, %v399_v20  ;;  %v586_v22 = vor.u32 %v585_v55, %v581_v28  ;;  %v421_v18 = vshll.u32 %v6557_v48, 16  ;;  %v594_v27 = vshrl.u32 %v6562_v52, 16 }
  0x48   : > { %v5042_v37 = vcombine.low %v390_v44, %v400_v17  ;;  %v582_v39 = vsel %vm6378_vm4, %v577_v0, %v581_v28  ;;  %v408_v42 = vor.u32 %v407_v2, %v404_v59  ;;  %v417_v45 = vrot.slane %v415_v50, 4  ;;  %v6585_v17 = vld [vmem:[%s6334_s9 + $0x4c] sm:$0xf]  ;;  %v6591_v2 = vld [vmem:[%s6334_s9 + $0x50] sm:$0x1] }
  0x49   : > { %v587_v4 = vrot.slane %v586_v22, 4  ;;  %v423_v49 = vrot.slane %v421_v18, 5  ;;  %v596_v20 = vrot.slane %v594_v27, 4  ;;  %v597_v54 = vshll.u32 %v6562_v52, 16 }
  0x4a   : > { %5743 = vmatprep.mubr.msk.bf16.mxu0 %vm715_vm3, %v5042_v37  ;;  %v409_v55 = vrot.slane %v408_v42, 4  ;;  %v418_v62 = vor.u32 %v417_v45, %v413_v3  ;;  %v603_v32 = vshll.u32 %v6566_v13, 16  ;;  %v607_v44 = vshrl.u32 %v6566_v13, 16  ;;  %v6597_v42 = vld [vmem:[%s6334_s9 + $0xa8] sm:$0xf] }
  0x4b   : > { %v592_v28 = vsel %vm6378_vm4, %v587_v4, %v591_v57  ;;  %v599_v59 = vrot.slane %v597_v54, 5  ;;  %v613_v0 = vshll.u32 %v6572_v26, 16  ;;  %v426_v50 = vshrl.u32 %v6576_v34, 16  ;;  %9052 = vst [vmem:[#allocation13_spill] sm:$0xff] %v6597_v42 }
  0x4c   : > { %v5050_v22 = vcombine.low %v582_v39, %v592_v28  ;;  %v414_v18 = vsel %vm6378_vm4, %v409_v55, %v413_v3  ;;  %v419_v27 = vrot.slane %v418_v62, 4  ;;  %v605_v37 = vrot.slane %v603_v32, 5 }
  0x4d   : > { %v600_v45 = vor.u32 %v599_v59, %v596_v20  ;;  %v609_v61 = vrot.slane %v607_v44, 4  ;;  %v615_v57 = vrot.slane %v613_v0, 5  ;;  %v428_v4 = vrot.slane %v426_v50, 4  ;;  %v6607_v44 = vld [vmem:[%s6334_s9 + $0xac] sm:$0xf] }
  0x4e   : > { %5759 = vmatprep.mubr.msk.bf16.mxu1 %vm715_vm3, %v5050_v22  ;;  %v424_v54 = vsel %vm6378_vm4, %v419_v27, %v423_v49  ;;  %v429_v39 = vshll.u32 %v6576_v34, 16  ;;  %v435_v28 = vshll.u32 %v6585_v17, 16  ;;  %v439_v62 = vshrl.u32 %v6585_v17, 16  ;;  %9053 = vst [vmem:[#allocation14_spill] sm:$0xff] %v6607_v44  ;;  %v6610_v22 = vld [vmem:[%s6334_s9 + $0xb0] sm:$0x1] }
  0x4f   : > { %v5043_v3 = vcombine.low %v414_v18, %v424_v54  ;;  %v601_v32 = vrot.slane %v600_v45, 4  ;;  %v610_v55 = vor.u32 %v609_v61, %v605_v37  ;;  %v445_v20 = vshll.u32 %v6591_v2, 16  ;;  %9054 = vst [vmem:[#allocation15_spill] sm:$0xff] %v6610_v22 }
  0x50   : > { %v431_v59 = vrot.slane %v429_v39, 5  ;;  %v437_v0 = vrot.slane %v435_v28, 5  ;;  %v441_v50 = vrot.slane %v439_v62, 4  ;;  %v618_v49 = vshrl.u32 %v6597_v42, 16  ;;  %v6619_v62 = vld [vmem:[%s6334_s9 + $0x54] sm:$0xf] }
  0x51   : > { %5744 = vmatmul.mubr.msk.bf16.gmra.mxu0 %vm715_vm3, %v5043_v3  ;;  %v606_v18 = vsel %vm6378_vm4, %v601_v32, %v605_v37  ;;  %v611_v27 = vrot.slane %v610_v55, 4  ;;  %v447_v61 = vrot.slane %v445_v20, 5  ;;  %v621_v45 = vshll.u32 %v6597_v42, 16  ;;  %v6626_v55 = vld [vmem:[%s6334_s9 + $0x58] sm:$0xf] }
  0x52   : > { %v432_v54 = vor.u32 %v431_v59, %v428_v4  ;;  %v442_v56 = vor.u32 %v441_v50, %v437_v0  ;;  %v620_v39 = vrot.slane %v618_v49, 4  ;;  %v627_v28 = vshll.u32 %v6607_v44, 16  ;;  %v6629_v49 = vld [vmem:[%s6334_s9 + $0x5c] sm:$0x1] }
  0x53   : > { %v616_v3 = vsel %vm6378_vm4, %v611_v27, %v615_v57  ;;  %v623_v26 = vrot.slane %v621_v45, 5  ;;  %v631_v37 = vshrl.u32 %v6607_v44, 16  ;;  %v637_v32 = vshll.u32 %v6610_v22, 16  ;;  %v1221_v22 = vld [vmem:[%s6334_s9] sm:$0xe] }
  0x54   : > { %v5051_v4 = vcombine.low %v606_v18, %v616_v3  ;;  %v433_v20 = vrot.slane %v432_v54, 4  ;;  %v443_v59 = vrot.slane %v442_v56, 4  ;;  %v629_v50 = vrot.slane %v627_v28, 5  ;;  %v6640_v54 = vld [vmem:[%s6334_s9 + $0xb4] sm:$0xf] }
  0x55   : > { %v624_v42 = vor.u32 %v623_v26, %v620_v39  ;;  %v633_v52 = vrot.slane %v631_v37, 4  ;;  %v639_v13 = vrot.slane %v637_v32, 5  ;;  %v450_v57 = vshrl.u32 %v6619_v62, 16  ;;  %9055 = vst [vmem:[#allocation16_spill] sm:$0xff] %v6640_v54  ;;  %v6643_v37 = vld [vmem:[%s6334_s9 + $0xb8] sm:$0xf] }
  0x56   : > { %5760 = vmatmul.mubr.msk.bf16.gmra.mxu1 %vm715_vm3, %v5051_v4  ;;  %v438_v27 = vsel %vm6378_vm4, %v433_v20, %v437_v0  ;;  %v448_v18 = vsel %vm6378_vm4, %v443_v59, %v447_v61  ;;  %v453_v56 = vshll.u32 %v6619_v62, 16  ;;  %v459_v45 = vshll.u32 %v6626_v55, 16  ;;  %v6648_v61 = vld [vmem:[%s6334_s9 + $0xbc] sm:$0x1] }
  0x57   : > { %v5044_v26 = vcombine.low %v438_v27, %v448_v18  ;;  %v625_v39 = vrot.slane %v624_v42, 4  ;;  %v634_v28 = vor.u32 %v633_v52, %v629_v50  ;;  %v452_v3 = vrot.slane %v450_v57, 4 }
  0x58   : > { %v455_v32 = vrot.slane %v453_v56, 5  ;;  %v461_v4 = vrot.slane %v459_v45, 5  ;;  %v463_v0 = vshrl.u32 %v6626_v55, 16  ;;  %v469_v20 = vshll.u32 %v6629_v49, 16 }
  0x59   : > { %5747 = vmatprep.mubr.msk.bf16.mxu0 %vm715_vm3, %v5044_v26  ;;  %v630_v59 = vsel %vm6378_vm4, %v625_v39, %v629_v50  ;;  %v635_v27 = vrot.slane %v634_v28, 4  ;;  %v642_v52 = vshrl.u32 %v6640_v54, 16  ;;  %v645_v42 = vshll.u32 %v6640_v54, 16 }
  0x5a   : > { %v456_v57 = vor.u32 %v455_v32, %v452_v3  ;;  %v465_v18 = vrot.slane %v463_v0, 4  ;;  %v471_v56 = vrot.slane %v469_v20, 5  ;;  %v651_v45 = vshll.u32 %v6643_v37, 16 }
  0x5b   : > { %v640_v44 = vsel %vm6378_vm4, %v635_v27, %v639_v13  ;;  %v644_v16 = vrot.slane %v642_v52, 4  ;;  %v647_v26 = vrot.slane %v645_v42, 5  ;;  %v655_v38 = vshrl.u32 %v6643_v37, 16 }
  0x5c   : > { %v5052_v50 = vcombine.low %v630_v59, %v640_v44  ;;  %v457_v39 = vrot.slane %v456_v57, 4  ;;  %v466_v28 = vor.u32 %v465_v18, %v461_v4  ;;  %v653_v47 = vrot.slane %v651_v45, 5  ;;  %v1223_v57 = vld [vmem:[%s6334_s9 + $0x18] sm:$0xe] }
  0x5d   : > { %v648_v54 = vor.u32 %v647_v26, %v644_v16  ;;  %v657_v3 = vrot.slane %v655_v38, 4  ;;  %v661_v32 = vshll.u32 %v6648_v61, 16  ;;  %v5102_v13 = vrot.slane %v1221_v22, 9 }
  0x5e   : > { %5763 = vmatprep.mubr.msk.bf16.mxu1 %vm715_vm3, %v5052_v50  ;;  %v462_v44 = vsel %vm6378_vm4, %v457_v39, %v461_v4  ;;  %v467_v20 = vrot.slane %v466_v28, 4  ;;  %v1274_v59 = vrot.slane %v6343_v6, 5  ;;  %v5071_v38 = vcombine.low %v6371_v29, %v6374_v30 }
  0x5f   : > { %v649_v16 = vrot.slane %v648_v54, 4  ;;  %v658_v27 = vor.u32 %v657_v3, %v653_v47  ;;  %v663_v52 = vrot.slane %v661_v32, 5  ;;  %v5103_v42 = vrot.slane %v1222_v51, 9 }
  0x60   : > { %v472_v18 = vsel %vm6378_vm4, %v467_v20, %v471_v56  ;;  %v1275_v22 = vsel %vm6664_vm7, %v5102_v13, %v1274_v59  ;;  %v1276_v45 = vrot.slane %v1274_v59, 4  ;;  %v9058_v4 = vrot.slane %v6374_v30, 5 }
  0x61   : > { %v5045_v50 = vcombine.low %v462_v44, %v472_v18  ;;  %v654_v54 = vsel %vm6378_vm4, %v649_v16, %v653_v47  ;;  %v659_v39 = vrot.slane %v658_v27, 4  ;;  %v5070_v51 = vcombine.low %v6340_v5, %v6343_v6  ;;  %v1224_v27 = vld [vmem:[%s6334_s9 + $0x24] sm:$0xe] }
  0x62   : > { %v1283_v26 = vrot.slane %v9058_v4, 4  ;;  %v9059_v28 = vrot.slane %v6346_v7, 5  ;;  %v9060_v3 = vmov %v9058_v4  ;;  %v5072_v13 = vcombine.low %v6413_v8, %v6420_v21  ;;  %v1226_v4 = vld [vmem:[%s6334_s9 + $0x3c] sm:$0xe] }
  0x63   : > { %v1282_v32 = vsel %vm6664_vm7, %v5103_v42, %v9060_v3  ;;  %v5104_v44 = vrot.slane %v1223_v57, 9  ;;  %5748 = vmatmul.mubr.msk.bf16.gmra.mxu0 %vm715_vm3, %v5045_v50  ;;  %v664_v47 = vsel %vm6378_vm4, %v659_v39, %v663_v52  ;;  %v9061_v6 = vrot.slane %v6384_v41, 5  ;;  %v1225_v42 = vld [vmem:[%s6334_s9 + $0x30] sm:$0xe]  ;;  %v1227_v39 = vld [vmem:[%s6334_s9 + $0x48] sm:$0xe] }
  0x64   : > { %v1278_v56 = vsel %vm6664_vm7, %v1276_v45, %v9059_v28  ;;  %v1288_v20 = vrot.slane %v6420_v21, 5  ;;  %v5053_v59 = vcombine.low %v654_v54, %v664_v47  ;;  %v1291_v16 = vrot.slane %v6426_v25, 5  ;;  %v1228_v47 = vld [vmem:[%s6334_s9 + $0x54] sm:$0xe]  ;;  %v6959_v21 = vld [vmem:[%s6334_s9 + $0x2c] sm:$0x1] }
  0x65   : > { %v5119_v5 = vcombine.low %v1275_v22, %v1278_v56  ;;  %v1285_v7 = vsel %vm6664_vm7, %v1283_v26, %v9061_v6  ;;  %v1845_v52 = vsel %vm764_vm0, %v6471_v19, 0  ;;  %v1295_v18 = vrot.slane %v6465_v10, 5 }
  0x66   : > { %v1289_v41 = vsel %vm6664_vm7, %v5104_v44, %v1288_v20  ;;  %v1290_v57 = vrot.slane %v1288_v20, 4  ;;  %5764 = vmatmul.mubr.msk.bf16.gmra.mxu1 %vm715_vm3, %v5053_v59  ;;  %v5120_v22 = vcombine.low %v1282_v32, %v1285_v7  ;;  %v2571_v25 = vsel %vm764_vm0, %v6439_v40, 0 }
  0x67   : > { %5803 = vmatprep.mubr.msk.bf16.mxu0 %vm715_vm3, %v5119_v5  ;;  %v1302_v45 = vrot.slane %v6511_v9, 5  ;;  %5769 = vmatprep.mubr.msk.bf16.mxu1 %vm715_vm3, %v5070_v51  ;;  %v5105_v26 = vrot.slane %v1224_v27, 9  ;;  %v1298_v50 = vrot.slane %v6476_v24, 5  ;;  %v5106_v54 = vrot.slane %v1225_v42, 9  ;;  %v6731_v24 = vld [vmem:[%s9004_s1 + $0xc] sm:$0x3] }
  0x68   : > { %v1292_v19 = vsel %vm6664_vm7, %v1290_v57, %v1291_v16  ;;  %v1297_v56 = vrot.slane %v1295_v18, 4  ;;  %v1305_v32 = vrot.slane %v6519_v33, 5  ;;  %v5107_v44 = vrot.slane %v1226_v4, 9 }
  0x69   : > { %v5121_v28 = vcombine.low %v1289_v41, %v1292_v19  ;;  %v1304_v3 = vrot.slane %v1302_v45, 4  ;;  %v1309_v40 = vrot.slane %v6548_v23, 5  ;;  %v1333_v5 = vrot.slane %v6360_v15, 5 }
  0x6a   : > { %v1312_v51 = vrot.slane %v6557_v48, 5  ;;  %v5108_v6 = vrot.slane %v1227_v39, 9  ;;  %v1316_v7 = vrot.slane %v6585_v17, 5  ;;  %v5073_v33 = vcombine.low %v6457_v1, %v6465_v10  ;;  %v1229_v1 = vld [vmem:[%s6334_s9 + $0x60] sm:$0xe] }
  0x6b   : > { %5804 = vmatmul.mubr.msk.bf16.vlgmr.msra.gmra.mxu0 %vm715_vm3, %v5120_v22  ;;  %v1296_v20 = vsel %vm6664_vm7, %v5105_v26, %v1295_v18  ;;  %v1311_v59 = vrot.slane %v1309_v40, 4  ;;  %v1319_v16 = vrot.slane %v6591_v2, 5  ;;  %v1299_v48 = vsel %vm6664_vm7, %v1297_v56, %v1298_v50  ;;  %v6759_v22 = vld [vmem:[%s9004_s1 + $0xa] sm:$0x3]  ;;  %v6784_v50 = vld [vmem:[%s6334_s9 + $0x6c] sm:$0xe] }
  0x6c   : > { %5870 = vmatpush3.bf16.msra.mxu0 %v2571_v25  ;;  %5807 = vmatprep.mubr.msk.bf16.mxu0 %vm715_vm3, %v5121_v28  ;;  %v1303_v27 = vsel %vm6664_vm7, %v5106_v54, %v1302_v45  ;;  %v1306_v42 = vsel %vm6664_vm7, %v1304_v3, %v1305_v32  ;;  %v1318_v41 = vrot.slane %v1316_v7, 4  ;;  %v6749_v10 = vsel %vm6664_vm7, %v5107_v44, %v1309_v40  ;;  %v1232_v39 = vld [vmem:[%s6334_s9 + $0x84] sm:$0xe]  ;;  %v6813_v44 = vld [vmem:[%s6334_s9 + $0x78] sm:$0xe] }
  0x6d   : > { %v6753_v2 = vsel %vm6664_vm7, %v5108_v6, %v1316_v7  ;;  %v5109_v57 = vrot.slane %v1228_v47, 9  ;;  %v1323_v18 = vrot.slane %v6626_v55, 5  ;;  %6048 = vmatprep.subr.msk.bf16.mxu0 %vm764_vm0, %v6731_v24  ;;  %v6769_v25 = vsel %vm6664_vm7, %v1311_v59, %v1312_v51  ;;  %v1233_v40 = vld [vmem:[%s6334_s9 + $0x90] sm:$0xe] }
  0x6e   : > { %5770 = vmatmul.mubr.msk.bf16.vlgmr.msra.gmra.mxu1 %vm715_vm3, %v5071_v38  ;;  %v6773_v45 = vsel %vm6664_vm7, %v1318_v41, %v1319_v16  ;;  %v1326_v4 = vrot.slane %v6629_v49, 5  ;;  %v1330_v19 = vrot.slane %v6357_v14, 5  ;;  %v5122_v29 = vcombine.low %v1296_v20, %v1299_v48  ;;  %v9062_v48 = vld [vmem:[#allocation6_spill] sm:$0xff] }
  0x6f   : > { %5836 = vmatpush3.bf16.msra.mxu1 %v1845_v52  ;;  %5773 = vmatprep.mubr.msk.bf16.mxu1 %vm715_vm3, %v5072_v13  ;;  %v5074_v30 = vcombine.low %v6506_v60, %v6511_v9  ;;  %v1325_v38 = vrot.slane %v1323_v18, 4  ;;  %v5110_v26 = vrot.slane %v1229_v1, 9  ;;  %v5123_v49 = vcombine.low %v1303_v27, %v1306_v42  ;;  %v1234_v42 = vld [vmem:[%s6334_s9 + $0x9c] sm:$0xe] }
  0x70   : > { %v5075_v52 = vcombine.low %v6543_v11, %v6548_v23  ;;  %v5076_v8 = vcombine.low %v6576_v34, %v6585_v17  ;;  %6047 = vmatprep.subr.msk.bf16.mxu1 %vm764_vm0, %v6759_v22  ;;  %v5124_v60 = vcombine.low %v6749_v10, %v6769_v25  ;;  %v5125_v9 = vcombine.low %v6753_v2, %v6773_v45  ;;  %v9063_v10 = vld [vmem:[#allocation8_spill] sm:$0xff]  ;;  %v9064_v2 = vld [vmem:[#allocation7_spill] sm:$0xff] }
  0x71   : > { %v1332_v54 = vrot.slane %v1330_v19, 4  ;;  %v6803_v28 = vsel %vm6664_vm7, %v5109_v57, %v1323_v18  ;;  %v6807_v56 = vsel %vm6664_vm7, %v1325_v38, %v1326_v4  ;;  %v5111_v32 = vrot.slane %v6784_v50, 9  ;;  %v1235_v18 = vld [vmem:[%s6334_s9 + $0xa8] sm:$0xe]  ;;  %v9066_v38 = vld [vmem:[#allocation11_spill] sm:$0xff] }
  0x72   : > { %v6819_v47 = vsel %vm6664_vm7, %v5110_v26, %v1330_v19  ;;  %v1337_v51 = vrot.slane %v6399_v58, 5  ;;  %v1340_v6 = vrot.slane %v6407_v63, 5  ;;  %v5113_v59 = vrot.slane %v1232_v39, 9  ;;  %v9065_v19 = vld [vmem:[#allocation9_spill] sm:$0xff]  ;;  %v9067_v26 = vld [vmem:[#allocation10_spill] sm:$0xff] }
  0x73   : > { %5808 = vmatmul.mubr.msk.bf16.gmra.mxu0 %vm715_vm3, %v5122_v29  ;;  %v1351_v16 = vrot.slane %v6490_v43, 5  ;;  %v1354_v27 = vrot.slane %v9062_v48, 5  ;;  %v5126_v41 = vcombine.low %v6803_v28, %v6807_v56  ;;  %v6837_v63 = vsel %vm6664_vm7, %v1332_v54, %v1333_v5  ;;  %v9069_v48 = vld [vmem:[#allocation14_spill] sm:$0xff] }
  0x74   : > { %5811 = vmatprep.mubr.msk.bf16.mxu0 %vm715_vm3, %v5123_v49  ;;  %v5112_v1 = vrot.slane %v6813_v44, 9  ;;  %v5114_v4 = vrot.slane %v1233_v40, 9  ;;  %v1358_v15 = vrot.slane %v9063_v10, 5  ;;  %v1339_v5 = vrot.slane %v1337_v51, 4  ;;  %v5216_v57 = vld [vmem:[%s6334_s9 + $0xc] sm:$0xf] }
  0x75   : > { %v6846_v25 = vsel %vm6664_vm7, %v5113_v59, %v1351_v16  ;;  %v1353_v45 = vrot.slane %v1351_v16, 4  ;;  %v1361_v29 = vrot.slane %v9065_v19, 5  ;;  %v5115_v49 = vrot.slane %v1234_v42, 9  ;;  %v9068_v59 = vld [vmem:[#allocation12_spill] sm:$0xff]  ;;  %v9070_v42 = vld [vmem:[#allocation13_spill] sm:$0xff] }
  0x76   : > { %5774 = vmatmul.mubr.msk.bf16.gmra.mxu1 %vm715_vm3, %v5073_v33  ;;  %v1344_v33 = vrot.slane %v6444_v46, 5  ;;  %v6860_v39 = vsel %vm6664_vm7, %v5114_v4, %v1358_v15  ;;  %v1360_v44 = vrot.slane %v1358_v15, 4  ;;  %v1365_v40 = vrot.slane %v9066_v38, 5  ;;  %v9071_v15 = vld [vmem:[#allocation15_spill] sm:$0xff] }
  0x77   : > { %5777 = vmatprep.mubr.msk.bf16.mxu1 %vm715_vm3, %v5074_v30  ;;  %v6856_v54 = vsel %vm6664_vm7, %v1353_v45, %v1354_v27  ;;  %v1368_v16 = vrot.slane %v9068_v59, 5  ;;  %v5116_v45 = vrot.slane %v1235_v18, 9  ;;  %v1372_v4 = vrot.slane %v9069_v48, 5 }
  0x78   : > { %v6870_v27 = vsel %vm6664_vm7, %v1360_v44, %v1361_v29  ;;  %v1375_v50 = vrot.slane %v9071_v15, 5  ;;  %v6880_v19 = vsel %vm6664_vm7, %v5115_v49, %v1365_v40  ;;  %v1367_v7 = vrot.slane %v1365_v40, 4  ;;  %v9072_v29 = vld [vmem:[#allocation16_spill] sm:$0xff]  ;;  %v9073_v15 = vld [vmem:[#allocation5_spill] sm:$0xff]  ;;  %v6895_v49 = vld [vmem:[%s6334_s9 + $0x10] sm:$0xf] }
  0x79   : > { %v6887_v18 = vsel %vm6664_vm7, %v5111_v32, %v1337_v51  ;;  %v6892_v59 = vsel %vm6664_vm7, %v5116_v45, %v1372_v4  ;;  %v1374_v30 = vrot.slane %v1372_v4, 4  ;;  %v5219_v40 = vld [vmem:[%s6334_s9 + $0x18] sm:$0xf]  ;;  %v1346_v20 = vrot.slane %v1344_v33, 4 }
  0x7a   : > { %v2089_v44 = vshrl.u32 %v5216_v57, 16  ;;  %v2092_v32 = vshll.u32 %v5216_v57, 16  ;;  %v5127_v51 = vcombine.low %v6819_v47, %v6837_v63  ;;  %v6910_v45 = vsel %vm6664_vm7, %v1339_v5, %v1340_v6  ;;  %v1236_v57 = vld [vmem:[%s6334_s9 + $0xb4] sm:$0xe]  ;;  %v6931_v47 = vld [vmem:[%s6334_s9 + $0x14] sm:$0x1] }
  0x7b   : > { %5812 = vmatmul.mubr.msk.bf16.gmra.mxu0 %vm715_vm3, %v5124_v60  ;;  %v1347_v60 = vrot.slane %v9073_v15, 5  ;;  %v6925_v11 = vsel %vm6664_vm7, %v5112_v1, %v1344_v33  ;;  %v2098_v6 = vshll.u32 %v6895_v49, 16  ;;  %v5220_v63 = vld [vmem:[%s6334_s9 + $0x1c] sm:$0xf]  ;;  %v2102_v17 = vshrl.u32 %v6895_v49, 16 }
  0x7c   : > { %5815 = vmatprep.mubr.msk.bf16.mxu0 %vm715_vm3, %v5125_v9  ;;  %v6900_v9 = vsel %vm6664_vm7, %v1367_v7, %v1368_v16  ;;  %v6916_v7 = vsel %vm6664_vm7, %v1374_v30, %v1375_v50  ;;  %v2091_v5 = vrot.slane %v2089_v44, 4  ;;  %v2094_v34 = vrot.slane %v2092_v32, 5  ;;  %v5222_v15 = vld [vmem:[%s6334_s9 + $0x24] sm:$0xf]  ;;  %v6944_v44 = vld [vmem:[%s6334_s9 + $0x28] sm:$0xf] }
  0x7d   : > { %v2113_v50 = vshrl.u32 %v5219_v40, 16  ;;  %v1348_v1 = vsel %vm6664_vm7, %v1346_v20, %v1347_v60  ;;  %v5117_v33 = vrot.slane %v1236_v57, 9  ;;  %v6939_v30 = vrot.slane %v2098_v6, 5 }
  0x7e   : > { %5778 = vmatmul.mubr.msk.bf16.gmra.mxu1 %vm715_vm3, %v5075_v52  ;;  %v1379_v52 = vrot.slane %v6643_v37, 5  ;;  %v2116_v16 = vshll.u32 %v5219_v40, 16  ;;  %v1382_v23 = vrot.slane %v6648_v61, 5  ;;  %v2104_v4 = vrot.slane %v2102_v17, 4 }
  0x7f   : > { %5781 = vmatprep.mubr.msk.bf16.mxu1 %vm715_vm3, %v5076_v8  ;;  %v5221_v8 = vld [vmem:[%s6334_s9 + $0x20] sm:$0x1]  ;;  %v2115_v3 = vrot.slane %v2113_v50, 4  ;;  %v2122_v13 = vshll.u32 %v5220_v63, 16  ;;  %v2108_v20 = vshll.u32 %v6931_v47, 16  ;;  %v2126_v57 = vshrl.u32 %v5220_v63, 16 }
  0x80   : > { %v1381_v32 = vrot.slane %v1379_v52, 4  ;;  %v2118_v60 = vrot.slane %v2116_v16, 5  ;;  %v5128_v61 = vcombine.low %v6887_v18, %v6910_v45  ;;  %v5129_v40 = vcombine.low %v6925_v11, %v1348_v1 }
  0x81   : > { %v2095_v6 = vor.u32 %v2094_v34, %v2091_v5  ;;  %v6955_v17 = vrot.slane %v2122_v13, 5  ;;  %v2105_v28 = vor.u32 %v2104_v4, %v6939_v30  ;;  %v2132_v50 = vshll.u32 %v5221_v8, 16  ;;  %v6982_v5 = vld [vmem:[%s6334_s9 + $0x34] sm:$0xf] }
  0x82   : > { %v2119_v56 = vor.u32 %v2118_v60, %v2115_v3  ;;  %v6967_v18 = vsel %vm6664_vm7, %v5117_v33, %v1379_v52  ;;  %v2137_v13 = vshrl.u32 %v5222_v15, 16  ;;  %v2140_v45 = vshll.u32 %v5222_v15, 16  ;;  %v5225_v52 = vld [vmem:[%s6334_s9 + $0x30] sm:$0xf] }
  0x83   : > { %5816 = vmatmul.mubr.msk.bf16.gmra.mxu0 %vm715_vm3, %v5126_v41  ;;  %v2128_v41 = vrot.slane %v2126_v57, 4  ;;  %v2146_v11 = vshll.u32 %v6944_v44, 16  ;;  %v9075_v3 = vcombine.low %v6353_v12, %v6357_v14  ;;  %v6976_v4 = vsel %vm6664_vm7, %v1381_v32, %v1382_v23 }
  0x84   : > { %5819 = vmatprep.mubr.msk.bf16.mxu0 %vm715_vm3, %v5127_v51  ;;  %v9074_v51 = vcombine.low %v6619_v62, %v6626_v55  ;;  %v2110_v62 = vrot.slane %v2108_v20, 5  ;;  %v2150_v63 = vshrl.u32 %v6944_v44, 16  ;;  %v2096_v34 = vrot.slane %v2095_v6, 4 }
  0x85   : > { %v2129_v55 = vor.u32 %v2128_v41, %v6955_v17  ;;  %v2139_v8 = vrot.slane %v2137_v13, 4  ;;  %v2142_v1 = vrot.slane %v2140_v45, 5  ;;  %v6984_v33 = vrot.slane %v2146_v11, 5  ;;  %v6990_v41 = vld [vmem:[%s6334_s9 + $0x38] sm:$0x1] }
  0x86   : > { %5782 = vmatmul.mubr.msk.bf16.gmra.mxu1 %vm715_vm3, %v9074_v51  ;;  %v2106_v12 = vrot.slane %v2105_v28, 4  ;;  %v2120_v14 = vrot.slane %v2119_v56, 4  ;;  %v2134_v16 = vrot.slane %v2132_v50, 5  ;;  %v2152_v23 = vrot.slane %v2150_v63, 4  ;;  %v5228_v13 = vld [vmem:[%s6334_s9 + $0x3c] sm:$0xf] }
  0x87   : > { %5785 = vmatprep.mubr.msk.bf16.mxu1 %vm715_vm3, %v9075_v3  ;;  %v2130_v15 = vrot.slane %v2129_v55, 4  ;;  %v2156_v32 = vshll.u32 %v6959_v21, 16  ;;  %v2161_v20 = vshrl.u32 %v5225_v52, 16  ;;  %v2164_v60 = vshll.u32 %v5225_v52, 16 }
  0x88   : > { %v2143_v57 = vor.u32 %v2142_v1, %v2139_v8  ;;  %v2153_v6 = vor.u32 %v2152_v23, %v6984_v33  ;;  %v2170_v28 = vshll.u32 %v6982_v5, 16  ;;  %v2174_v56 = vshrl.u32 %v6982_v5, 16  ;;  %v5231_v8 = vld [vmem:[%s6334_s9 + $0x48] sm:$0xf]  ;;  %v7017_v1 = vld [vmem:[%s6334_s9 + $0x4c] sm:$0xf] }
  0x89   : > { %v2163_v50 = vrot.slane %v2161_v20, 4  ;;  %v2166_v51 = vrot.slane %v2164_v60, 5  ;;  %v9076_v3 = vcombine.low %v6395_v53, %v6399_v58  ;;  %v5134_v55 = vcombine.low %v6967_v18, %v6976_v4 }
  0x8a   : > { %v6996_v45 = vrot.slane %v2170_v28, 5  ;;  %v2176_v11 = vrot.slane %v2174_v56, 4  ;;  %v2111_v63 = vsel %vm6378_vm4, %v2106_v12, %v2110_v62  ;;  %v2125_v52 = vsel %vm6378_vm4, %v2120_v14, %v6955_v17 }
  0x8b   : > { %5820 = vmatmul.mubr.msk.bf16.gmra.mxu0 %vm715_vm3, %v5128_v61  ;;  %v6999_v61 = vld [vmem:[%s6334_s9 + $0x40] sm:$0xf]  ;;  %v9077_v53 = vcombine.low %v6433_v35, %v6444_v46  ;;  %v2135_v58 = vsel %vm6378_vm4, %v2130_v15, %v2134_v16  ;;  %v2144_v23 = vrot.slane %v2143_v57, 4  ;;  %v2167_v20 = vor.u32 %v2166_v51, %v2163_v50  ;;  %v7051_v50 = vld [vmem:[%s6334_s9 + $0x44] sm:$0x1] }
  0x8c   : > { %5823 = vmatprep.mubr.msk.bf16.mxu0 %vm715_vm3, %v5129_v40  ;;  %v2101_v40 = vsel %vm6378_vm4, %v2096_v34, %v6939_v30  ;;  %v2154_v30 = vrot.slane %v2153_v6, 4  ;;  %v2158_v34 = vrot.slane %v2156_v32, 5  ;;  %v2180_v62 = vshll.u32 %v6990_v41, 16  ;;  %v5234_v51 = vld [vmem:[%s6334_s9 + $0x54] sm:$0xf] }
  0x8d   : > { %v2185_v12 = vshrl.u32 %v5228_v13, 16  ;;  %v2188_v17 = vshll.u32 %v5228_v13, 16  ;;  %v7028_v14 = vsel %vm764_vm0, %v6759_v22, 0  ;;  %v2177_v35 = vor.u32 %v2176_v11, %v6996_v45 }
  0x8e   : > { %5786 = vmatmul.mubr.msk.bf16.gmra.mxu1 %vm715_vm3, %v9076_v3  ;;  %v2194_v46 = vshll.u32 %v6999_v61, 16  ;;  %v2198_v16 = vshrl.u32 %v6999_v61, 16  ;;  %v7033_v15 = vcombine.low %v2101_v40, %v2111_v63  ;;  %v7037_v32 = vsel %vm764_vm0, %v6731_v24, 0  ;;  %v7060_v40 = vld [vmem:[%s6334_s9 + $0x58] sm:$0xf] }
  0x8f   : > { %5789 = vmatprep.mubr.msk.bf16.mxu1 %vm715_vm3, %v9077_v53  ;;  %v2209_v60 = vshrl.u32 %v5231_v8, 16  ;;  %v2212_v57 = vshll.u32 %v5231_v8, 16  ;;  %v9078_v6 = vcombine.low %v6846_v25, %v6856_v54  ;;  %v7043_v22 = vcombine.low %v2125_v52, %v2135_v58  ;;  %v7065_v8 = vld [vmem:[%s6334_s9 + $0x50] sm:$0x1] }
  0x90   : > { %v2149_v28 = vsel %vm6378_vm4, %v2144_v23, %v6984_v33  ;;  %v2159_v56 = vsel %vm6378_vm4, %v2154_v30, %v2158_v34  ;;  %v2218_v24 = vshll.u32 %v7017_v1, 16  ;;  %v9079_v25 = vcombine.low %v6860_v39, %v6870_v27  ;;  %v5237_v34 = vld [vmem:[%s6334_s9 + $0x60] sm:$0xf] }
  0x91   : > { %v2168_v54 = vrot.slane %v2167_v20, 4  ;;  %v2182_v13 = vrot.slane %v2180_v62, 5  ;;  %v2187_v11 = vrot.slane %v2185_v12, 4  ;;  %v2190_v3 = vrot.slane %v2188_v17, 5 }
  0x92   : > { %v2178_v33 = vrot.slane %v2177_v35, 4  ;;  %v7062_v63 = vrot.slane %v2194_v46, 5  ;;  %v2200_v52 = vrot.slane %v2198_v16, 4  ;;  %v2222_v53 = vshrl.u32 %v7017_v1, 16  ;;  %v7082_v35 = vld [vmem:[%s6334_s9 + $0x5c] sm:$0x1] }
  0x93   : > { %5824 = vmatmul.mubr.msk.bf16.gmra.mxu0 %vm715_vm3, %v9078_v6  ;;  %v9080_v39 = vcombine.low %v6483_v36, %v6490_v43  ;;  %v2211_v27 = vrot.slane %v2209_v60, 4  ;;  %v2214_v58 = vrot.slane %v2212_v57, 5  ;;  %v2233_v23 = vshrl.u32 %v5234_v51, 16 }
  0x94   : > { %5827 = vmatprep.mubr.msk.bf16.mxu0 %vm715_vm3, %v9079_v25  ;;  %v2236_v30 = vshll.u32 %v5234_v51, 16  ;;  %v9081_v20 = vcombine.low %v9064_v2, %v9063_v10  ;;  %v7077_v62 = vcombine.low %v2149_v28, %v2159_v56  ;;  %v7079_v12 = vrot.slane %v2218_v24, 5  ;;  %v7095_v28 = vld [vmem:[%s6334_s9 + $0x64] sm:$0xf] }
  0x95   : > { %v2224_v17 = vrot.slane %v2222_v53, 4  ;;  %v2242_v36 = vshll.u32 %v7060_v40, 16  ;;  %v2204_v43 = vshll.u32 %v7051_v50, 16  ;;  %v2235_v46 = vrot.slane %v2233_v23, 4 }
  0x96   : > { %5790 = vmatmul.mubr.msk.bf16.gmra.mxu1 %vm715_vm3, %v9080_v39  ;;  %v2238_v16 = vrot.slane %v2236_v30, 5  ;;  %v2246_v60 = vshrl.u32 %v7060_v40, 16  ;;  %v2173_v10 = vsel %vm6378_vm4, %v2168_v54, %v6996_v45  ;;  %v2183_v2 = vsel %vm6378_vm4, %v2178_v33, %v2182_v13  ;;  %v7117_v30 = vld [vmem:[%s6334_s9 + $0x68] sm:$0x1] }
  0x97   : > { %5793 = vmatprep.mubr.msk.bf16.mxu1 %vm715_vm3, %v9081_v20  ;;  %v2191_v57 = vor.u32 %v2190_v3, %v2187_v11  ;;  %v7092_v6 = vrot.slane %v2242_v36, 5  ;;  %v2201_v56 = vor.u32 %v2200_v52, %v7062_v63  ;;  %v2215_v24 = vor.u32 %v2214_v58, %v2211_v27  ;;  %v5240_v3 = vld [vmem:[%s6334_s9 + $0x6c] sm:$0xf]  ;;  %v7114_v27 = vld [vmem:[%s6334_s9 + $0x70] sm:$0xf] }
  0x98   : > { %v2228_v51 = vshll.u32 %v7065_v8, 16  ;;  %v2248_v25 = vrot.slane %v2246_v60, 4  ;;  %v9082_v53 = vcombine.low %v6880_v19, %v6900_v9  ;;  %v2225_v45 = vor.u32 %v2224_v17, %v7079_v12 }
  0x99   : > { %v2239_v54 = vor.u32 %v2238_v16, %v2235_v46  ;;  %v2257_v13 = vshrl.u32 %v5237_v34, 16  ;;  %v2260_v11 = vshll.u32 %v5237_v34, 16  ;;  %v9083_v33 = vcombine.low %v6892_v59, %v6916_v7  ;;  %v5243_v16 = vld [vmem:[%s6334_s9 + $0x78] sm:$0xf] }
  0x9a   : > { %v2249_v52 = vor.u32 %v2248_v25, %v7092_v6  ;;  %v2252_v39 = vshll.u32 %v7082_v35, 16  ;;  %v2266_v19 = vshll.u32 %v7095_v28, 16  ;;  %v2270_v9 = vshrl.u32 %v7095_v28, 16 }
  0x9b   : > { %5828 = vmatmul.mubr.msk.bf16.gmra.mxu0 %vm715_vm3, %v9082_v53  ;;  %v2192_v58 = vrot.slane %v2191_v57, 4  ;;  %v2206_v23 = vrot.slane %v2204_v43, 5  ;;  %v2259_v34 = vrot.slane %v2257_v13, 4  ;;  %v2262_v20 = vrot.slane %v2260_v11, 5 }
  0x9c   : > { %5831 = vmatprep.mubr.msk.bf16.mxu0 %vm715_vm3, %v9083_v33  ;;  %v9084_v59 = vcombine.low %v9067_v26, %v9066_v38  ;;  %v7123_v7 = vcombine.low %v2173_v10, %v2183_v2  ;;  %v2202_v17 = vrot.slane %v2201_v56, 4  ;;  %v2216_v36 = vrot.slane %v2215_v24, 4  ;;  %v7133_v2 = vld [vmem:[%s6334_s9 + $0x7c] sm:$0xf] }
  0x9d   : > { %v7125_v46 = vrot.slane %v2266_v19, 5  ;;  %v9085_v43 = vcombine.low %v9070_v42, %v9069_v48  ;;  %v2226_v60 = vrot.slane %v2225_v45, 4  ;;  %v2230_v57 = vrot.slane %v2228_v51, 5  ;;  %9086 = vst [vmem:[#allocation6_spill] sm:$0xff] %v7133_v2  ;;  %v5246_v19 = vld [vmem:[%s6334_s9 + $0x84] sm:$0xf] }
  0x9e   : > { %5794 = vmatmul.mubr.msk.bf16.gmra.mxu1 %vm715_vm3, %v9084_v59  ;;  %v2240_v25 = vrot.slane %v2239_v54, 4  ;;  %v2272_v38 = vrot.slane %v2270_v9, 4  ;;  %v2250_v26 = vrot.slane %v2249_v52, 4  ;;  %v2254_v53 = vrot.slane %v2252_v39, 5 }
  0x9f   : > { %5797 = vmatprep.mubr.msk.bf16.mxu1 %vm715_vm3, %v9085_v43  ;;  %v2263_v13 = vor.u32 %v2262_v20, %v2259_v34  ;;  %v2281_v10 = vshrl.u32 %v5240_v3, 16  ;;  %v2197_v56 = vsel %vm6378_vm4, %v2192_v58, %v7062_v63  ;;  %v2284_v24 = vshll.u32 %v5240_v3, 16  ;;  %v6125_v63 = vld [vmem:[%s6334_s9 + $0xc] sm:$0xff]   ;;  %v7167_v34 = vld [vmem:[%s6334_s9 + $0x88] sm:$0xf] }
  0xa0   : > { %v2290_v48 = vshll.u32 %v7114_v27, 16  ;;  %v2294_v42 = vshrl.u32 %v7114_v27, 16  ;;  %v2207_v51 = vsel %vm6378_vm4, %v2202_v17, %v2206_v23  ;;  %v2221_v45 = vsel %vm6378_vm4, %v2216_v36, %v7079_v12  ;;  %9087 = vst [vmem:[#allocation8_spill] sm:$0xff] %v7167_v34  ;;  %v7176_v36 = vld [vmem:[%s6334_s9 + $0x74] sm:$0x1] }
  0xa1   : > { %v2273_v54 = vor.u32 %v2272_v38, %v7125_v46  ;;  %v2276_v11 = vshll.u32 %v7117_v30, 16  ;;  %v2231_v3 = vsel %vm6378_vm4, %v2226_v60, %v2230_v57  ;;  %v2245_v33 = vsel %vm6378_vm4, %v2240_v25, %v7092_v6  ;;  %9089 = vst [vmem:[#allocation7_spill] sm:$0xff] %v7176_v36  ;;  %v7186_v38 = vld [vmem:[%s6334_s9 + $0x80] sm:$0x1] }
  0xa2   : > { %v2305_v52 = vshrl.u32 %v5243_v16, 16  ;;  %v2308_v12 = vshll.u32 %v5243_v16, 16  ;;  %v2255_v18 = vsel %vm6378_vm4, %v2250_v26, %v2254_v53  ;;  %v2264_v4 = vrot.slane %v2263_v13, 4  ;;  %9090 = vst [vmem:[#allocation9_spill] sm:$0xff] %v7186_v38  ;;  %v7189_v26 = vld [vmem:[%s6334_s9 + $0x8c] sm:$0x1] }
  0xa3   : > { %5832 = vmatmul.mubr.msk.bf16.gmra.mxu0 %vm715_vm3, %v5134_v55  ;;  %v2283_v55 = vrot.slane %v2281_v10, 4  ;;  %v2314_v39 = vshll.u32 %v7133_v2, 16  ;;  %v2286_v9 = vrot.slane %v2284_v24, 5  ;;  %v7163_v58 = vrot.slane %v2290_v48, 5  ;;  %9091 = vst [vmem:[#allocation11_spill] sm:$0xff] %v7189_v26  ;;  %v6126_v10 = vld [vmem:[%s6334_s9 + $0x18] sm:$0xff]  }
  0xa4   : > { %5871 = vmatprep.mubr.msk.bf16.mxu0 %vm715_vm3, %v7033_v15  ;;  %v2296_v23 = vrot.slane %v2294_v42, 4  ;;  %v2318_v6 = vshrl.u32 %v7133_v2, 16  ;;  %v9088_v15 = vcombine.low %v9072_v29, %v6643_v37  ;;  %v7173_v20 = vcombine.low %v2197_v56, %v2207_v51  ;;  %v5249_v51 = vld [vmem:[%s6334_s9 + $0x90] sm:$0xf] }
  0xa5   : > { %v2274_v59 = vrot.slane %v2273_v54, 4  ;;  %v2278_v17 = vrot.slane %v2276_v11, 5  ;;  %v2307_v16 = vrot.slane %v2305_v52, 4  ;;  %v2310_v43 = vrot.slane %v2308_v12, 5 }
  0xa6   : > { %5798 = vmatmul.mubr.msk.bf16.gmra.mxu1 %vm715_vm3, %v9088_v15  ;;  %v7179_v60 = vrot.slane %v2314_v39, 5  ;;  %v2320_v57 = vrot.slane %v2318_v6, 4  ;;  %v2329_v25 = vshrl.u32 %v5246_v19, 16  ;;  %v7181_v37 = vcombine.low %v2221_v45, %v2231_v3  ;;  %v7200_v45 = vld [vmem:[%s6334_s9 + $0x94] sm:$0xf] }
  0xa7   : > { %5837 = vmatprep.mubr.msk.bf16.mxu1 %vm715_vm3, %v6125_v63  ;;  %v7183_v29 = vcombine.low %v2245_v33, %v2255_v18  ;;  %v2332_v53 = vshll.u32 %v5246_v19, 16  ;;  %v2338_v13 = vshll.u32 %v7167_v34, 16  ;;  %v2269_v56 = vsel %vm6378_vm4, %v2264_v4, %v7125_v46  ;;  %9092 = vst [vmem:[#allocation10_spill] sm:$0xff] %v7200_v45  ;;  %v7208_v33 = vld [vmem:[%s9004_s1 + $0x10] sm:$0x3]  ;;  %v6127_v46 = vld [vmem:[%s6334_s9 + $0x24] sm:$0xff]  }
  0xa8   : > { %v2287_v24 = vor.u32 %v2286_v9, %v2283_v55  ;;  %v2297_v48 = vor.u32 %v2296_v23, %v7163_v58  ;;  %v2300_v42 = vshll.u32 %v7176_v36, 16  ;;  %v2331_v54 = vrot.slane %v2329_v25, 4  ;;  %9093 = vst [vmem:[#allocation12_spill] sm:$0xff] %v7208_v33 }
  0xa9   : > { %v2334_v11 = vrot.slane %v2332_v53, 5  ;;  %v7202_v63 = vrot.slane %v2338_v13, 5  ;;  %v2342_v3 = vshrl.u32 %v7167_v34, 16  ;;  %v2279_v52 = vsel %vm6378_vm4, %v2274_v59, %v2278_v17 }
  0xaa   : > { %v2311_v12 = vor.u32 %v2310_v43, %v2307_v16  ;;  %v2321_v18 = vor.u32 %v2320_v57, %v7179_v60  ;;  %v2324_v4 = vshll.u32 %v7186_v38, 16  ;;  %v2353_v19 = vshrl.u32 %v5249_v51, 16  ;;  %v7242_v57 = vld [vmem:[%s6334_s9 + $0xa0] sm:$0xf] }
  0xab   : > { %5872 = vmatmul.mubr.msk.bf16.vlgmr.msra.gmra.mxu0 %vm715_vm3, %v7043_v22  ;;  %v2335_v55 = vor.u32 %v2334_v11, %v2331_v54  ;;  %v2344_v39 = vrot.slane %v2342_v3, 4  ;;  %v2356_v9 = vshll.u32 %v5249_v51, 16  ;;  %v5252_v22 = vld [vmem:[%s6334_s9 + $0x9c] sm:$0xf]  ;;  %v7221_v23 = vrot.slane %v2287_v24, 4  ;;  %9095 = vst [vmem:[#allocation13_spill] sm:$0xff] %v7242_v57 }
  0xac   : > { %5938 = vmatpush3.bf16.msra.mxu0 %v7037_v32  ;;  %5875 = vmatprep.mubr.msk.bf16.mxu0 %vm715_vm3, %v7077_v62  ;;  %v7223_v6 = vrot.slane %v2300_v42, 5  ;;  %v2348_v15 = vshll.u32 %v7189_v26, 16  ;;  %v2362_v59 = vshll.u32 %v7200_v45, 16  ;;  %v7230_v32 = vld [vmem:[%s9004_s1 + $0xe] sm:$0x3]  ;;  %v7235_v62 = vcombine.low %v2269_v56, %v2279_v52 }
  0xad   : > { %9094 = vst [vmem:[#allocation14_spill] sm:$0xff] %v7230_v32  ;;  %6050 = vmatprep.subr.msk.bf16.mxu0 %vm764_vm0, %v7208_v33  ;;  %v7237_v17 = vrot.slane %v2297_v48, 4  ;;  %v2345_v16 = vor.u32 %v2344_v39, %v7202_v63  ;;  %v2366_v43 = vshrl.u32 %v7200_v45, 16  ;;  %v7246_v25 = vrot.slane %v2311_v12, 4  ;;  %v7255_v56 = vld [vmem:[%s6334_s9 + $0x98] sm:$0x1] }
  0xae   : > { %5838 = vmatmul.mubr.msk.bf16.vlgmr.msra.gmra.mxu1 %vm715_vm3, %v6126_v10  ;;  %v7248_v53 = vrot.slane %v2321_v18, 4  ;;  %v7250_v13 = vrot.slane %v2324_v4, 5  ;;  %v7252_v10 = vrot.slane %v2335_v55, 4  ;;  %9096 = vst [vmem:[#allocation15_spill] sm:$0xff] %v7255_v56  ;;  %v2355_v24 = vrot.slane %v2353_v19, 4  ;;  %v6129_v19 = vld [vmem:[%s6334_s9 + $0x3c] sm:$0xff]  }
  0xaf   : > { %5904 = vmatpush3.bf16.msra.mxu1 %v7028_v14  ;;  %5841 = vmatprep.mubr.msk.bf16.mxu1 %vm715_vm3, %v6127_v46  ;;  %v2358_v48 = vrot.slane %v2356_v9, 5  ;;  %v2377_v42 = vshrl.u32 %v5252_v22, 16  ;;  %v2380_v51 = vshll.u32 %v5252_v22, 16  ;;  %v6128_v14 = vld [vmem:[%s6334_s9 + $0x30] sm:$0xff]   ;;  %v7264_v11 = vrot.slane %v2348_v15, 5 }
  0xb0   : > { %6049 = vmatprep.subr.msk.bf16.mxu1 %vm764_vm0, %v7230_v32  ;;  %v7266_v3 = vrot.slane %v2362_v59, 5  ;;  %v2386_v46 = vshll.u32 %v7242_v57, 16  ;;  %v5255_v52 = vld [vmem:[%s6334_s9 + $0xa8] sm:$0xf]  ;;  %v7270_v12 = vrot.slane %v2345_v16, 4  ;;  %v2368_v18 = vrot.slane %v2366_v43, 4 }
  0xb1   : > { %v2372_v4 = vshll.u32 %v7255_v56, 16  ;;  %v2390_v55 = vshrl.u32 %v7242_v57, 16  ;;  %v7275_v39 = vld [vmem:[%s6334_s9 + $0xac] sm:$0xf]  ;;  %v2359_v59 = vor.u32 %v2358_v48, %v2355_v24  ;;  %v7299_v16 = vld [vmem:[%s6334_s9 + $0xa4] sm:$0x1] }
  0xb2   : > { %9097 = vst [vmem:[#allocation16_spill] sm:$0xff] %v7275_v39  ;;  %9098 = vst [vmem:[#allocation5_spill] sm:$0xff] %v7299_v16  ;;  %v2379_v43 = vrot.slane %v2377_v42, 4  ;;  %v2382_v22 = vrot.slane %v2380_v51, 5  ;;  %v2401_v54 = vshrl.u32 %v5255_v52, 16  ;;  %v7301_v9 = vrot.slane %v2386_v46, 5 }
  0xb3   : > { %5876 = vmatmul.mubr.msk.bf16.gmra.mxu0 %vm715_vm3, %v7123_v7  ;;  %v2392_v32 = vrot.slane %v2390_v55, 4  ;;  %v2404_v15 = vshll.u32 %v5255_v52, 16  ;;  %v2410_v33 = vshll.u32 %v7275_v39, 16  ;;  %v5258_v57 = vld [vmem:[%s6334_s9 + $0xb4] sm:$0xf]  ;;  %v2369_v24 = vor.u32 %v2368_v18, %v7266_v3 }
  0xb4   : > { %5879 = vmatprep.mubr.msk.bf16.mxu0 %vm715_vm3, %v7173_v20  ;;  %v2351_v20 = vsel %vm6378_vm4, %v7270_v12, %v7264_v11  ;;  %v7311_v48 = vrot.slane %v2372_v4, 5  ;;  %v7314_v42 = vld [vmem:[%s6334_s9 + $0xb0] sm:$0x1]  ;;  %v2403_v51 = vrot.slane %v2401_v54, 4  ;;  %v7317_v46 = vld [vmem:[%s6334_s9 + $0xb8] sm:$0xf]  ;;  %v2383_v18 = vor.u32 %v2382_v22, %v2379_v43 }
  0xb5   : > { %9099 = vst [vmem:[#allocation17_spill] sm:$0xff] %v7314_v42  ;;  %9100 = vst [vmem:[#allocation18_spill] sm:$0xff] %v7317_v46  ;;  %v2406_v52 = vrot.slane %v2404_v15, 5  ;;  %v7321_v55 = vrot.slane %v2410_v33, 5  ;;  %v2414_v11 = vshrl.u32 %v7275_v39, 16  ;;  %v7324_v12 = vrot.slane %v2359_v59, 4 }
  0xb6   : > { %5842 = vmatmul.mubr.msk.bf16.gmra.mxu1 %vm715_vm3, %v6128_v14  ;;  %v2396_v14 = vshll.u32 %v7299_v16, 16  ;;  %v7327_v4 = vld [vmem:[%s6334_s9 + $0xbc] sm:$0x1]  ;;  %v2425_v54 = vshrl.u32 %v5258_v57, 16  ;;  %v2428_v7 = vshll.u32 %v5258_v57, 16  ;;  %v2393_v56 = vor.u32 %v2392_v32, %v7301_v9  ;;  %v6130_v16 = vld [vmem:[%s6334_s9 + $0x48] sm:$0xff]  }
  0xb7   : > { %5845 = vmatprep.mubr.msk.bf16.mxu1 %vm715_vm3, %v6129_v19  ;;  %v2416_v45 = vrot.slane %v2414_v11, 4  ;;  %v2420_v19 = vshll.u32 %v7314_v42, 16  ;;  %v2434_v15 = vshll.u32 %v7317_v46, 16  ;;  %v5261_v33 = vld [vmem:[%s6334_s9 + $0xc0] sm:$0xf]  ;;  %v2407_v26 = vor.u32 %v2406_v52, %v2403_v51  ;;  %v6131_v57 = vld [vmem:[%s6334_s9 + $0x54] sm:$0xff]  }
  0xb8   : > { %v2427_v39 = vrot.slane %v2425_v54, 4  ;;  %v2430_v34 = vrot.slane %v2428_v7, 5  ;;  %v2438_v59 = vshrl.u32 %v7317_v46, 16  ;;  %v7336_v22 = vld [vmem:[%s6334_s9 + $0xc4] sm:$0xf]  ;;  %v2370_v43 = vrot.slane %v2369_v24, 4 }
  0xb9   : > { %v2398_v32 = vrot.slane %v2396_v14, 5  ;;  %v2417_v11 = vor.u32 %v2416_v45, %v7321_v55  ;;  %v2436_v42 = vrot.slane %v2434_v15, 5  ;;  %v2444_v7 = vshll.u32 %v7327_v4, 16  ;;  %v7348_v45 = vld [vmem:[%s6334_s9 + $0xc8] sm:$0x1] }
  0xba   : > { %v2431_v51 = vor.u32 %v2430_v34, %v2427_v39  ;;  %v2440_v52 = vrot.slane %v2438_v59, 4  ;;  %v2449_v54 = vshrl.u32 %v5261_v33, 16  ;;  %v2384_v46 = vrot.slane %v2383_v18, 4 }
  0xbb   : > { %5880 = vmatmul.mubr.msk.bf16.gmra.mxu0 %vm715_vm3, %v7181_v37  ;;  %v2394_v38 = vrot.slane %v2393_v56, 4  ;;  %v2452_v2 = vshll.u32 %v5261_v33, 16  ;;  %v2458_v37 = vshll.u32 %v7336_v22, 16  ;;  %v2408_v24 = vrot.slane %v2407_v26, 4 }
  0xbc   : > { %5883 = vmatprep.mubr.msk.bf16.mxu0 %vm715_vm3, %v7183_v29  ;;  %v2422_v14 = vrot.slane %v2420_v19, 5  ;;  %v2441_v36 = vor.u32 %v2440_v52, %v2436_v42  ;;  %v2451_v15 = vrot.slane %v2449_v54, 4  ;;  %v2418_v34 = vrot.slane %v2417_v11, 4 }
  0xbd   : > { %v2454_v29 = vrot.slane %v2452_v2, 5  ;;  %v7351_v39 = vrot.slane %v2458_v37, 5  ;;  %v2462_v56 = vshrl.u32 %v7336_v22, 16  ;;  %v9101_v26 = vsel %vm6378_vm4, %v7237_v17, %v7223_v6 }
  0xbe   : > { %5846 = vmatmul.mubr.msk.bf16.gmra.mxu1 %vm715_vm3, %v6130_v16  ;;  %v9102_v16 = vsel %vm6378_vm4, %v7221_v23, %v7163_v58  ;;  %v2432_v19 = vrot.slane %v2431_v51, 4  ;;  %v2442_v33 = vrot.slane %v2441_v36, 4  ;;  %v2446_v2 = vrot.slane %v2444_v7, 5  ;;  %v6132_v23 = vld [vmem:[%s6334_s9 + $0x60] sm:$0xff]  }
  0xbf   : > { %5849 = vmatprep.mubr.msk.bf16.mxu1 %vm715_vm3, %v6131_v57  ;;  %v5273_v18 = vcombine.low %v9102_v16, %v9101_v26  ;;  %v9103_v59 = vsel %vm6378_vm4, %v7248_v53, %v7250_v13  ;;  %v9104_v6 = vsel %vm6378_vm4, %v7246_v25, %v7179_v60  ;;  %v2455_v57 = vor.u32 %v2454_v29, %v2451_v15  ;;  %v5299_v13 = vld [vmem:[%s6334_s9 + $0x24] sm:$0xe]  ;;  %v5302_v26 = vld [vmem:[%s6334_s9 + $0x48] sm:$0xe] }
  0xc0   : > { %v5274_v17 = vcombine.low %v9104_v6, %v9103_v59  ;;  %v2464_v11 = vrot.slane %v2462_v56, 4  ;;  %v2468_v58 = vshll.u32 %v7348_v45, 16  ;;  %v9105_v36 = vsel %vm6378_vm4, %v7252_v10, %v7202_v63  ;;  %v6133_v63 = vld [vmem:[%s6334_s9 + $0x6c] sm:$0xff]   ;;  %v5303_v6 = vld [vmem:[%s6334_s9 + $0x54] sm:$0xe] }
  0xc1   : > { %v5275_v51 = vcombine.low %v9105_v36, %v2351_v20  ;;  %v2365_v53 = vsel %vm6378_vm4, %v7324_v12, %v7266_v3  ;;  %v2375_v60 = vsel %vm6378_vm4, %v2370_v43, %v7311_v48  ;;  %v2389_v25 = vsel %vm6378_vm4, %v2384_v46, %v7301_v9  ;;  %v7404_v12 = vld [vmem:[%s6334_s9 + $0xc] sm:$0xe] }
  0xc2   : > { %v2399_v10 = vsel %vm6378_vm4, %v2394_v38, %v2398_v32  ;;  %v2413_v3 = vsel %vm6378_vm4, %v2408_v24, %v7321_v55  ;;  %v2423_v20 = vsel %vm6378_vm4, %v2418_v34, %v2422_v14  ;;  %v2465_v48 = vor.u32 %v2464_v11, %v7351_v39  ;;  %v5300_v55 = vld [vmem:[%s6334_s9 + $0x30] sm:$0xe]  ;;  %v5301_v14 = vld [vmem:[%s6334_s9 + $0x3c] sm:$0xe] }
  0xc3   : > { %5884 = vmatmul.mubr.msk.bf16.gmra.mxu0 %vm715_vm3, %v7235_v62  ;;  %v2437_v62 = vsel %vm6378_vm4, %v2432_v19, %v2436_v42  ;;  %v2447_v38 = vsel %vm6378_vm4, %v2442_v33, %v2446_v2  ;;  %v7411_v9 = vrot.slane %v2455_v57, 4  ;;  %v2832_v46 = vrot.slane %v6895_v49, 5  ;;  %v6134_v57 = vld [vmem:[%s6334_s9 + $0x78] sm:$0xff]  }
  0xc4   : > { %5887 = vmatprep.mubr.msk.bf16.mxu0 %vm715_vm3, %v5273_v18  ;;  %v7415_v43 = vcombine.low %v2365_v53, %v2375_v60  ;;  %v7417_v32 = vrot.slane %v2465_v48, 4  ;;  %v7419_v52 = vrot.slane %v2468_v58, 5  ;;  %v5315_v7 = vrot.slane %v5299_v13, 9  ;;  %v6135_v53 = vld [vmem:[%s6334_s9 + $0x84] sm:$0xff]   ;;  %v5304_v13 = vld [vmem:[%s6334_s9 + $0x60] sm:$0xe] }
  0xc5   : > { %v7422_v54 = vcombine.low %v2389_v25, %v2399_v10  ;;  %v7424_v42 = vcombine.low %v2413_v3, %v2423_v20  ;;  %v5313_v37 = vrot.slane %v7404_v12, 9  ;;  %v2846_v24 = vrot.slane %v6944_v44, 5  ;;  %v6141_v49 = vld [vmem:[%s6334_s9 + $0x18] sm:$0xff]  }
  0xc6   : > { %5850 = vmatmul.mubr.msk.bf16.gmra.mxu1 %vm715_vm3, %v6132_v23  ;;  %v7430_v15 = vcombine.low %v2437_v62, %v2447_v38  ;;  %v2835_v34 = vrot.slane %v6931_v47, 5  ;;  %v2849_v29 = vrot.slane %v6959_v21, 5  ;;  %v5316_v56 = vrot.slane %v5300_v55, 9  ;;  %v5306_v55 = vld [vmem:[%s6334_s9 + $0x78] sm:$0xe] }
  0xc7   : > { %5853 = vmatprep.mubr.msk.bf16.mxu1 %vm715_vm3, %v6133_v63  ;;  %v2461_v16 = vsel %vm6378_vm4, %v7411_v9, %v7351_v39  ;;  %v7441_v44 = vrot.slane %v2832_v46, 4  ;;  %v7445_v18 = vsel %vm6664_vm7, %v5315_v7, %v2846_v24  ;;  %v2848_v19 = vrot.slane %v2846_v24, 4 }
  0xc8   : > { %v2471_v21 = vsel %vm6378_vm4, %v7417_v32, %v7419_v52  ;;  %v2853_v33 = vrot.slane %v6982_v5, 5  ;;  %v2856_v2 = vrot.slane %v6990_v41, 5  ;;  %v5317_v59 = vrot.slane %v5301_v14, 9  ;;  %v6140_v52 = vld [vmem:[%s6334_s9 + $0xc0] sm:$0xff]  }
  0xc9   : > { %v7457_v11 = vsel %vm6664_vm7, %v2848_v19, %v2849_v29  ;;  %v2860_v58 = vrot.slane %v6999_v61, 5  ;;  %v2863_v23 = vrot.slane %v7051_v50, 5  ;;  %v5318_v36 = vrot.slane %v5302_v26, 9  ;;  %v5307_v19 = vld [vmem:[%s6334_s9 + $0x84] sm:$0xe] }
  0xca   : > { %v5332_v5 = vcombine.low %v7445_v18, %v7457_v11  ;;  %v7467_v41 = vsel %vm6664_vm7, %v5316_v56, %v2853_v33  ;;  %v2855_v60 = vrot.slane %v2853_v33, 4  ;;  %v2867_v25 = vrot.slane %v7017_v1, 5 }
  0xcb   : > { %5888 = vmatmul.mubr.msk.bf16.gmra.mxu0 %vm715_vm3, %v5274_v17  ;;  %v7474_v61 = vsel %vm6664_vm7, %v5317_v59, %v2860_v58  ;;  %v2862_v50 = vrot.slane %v2860_v58, 4  ;;  %v2870_v17 = vrot.slane %v7065_v8, 5  ;;  %v5319_v63 = vrot.slane %v5303_v6, 9  ;;  %v9106_v59 = vld [vmem:[#allocation7_spill] sm:$0xff] }
  0xcc   : > { %5891 = vmatprep.mubr.msk.bf16.mxu0 %vm715_vm3, %v5275_v51  ;;  %v7479_v10 = vsel %vm6664_vm7, %v2855_v60, %v2856_v2  ;;  %v7483_v3 = vsel %vm6664_vm7, %v5318_v36, %v2867_v25  ;;  %v2869_v1 = vrot.slane %v2867_v25, 4  ;;  %v2874_v20 = vrot.slane %v7060_v40, 5  ;;  %v5305_v51 = vld [vmem:[%s6334_s9 + $0x6c] sm:$0xe]  ;;  %v6136_v58 = vld [vmem:[%s6334_s9 + $0x90] sm:$0xff]  }
  0xcd   : > { %v5333_v48 = vcombine.low %v7467_v41, %v7479_v10  ;;  %v7492_v8 = vsel %vm6664_vm7, %v2862_v50, %v2863_v23  ;;  %v2877_v62 = vrot.slane %v7082_v35, 5  ;;  %v5320_v38 = vrot.slane %v5304_v13, 9  ;;  %v9107_v36 = vld [vmem:[#allocation6_spill] sm:$0xff]  ;;  %v5308_v60 = vld [vmem:[%s6334_s9 + $0x90] sm:$0xe]  ;;  %v9108_v50 = vld [vmem:[#allocation9_spill] sm:$0xff] }
  0xce   : > { %5854 = vmatmul.mubr.msk.bf16.gmra.mxu1 %vm715_vm3, %v6134_v57  ;;  %v5334_v40 = vcombine.low %v7474_v61, %v7492_v8  ;;  %v7501_v7 = vsel %vm6664_vm7, %v2869_v1, %v2870_v17  ;;  %v7505_v24 = vsel %vm6664_vm7, %v5319_v63, %v2874_v20  ;;  %v2876_v14 = vrot.slane %v2874_v20, 4 }
  0xcf   : > { %5857 = vmatprep.mubr.msk.bf16.mxu1 %vm715_vm3, %v6135_v53  ;;  %v5335_v35 = vcombine.low %v7483_v3, %v7501_v7  ;;  %v2881_v29 = vrot.slane %v7095_v28, 5  ;;  %v2884_v56 = vrot.slane %v7117_v30, 5  ;;  %v5321_v26 = vrot.slane %v5305_v51, 9  ;;  %v9109_v51 = vld [vmem:[#allocation8_spill] sm:$0xff]  ;;  %v5439_v3 = vld [vmem:[%s6334_s9 + $0x48] sm:$0xf] }
  0xd0   : > { %v7514_v33 = vsel %vm6664_vm7, %v2876_v14, %v2877_v62  ;;  %v2888_v2 = vrot.slane %v7114_v27, 5  ;;  %v2891_v6 = vrot.slane %v9106_v59, 5  ;;  %v5322_v57 = vrot.slane %v5306_v55, 9  ;;  %v6137_v27 = vld [vmem:[%s6334_s9 + $0x9c] sm:$0xff]   ;;  %v9117_v55 = vld [vmem:[#allocation18_spill] sm:$0xff] }
  0xd1   : > { %v5336_v23 = vcombine.low %v7505_v24, %v7514_v33  ;;  %v7523_v28 = vsel %vm6664_vm7, %v5320_v38, %v2881_v29  ;;  %v2883_v30 = vrot.slane %v2881_v29, 4  ;;  %v2895_v53 = vrot.slane %v9107_v36, 5  ;;  %v5309_v38 = vld [vmem:[%s6334_s9 + $0x9c] sm:$0xe]  ;;  %v9112_v36 = vld [vmem:[#allocation15_spill] sm:$0xff] }
  0xd2   : > { %v7532_v25 = vsel %vm6664_vm7, %v5321_v26, %v2888_v2  ;;  %v2890_v13 = vrot.slane %v2888_v2, 4  ;;  %v2898_v17 = vrot.slane %v9108_v50, 5  ;;  %v5323_v63 = vrot.slane %v5307_v19, 9  ;;  %v5310_v26 = vld [vmem:[%s6334_s9 + $0xa8] sm:$0xe] }
  0xd3   : > { %5892 = vmatmul.mubr.msk.bf16.gmra.mxu0 %vm715_vm3, %v7415_v43  ;;  %v7539_v1 = vsel %vm6664_vm7, %v2883_v30, %v2884_v56  ;;  %v7543_v43 = vsel %vm6664_vm7, %v5322_v57, %v2895_v53  ;;  %v2897_v20 = vrot.slane %v2895_v53, 4  ;;  %v2902_v62 = vrot.slane %v9109_v51, 5  ;;  %v5312_v57 = vld [vmem:[%s6334_s9 + $0xc0] sm:$0xe]  ;;  %v6138_v19 = vld [vmem:[%s6334_s9 + $0xa8] sm:$0xff]  }
  0xd4   : > { %5895 = vmatprep.mubr.msk.bf16.mxu0 %vm715_vm3, %v7422_v54  ;;  %v7551_v14 = vsel %vm6664_vm7, %v2890_v13, %v2891_v6  ;;  %v9110_v54 = vld [vmem:[#allocation11_spill] sm:$0xff]  ;;  %v5324_v56 = vrot.slane %v5308_v60, 9  ;;  %v2912_v53 = vrot.slane %v9112_v36, 5  ;;  %v5325_v60 = vrot.slane %v5309_v38, 9  ;;  %v9115_v38 = vld [vmem:[#allocation16_spill] sm:$0xff] }
  0xd5   : > { %v2905_v29 = vrot.slane %v9110_v54, 5  ;;  %v7560_v2 = vsel %vm6664_vm7, %v2897_v20, %v2898_v17  ;;  %v7564_v59 = vsel %vm6664_vm7, %v5323_v63, %v2902_v62  ;;  %v2904_v6 = vrot.slane %v2902_v62, 4  ;;  %v5311_v13 = vld [vmem:[%s6334_s9 + $0xb4] sm:$0xe]  ;;  %v9113_v17 = vld [vmem:[#allocation13_spill] sm:$0xff] }
  0xd6   : > { %5858 = vmatmul.mubr.msk.bf16.gmra.mxu1 %vm715_vm3, %v6136_v58  ;;  %v9111_v58 = vld [vmem:[#allocation10_spill] sm:$0xff]  ;;  %v2916_v63 = vrot.slane %v9113_v17, 5  ;;  %v9114_v20 = vld [vmem:[#allocation5_spill] sm:$0xff]  ;;  %v5326_v62 = vrot.slane %v5310_v26, 9  ;;  %v2923_v36 = vrot.slane %v9115_v38, 5  ;;  %v5327_v26 = vrot.slane %v5311_v13, 9 }
  0xd7   : > { %5861 = vmatprep.mubr.msk.bf16.mxu1 %vm715_vm3, %v6137_v27  ;;  %v2909_v30 = vrot.slane %v9111_v58, 5  ;;  %v7574_v50 = vsel %vm6664_vm7, %v2904_v6, %v2905_v29  ;;  %v2919_v51 = vrot.slane %v9114_v20, 5  ;;  %v9116_v17 = vld [vmem:[#allocation17_spill] sm:$0xff]  ;;  %v6139_v27 = vld [vmem:[%s6334_s9 + $0xb4] sm:$0xff]   ;;  %v2836_v39 = vsel %vm6664_vm7, %v7441_v44, %v2835_v34  ;;  %v7791_v7 = vld [vmem:[%s6334_s9 + $0x4c] sm:$0xf] }
  0xd8   : > { %v7589_v29 = vsel %vm6664_vm7, %v5325_v60, %v2916_v63  ;;  %v2918_v6 = vrot.slane %v2916_v63, 4  ;;  %v2926_v20 = vrot.slane %v9116_v17, 5  ;;  %v2925_v38 = vrot.slane %v2923_v36, 4  ;;  %v6158_v44 = vld [vmem:[%s6334_s9 + $0x20] sm:$0x1] }
  0xd9   : > { %v7582_v54 = vsel %vm6664_vm7, %v5324_v56, %v2909_v30  ;;  %v2911_v58 = vrot.slane %v2909_v30, 4  ;;  %v7601_v30 = vsel %vm6664_vm7, %v5326_v62, %v2923_v36  ;;  %v2930_v60 = vrot.slane %v9117_v55, 5 }
  0xda   : > { %v5328_v63 = vrot.slane %v5312_v57, 9  ;;  %v7617_v55 = vsel %vm6664_vm7, %v2925_v38, %v2926_v20  ;;  %v2937_v57 = vrot.slane %v7336_v22, 5  ;;  %v2833_v22 = vsel %vm6664_vm7, %v5313_v37, %v2832_v46  ;;  %v6143_v38 = vld [vmem:[%s6334_s9 + $0x30] sm:$0xff]  }
  0xdb   : > { %5896 = vmatmul.mubr.msk.bf16.gmra.mxu0 %vm715_vm3, %v7424_v42  ;;  %v7597_v56 = vsel %vm6664_vm7, %v2911_v58, %v2912_v53  ;;  %v7610_v42 = vsel %vm6664_vm7, %v2918_v6, %v2919_v51  ;;  %v2933_v53 = vrot.slane %v7327_v4, 5  ;;  %v2932_v58 = vrot.slane %v2930_v60, 4 }
  0xdc   : > { %5899 = vmatprep.mubr.msk.bf16.mxu0 %vm715_vm3, %v7430_v15  ;;  %v7621_v15 = vsel %vm6664_vm7, %v5327_v26, %v2930_v60  ;;  %v2940_v51 = vrot.slane %v7348_v45, 5  ;;  %v5298_v45 = vld [vmem:[%s6334_s9 + $0x18] sm:$0xe]  ;;  %v7661_v9 = vsel %vm6664_vm7, %v5328_v63, %v2937_v57  ;;  %v2939_v46 = vrot.slane %v2937_v57, 4  ;;  %v6142_v26 = vld [vmem:[%s6334_s9 + $0x24] sm:$0xff]  }
  0xdd   : > { %v7649_v32 = vsel %vm6664_vm7, %v2932_v58, %v2933_v53  ;;  %v5314_v37 = vrot.slane %v5298_v45, 9  ;;  %v5330_v34 = vcombine.low %v2833_v22, %v2836_v39  ;;  %v9118_v60 = vld [vmem:[#allocation12_spill] sm:$0xff] }
  0xde   : > { %5862 = vmatmul.mubr.msk.bf16.gmra.mxu1 %vm715_vm3, %v6138_v19  ;;  %v5280_v19 = vcombine.low %v2461_v16, %v2471_v21  ;;  %v7666_v47 = vsel %vm6664_vm7, %v2939_v46, %v2940_v51  ;;  %v2842_v21 = vrot.slane %v6158_v44, 5  ;;  %v4599_v53 = vsel %vm764_vm0, %v9118_v60, 0  ;;  %v5427_v63 = vld [vmem:[%s6334_s9 + $0x18] sm:$0xf]  ;;  %v5428_v57 = vld [vmem:[%s6334_s9 + $0x1c] sm:$0xf] }
  0xdf   : > { %5865 = vmatprep.mubr.msk.bf16.mxu1 %vm715_vm3, %v6139_v27  ;;  %v6157_v27 = vld [vmem:[%s6334_s9 + $0x1c] sm:$0xf]  ;;  %v5430_v51 = vld [vmem:[%s6334_s9 + $0x24] sm:$0xf]  ;;  %v3647_v45 = vshrl.u32 %v5427_v63, 16  ;;  %v3656_v39 = vshll.u32 %v5428_v57, 16 }
  0xe0   : > { %v2839_v36 = vrot.slane %v6157_v27, 5  ;;  %v3650_v27 = vshll.u32 %v5427_v63, 16  ;;  %v3671_v46 = vshrl.u32 %v5430_v51, 16  ;;  %v6145_v44 = vld [vmem:[%s6334_s9 + $0x48] sm:$0xff]   ;;  %v5508_v60 = vld [vmem:[%s6334_s9 + $0x18] sm:$0xe] }
  0xe1   : > { %v7707_v63 = vld [vmem:[%s6334_s9 + $0x2c] sm:$0x1] }
  0xe2   : > { %v2841_v16 = vrot.slane %v2839_v36, 4  ;;  %v2840_v17 = vsel %vm6664_vm7, %v5314_v37, %v2839_v36  ;;  %v7691_v36 = vld [vmem:[%s6334_s9 + $0x28] sm:$0xf]  ;;  %v6144_v37 = vld [vmem:[%s6334_s9 + $0x3c] sm:$0xff]   ;;  %v3673_v18 = vrot.slane %v3671_v46, 4 }
  0xe3   : > { %5900 = vmatmul.mubr.msk.bf16.gmra.mxu0 %vm715_vm3, %v5280_v19  ;;  %v9119_v19 = vld [vmem:[#allocation14_spill] sm:$0xff] }
  0xe4   : > { %5939 = vmatprep.mubr.msk.bf16.mxu0 %vm715_vm3, %v6141_v49  ;;  %v2843_v20 = vsel %vm6664_vm7, %v2841_v16, %v2842_v21  ;;  %v4129_v22 = vsel %vm764_vm0, %v9119_v19, 0  ;;  %v3660_v49 = vshrl.u32 %v5428_v57, 16  ;;  %v3684_v16 = vshrl.u32 %v7691_v36, 16  ;;  %v5429_v21 = vld [vmem:[%s6334_s9 + $0x20] sm:$0x1] }
  0xe5   : > { %v5331_v58 = vcombine.low %v2840_v17, %v2843_v20  ;;  %v3649_v17 = vrot.slane %v3647_v45, 4  ;;  %v3652_v20 = vrot.slane %v3650_v27, 5  ;;  %v5433_v19 = vld [vmem:[%s6334_s9 + $0x30] sm:$0xf]  ;;  %v3666_v45 = vshll.u32 %v5429_v21, 16 }
  0xe6   : > { %5866 = vmatmul.mubr.msk.bf16.gmra.mxu1 %vm715_vm3, %v6140_v52  ;;  %v3674_v52 = vshll.u32 %v5430_v51, 16  ;;  %v3686_v51 = vrot.slane %v3684_v16, 4  ;;  %v5524_v27 = vrot.slane %v5508_v60, 9  ;;  %v4393_v46 = vrot.slane %v5429_v21, 5  ;;  %v5509_v16 = vld [vmem:[%s6334_s9 + $0x24] sm:$0xe] }
  0xe7   : > { %5905 = vmatprep.mubr.msk.bf16.mxu1 %vm715_vm3, %v5330_v34  ;;  %v3680_v34 = vshll.u32 %v7691_v36, 16  ;;  %v6146_v21 = vld [vmem:[%s6334_s9 + $0x54] sm:$0xff]   ;;  %v3698_v10 = vshll.u32 %v5433_v19, 16  ;;  %v6147_v60 = vld [vmem:[%s6334_s9 + $0x60] sm:$0xff]  }
  0xe8   : > { %v3676_v11 = vrot.slane %v3674_v52, 5  ;;  %v3690_v52 = vshll.u32 %v7707_v63, 16 }
  0xeb   : > { %5940 = vmatmul.mubr.msk.bf16.vlgmr.msra.gmra.mxu0 %vm715_vm3, %v6142_v26  ;;  %v7703_v26 = vrot.slane %v3656_v39, 5 }
  0xec   : > { %6006 = vmatpush3.bf16.msra.mxu0 %v4599_v53  ;;  %5943 = vmatprep.mubr.msk.bf16.mxu0 %vm715_vm3, %v6143_v38  ;;  %v3662_v38 = vrot.slane %v3660_v49, 4  ;;  %v4390_v53 = vrot.slane %v5428_v57, 5  ;;  %v7717_v57 = vld [vmem:[%s6334_s9 + $0x34] sm:$0xf] }
  0xee   : > { %5906 = vmatmul.mubr.msk.bf16.vlgmr.msra.gmra.mxu1 %vm715_vm3, %v5331_v58  ;;  %v7712_v58 = vrot.slane %v3680_v34, 5  ;;  %v3663_v39 = vor.u32 %v3662_v38, %v7703_v26  ;;  %v4392_v49 = vrot.slane %v4390_v53, 4  ;;  %v3677_v34 = vor.u32 %v3676_v11, %v3673_v18 }
  0xef   : > { %5972 = vmatpush3.bf16.msra.mxu1 %v4129_v22  ;;  %5909 = vmatprep.mubr.msk.bf16.mxu1 %vm715_vm3, %v5332_v5  ;;  %v7710_v5 = vpop.f32.mrf.mxu0  ;;  %v3653_v22 = vor.u32 %v3652_v20, %v3649_v17  ;;  %v3695_v17 = vshrl.u32 %v5433_v19, 16  ;;  %v3708_v38 = vshrl.u32 %v7717_v57, 16  ;;  %v7742_v61 = vsel %vm6664_vm7, %v5524_v27, %v4390_v53  ;;  %v5436_v19 = vld [vmem:[%s6334_s9 + $0x3c] sm:$0xf] }
  0xf0   : > { %v3687_v41 = vor.u32 %v3686_v51, %v7712_v58  ;;  %v3664_v8 = vrot.slane %v3663_v39, 4  ;;  %v3692_v11 = vrot.slane %v3690_v52, 5  ;;  %v5525_v51 = vrot.slane %v5509_v16, 9  ;;  %v7756_v39 = vld [vmem:[%s6334_s9 + $0x38] sm:$0x1] }
  0xf1   : > { %v7734_v20 = vpop.f32.mrf.mxu0  ;;  %v3654_v18 = vrot.slane %v3653_v22, 4  ;;  %v3678_v12 = vrot.slane %v3677_v34, 4  ;;  %v4400_v22 = vrot.slane %v7707_v63, 5  ;;  %v3710_v52 = vrot.slane %v3708_v38, 4 }
  0xf2   : > { %v3688_v27 = vrot.slane %v3687_v41, 4  ;;  %v3719_v34 = vshrl.u32 %v5436_v19, 16  ;;  %v3722_v16 = vshll.u32 %v5436_v19, 16  ;;  %v7769_v41 = vld [vmem:[%s6334_s9 + $0x40] sm:$0xf] }
  0xf3   : > { %5944 = vmatmul.mubr.msk.bf16.gmra.mxu0 %vm715_vm3, %v6144_v37  ;;  %v7753_v53 = vpop.f32.mrf.mxu0  ;;  %v3659_v63 = vsel %vm6378_vm4, %v3654_v18, %v7703_v26  ;;  %v3683_v26 = vsel %vm6378_vm4, %v3678_v12, %v7712_v58  ;;  %v5510_v18 = vld [vmem:[%s6334_s9 + $0x30] sm:$0xe]  ;;  %v3728_v24 = vshll.u32 %v7769_v41, 16  ;;  %v3732_v33 = vshrl.u32 %v7769_v41, 16 }
  0xf4   : > { %5947 = vmatprep.mubr.msk.bf16.mxu0 %vm715_vm3, %v6145_v44  ;;  %v7725_v37 = vpop.f32.mrf.mxu1  ;;  %v4397_v44 = vrot.slane %v7691_v36, 5  ;;  %v3668_v36 = vrot.slane %v3666_v45, 5  ;;  %v3697_v45 = vrot.slane %v3695_v17, 4  ;;  %v3693_v58 = vsel %vm6378_vm4, %v3688_v27, %v3692_v11 }
  0xf5   : > { %9120 = vst [vmem:[#allocation7_spill] sm:$0xff] %v7725_v37  ;;  %v7798_v12 = vpop.f32.mrf.mxu0  ;;  %v3724_v19 = vrot.slane %v3722_v16, 5  ;;  %v3756_v11 = vshrl.u32 %v7791_v7, 16 }
  0xf6   : > { %5910 = vmatmul.mubr.msk.bf16.gmra.mxu1 %vm715_vm3, %v5333_v48  ;;  %v3704_v48 = vshll.u32 %v7717_v57, 16  ;;  %v7749_v6 = vpop.f32.mrf.mxu1  ;;  %v4399_v4 = vrot.slane %v4397_v44, 4  ;;  %v3669_v17 = vsel %vm6378_vm4, %v3664_v8, %v3668_v36  ;;  %v4404_v36 = vrot.slane %v7717_v57, 5  ;;  %v6149_v8 = vld [vmem:[%s6334_s9 + $0x78] sm:$0xff]  }
  0xf7   : > { %5913 = vmatprep.mubr.msk.bf16.mxu1 %vm715_vm3, %v5334_v40  ;;  %v7746_v40 = vsel %vm6664_vm7, %v4392_v49, %v4393_v46  ;;  %9121 = vst [vmem:[#allocation6_spill] sm:$0xff] %v7749_v6  ;;  %v3700_v49 = vrot.slane %v3698_v10, 5  ;;  %v7812_v27 = vcombine.low %v3659_v63, %v3669_v17  ;;  %v7814_v57 = vcombine.low %v3683_v26, %v3693_v58  ;;  %v7828_v17 = vld [vmem:[%s6334_s9 + $0x58] sm:$0xf]  ;;  %v7834_v58 = vld [vmem:[%s6334_s9 + $0x44] sm:$0x1] }
  0xf8   : > { %v7758_v46 = vrot.slane %v3704_v48, 5  ;;  %v7775_v10 = vpop.f32.mrf.mxu1  ;;  %v7782_v48 = vsel %vm6664_vm7, %v5525_v51, %v4397_v44  ;;  %v7786_v38 = vsel %vm6664_vm7, %v4399_v4, %v4400_v22  ;;  %v3721_v51 = vrot.slane %v3719_v34, 4  ;;  %v5442_v34 = vld [vmem:[%s6334_s9 + $0x54] sm:$0xf] }
  0xf9   : > { %9122 = vst [vmem:[#allocation9_spill] sm:$0xff] %v7775_v10  ;;  %v3701_v44 = vor.u32 %v3700_v49, %v3697_v45  ;;  %v3746_v22 = vshll.u32 %v5439_v3, 16  ;;  %v4406_v13 = vrot.slane %v4404_v36, 4  ;;  %v4407_v63 = vrot.slane %v7756_v39, 5  ;;  %v5511_v49 = vld [vmem:[%s6334_s9 + $0x3c] sm:$0xe] }
  0xfa   : > { %v3711_v4 = vor.u32 %v3710_v52, %v7758_v46  ;;  %v7810_v45 = vpop.f32.mrf.mxu1  ;;  %v5526_v52 = vrot.slane %v5510_v18, 9  ;;  %v3725_v18 = vor.u32 %v3724_v19, %v3721_v51  ;;  %v9125_v6 = vcombine.low %v7523_v28, %v7539_v1 }
  0xfb   : > { %5948 = vmatmul.mubr.msk.bf16.gmra.mxu0 %vm715_vm3, %v6146_v21  ;;  %v3752_v21 = vshll.u32 %v7791_v7, 16  ;;  %9123 = vst [vmem:[#allocation8_spill] sm:$0xff] %v7810_v45  ;;  %v3748_v45 = vrot.slane %v3746_v22, 5  ;;  %v3767_v51 = vshrl.u32 %v5442_v34, 16  ;;  %v3770_v19 = vshll.u32 %v5442_v34, 16 }
  0xfc   : > { %5951 = vmatprep.mubr.msk.bf16.mxu0 %vm715_vm3, %v6147_v60  ;;  %v3714_v60 = vshll.u32 %v7756_v39, 16  ;;  %v7831_v26 = vrot.slane %v3711_v4, 4  ;;  %v3758_v39 = vrot.slane %v3756_v11, 4  ;;  %v7869_v22 = vsel %vm6664_vm7, %v4406_v13, %v4407_v63 }
  0xfd   : > { %v7839_v10 = vrot.slane %v3752_v21, 5  ;;  %v9127_v21 = vcombine.low %v7532_v25, %v7551_v14  ;;  %v4411_v25 = vrot.slane %v7769_v41, 5  ;;  %v6151_v14 = vld [vmem:[%s6334_s9 + $0x90] sm:$0xff]   ;;  %v5527_v1 = vrot.slane %v5511_v49, 9  ;;  %v5445_v41 = vld [vmem:[%s6334_s9 + $0x60] sm:$0xf] }
  0xfe   : > { %5914 = vmatmul.mubr.msk.bf16.gmra.mxu1 %vm715_vm3, %v5335_v35  ;;  %v6148_v35 = vld [vmem:[%s6334_s9 + $0x6c] sm:$0xff]   ;;  %v7824_v62 = vrot.slane %v3714_v60, 5  ;;  %v3769_v37 = vrot.slane %v3767_v51, 4 }
  0xff   : > { %5917 = vmatprep.mubr.msk.bf16.mxu1 %vm715_vm3, %v5336_v23  ;;  %v3743_v23 = vshrl.u32 %v5439_v3, 16  ;;  %v7822_v3 = vrot.slane %v3701_v44, 4  ;;  %v3734_v44 = vrot.slane %v3732_v33, 4  ;;  %v3780_v33 = vshrl.u32 %v7828_v17, 16 }
 0x100   : > { %v7820_v16 = vpop.f32.mrf.mxu0  ;;  %v3759_v13 = vor.u32 %v3758_v39, %v7839_v10  ;;  %v4418_v39 = vrot.slane %v7791_v7, 5  ;;  %v9131_v7 = vcombine.low %v7543_v43, %v7560_v2  ;;  %v9133_v43 = vcombine.low %v7564_v59, %v7574_v50  ;;  %v6152_v2 = vld [vmem:[%s6334_s9 + $0x9c] sm:$0xff]  }
 0x101   : > { %9124 = vst [vmem:[#allocation11_spill] sm:$0xff] %v7820_v16  ;;  %v3745_v60 = vrot.slane %v3743_v23, 4  ;;  %v6150_v23 = vld [vmem:[%s6334_s9 + $0x84] sm:$0xff]   ;;  %v7896_v16 = vld [vmem:[%s6334_s9 + $0x5c] sm:$0x1]  ;;  %v4425_v59 = vrot.slane %v7828_v17, 5 }
 0x102   : > { %v7857_v28 = vpop.f32.mrf.mxu0 }
 0x103   : > { %5952 = vmatmul.mubr.msk.bf16.gmra.mxu0 %vm715_vm3, %v6148_v35  ;;  %v7836_v35 = vrot.slane %v3728_v24, 5  ;;  %v3776_v24 = vshll.u32 %v7828_v17, 16  ;;  %9128 = vst [vmem:[#allocation15_spill] sm:$0xff] %v7857_v28  ;;  %v3772_v28 = vrot.slane %v3770_v19, 5 }
 0x104   : > { %5955 = vmatprep.mubr.msk.bf16.mxu0 %vm715_vm3, %v6149_v8  ;;  %v7845_v4 = vpop.f32.mrf.mxu1  ;;  %v7848_v8 = vld [vmem:[%s6334_s9 + $0x50] sm:$0x1]  ;;  %v7889_v49 = vpop.f32.mrf.mxu0 }
 0x105   : > { %9126 = vst [vmem:[#allocation10_spill] sm:$0xff] %v7845_v4  ;;  %v3735_v34 = vor.u32 %v3734_v44, %v7836_v35  ;;  %v7879_v4 = vrot.slane %v3725_v18, 4  ;;  %v7886_v11 = vrot.slane %v3776_v24, 5  ;;  %v3782_v44 = vrot.slane %v3780_v33, 4  ;;  %9130 = vst [vmem:[#allocation5_spill] sm:$0xff] %v7889_v49 }
 0x106   : > { %5918 = vmatmul.mubr.msk.bf16.gmra.mxu1 %vm715_vm3, %v9125_v6  ;;  %v7865_v6 = vsel %vm6664_vm7, %v5526_v52, %v4404_v36  ;;  %v3749_v36 = vor.u32 %v3748_v45, %v3745_v60  ;;  %v3762_v52 = vshll.u32 %v7848_v8, 16  ;;  %v7884_v63 = vpop.f32.mrf.mxu1  ;;  %v4413_v18 = vrot.slane %v4411_v25, 4  ;;  %v5512_v24 = vld [vmem:[%s6334_s9 + $0x48] sm:$0xe] }
 0x107   : > { %5921 = vmatprep.mubr.msk.bf16.mxu1 %vm715_vm3, %v9127_v21  ;;  %v3738_v21 = vshll.u32 %v7834_v58, 16  ;;  %9129 = vst [vmem:[#allocation13_spill] sm:$0xff] %v7884_v63  ;;  %v4414_v60 = vrot.slane %v7834_v58, 5  ;;  %v3736_v51 = vrot.slane %v3735_v34, 4  ;;  %v3791_v33 = vshrl.u32 %v5445_v41, 16 }
 0x108   : > { %v7902_v63 = vsel %vm6664_vm7, %v5527_v1, %v4411_v25  ;;  %v3750_v45 = vrot.slane %v3749_v36, 4  ;;  %v3760_v49 = vrot.slane %v3759_v13, 4  ;;  %v3764_v58 = vrot.slane %v3762_v52, 5  ;;  %v7917_v36 = vld [vmem:[%s6334_s9 + $0x64] sm:$0xf]  ;;  %v7924_v13 = vpop.f32.mrf.mxu0 }
 0x109   : > { %v3740_v19 = vrot.slane %v3738_v21, 5  ;;  %v3731_v34 = vsel %vm6378_vm4, %v7879_v4, %v7836_v35  ;;  %v3773_v21 = vor.u32 %v3772_v28, %v3769_v37  ;;  %v3783_v1 = vor.u32 %v3782_v44, %v7886_v11  ;;  %9134 = vst [vmem:[#allocation17_spill] sm:$0xff] %v7924_v13  ;;  %v5513_v28 = vld [vmem:[%s6334_s9 + $0x54] sm:$0xe]  ;;  %v6156_v13 = vld [vmem:[%s6334_s9 + $0xcc] sm:$0xff]  }
 0x10a   : > { %v3786_v25 = vshll.u32 %v7896_v16, 16  ;;  %v7928_v52 = vsel %vm6664_vm7, %v4413_v18, %v4414_v60  ;;  %v5528_v35 = vrot.slane %v5512_v24, 9  ;;  %v4420_v37 = vrot.slane %v4418_v39, 4 }
 0x10b   : > { %5956 = vmatmul.mubr.msk.bf16.gmra.mxu0 %vm715_vm3, %v6150_v23  ;;  %v3794_v23 = vshll.u32 %v5445_v41, 16  ;;  %v4421_v4 = vrot.slane %v7848_v8, 5  ;;  %v6153_v41 = vld [vmem:[%s6334_s9 + $0xa8] sm:$0xff]   ;;  %v3741_v44 = vsel %vm6378_vm4, %v3736_v51, %v3740_v19  ;;  %v3793_v50 = vrot.slane %v3791_v33, 4 }
 0x10c   : > { %5959 = vmatprep.mubr.msk.bf16.mxu0 %vm715_vm3, %v6151_v14  ;;  %v7908_v14 = vpop.f32.mrf.mxu1  ;;  %v3765_v18 = vsel %vm6378_vm4, %v3760_v49, %v3764_v58  ;;  %v3800_v60 = vshll.u32 %v7917_v36, 16  ;;  %v3804_v8 = vshrl.u32 %v7917_v36, 16  ;;  %v3784_v51 = vrot.slane %v3783_v1, 4  ;;  %v7946_v33 = vld [vmem:[%s6334_s9 + $0x68] sm:$0x1] }
 0x10d   : > { %9132 = vst [vmem:[#allocation16_spill] sm:$0xff] %v7908_v14  ;;  %v3774_v14 = vrot.slane %v3773_v21, 4  ;;  %v3788_v17 = vrot.slane %v3786_v25, 5  ;;  %v5529_v19 = vrot.slane %v5513_v28, 9  ;;  %v9137_v49 = vsel %vm6378_vm4, %v7831_v26, %v7824_v62  ;;  %v5448_v25 = vld [vmem:[%s6334_s9 + $0x6c] sm:$0xf] }
 0x10e   : > { %5922 = vmatmul.mubr.msk.bf16.gmra.mxu1 %vm715_vm3, %v9131_v7  ;;  %v3796_v7 = vrot.slane %v3794_v23, 5  ;;  %v7943_v24 = vpop.f32.mrf.mxu1  ;;  %v7967_v21 = vsel %vm6664_vm7, %v5528_v35, %v4418_v39  ;;  %v7971_v1 = vsel %vm6664_vm7, %v4420_v37, %v4421_v4  ;;  %v7974_v62 = vcombine.low %v3731_v34, %v3741_v44  ;;  %v5514_v4 = vld [vmem:[%s6334_s9 + $0x60] sm:$0xe]  ;;  %v5454_v44 = vld [vmem:[%s6334_s9 + $0x84] sm:$0xf] }
 0x10f   : > { %5925 = vmatprep.mubr.msk.bf16.mxu1 %vm715_vm3, %v9133_v43  ;;  %v3755_v43 = vsel %vm6378_vm4, %v3750_v45, %v7839_v10  ;;  %9135 = vst [vmem:[#allocation18_spill] sm:$0xff] %v7943_v24  ;;  %v9138_v45 = vsel %vm6378_vm4, %v7822_v3, %v7758_v46  ;;  %v4427_v46 = vrot.slane %v4425_v59, 4  ;;  %v4428_v3 = vrot.slane %v7896_v16, 5 }
 0x110   : > { %v7961_v23 = vcombine.low %v9138_v45, %v9137_v49  ;;  %9139 = vst [vmem:[#allocation14_spill] sm:$0xff] %v7974_v62  ;;  %v3797_v26 = vor.u32 %v3796_v7, %v3793_v50  ;;  %v7981_v28 = vcombine.low %v3755_v43, %v3765_v18  ;;  %v7983_v39 = vrot.slane %v3800_v60, 5 }
 0x111   : > { %v7949_v10 = vpop.f32.mrf.mxu0  ;;  %v7985_v35 = vrot.slane %v3804_v8, 4  ;;  %v3810_v37 = vshll.u32 %v7946_v33, 16  ;;  %v9141_v34 = vcombine.low %v7582_v54, %v7597_v56  ;;  %v3779_v50 = vsel %vm6378_vm4, %v3774_v14, %v7886_v11  ;;  %v5451_v54 = vld [vmem:[%s6334_s9 + $0x78] sm:$0xf] }
 0x112   : > { %9136 = vst [vmem:[#allocation12_spill] sm:$0xff] %v7949_v10  ;;  %9140 = vst [vmem:[#allocation19_spill] sm:$0xff] %v7981_v28  ;;  %v3789_v7 = vsel %vm6378_vm4, %v3784_v51, %v3788_v17  ;;  %v8005_v43 = vsel %vm6664_vm7, %v5529_v19, %v4425_v59  ;;  %v9143_v56 = vcombine.low %v7589_v29, %v7610_v42  ;;  %v3815_v60 = vshrl.u32 %v5448_v25, 16  ;;  %v8017_v51 = vld [vmem:[%s6334_s9 + $0x7c] sm:$0xf]  ;;  %v6155_v59 = vld [vmem:[%s6334_s9 + $0xc0] sm:$0xff]  }
 0x113   : > { %5960 = vmatmul.mubr.msk.bf16.gmra.mxu0 %vm715_vm3, %v6152_v2  ;;  %v7979_v2 = vld [vmem:[%s6334_s9 + $0x70] sm:$0xf]  ;;  %v8012_v18 = vpop.f32.mrf.mxu0  ;;  %v3818_v8 = vshll.u32 %v5448_v25, 16  ;;  %v8022_v17 = vsel %vm6664_vm7, %v4427_v46, %v4428_v3  ;;  %v8024_v29 = vrot.slane %v3797_v26, 4  ;;  %v5530_v42 = vrot.slane %v5514_v4, 9 }
 0x114   : > { %5963 = vmatprep.mubr.msk.bf16.mxu0 %vm715_vm3, %v6153_v41  ;;  %v6154_v41 = vld [vmem:[%s6334_s9 + $0xb4] sm:$0xff]   ;;  %9144 = vst [vmem:[#allocation21_spill] sm:$0xff] %v8012_v18  ;;  %v3824_v11 = vshll.u32 %v7979_v2, 16  ;;  %v3828_v14 = vshrl.u32 %v7979_v2, 16  ;;  %v4432_v19 = vrot.slane %v7917_v36, 5  ;;  %v8027_v49 = vcombine.low %v3779_v50, %v3789_v7 }
 0x115   : > { %v3807_v45 = vor.u32 %v7985_v35, %v7983_v39  ;;  %v8031_v25 = vrot.slane %v3810_v37, 5  ;;  %v3839_v46 = vshrl.u32 %v5451_v54, 16  ;;  %v3842_v3 = vshll.u32 %v5451_v54, 16  ;;  %v8043_v4 = vld [vmem:[%s6334_s9 + $0x88] sm:$0xf]  ;;  %v8046_v35 = vpop.f32.mrf.mxu0 }
 0x116   : > { %5926 = vmatmul.mubr.msk.bf16.gmra.mxu1 %vm715_vm3, %v9141_v34  ;;  %v7993_v16 = vpop.f32.mrf.mxu1  ;;  %9145 = vst [vmem:[#allocation22_spill] sm:$0xff] %v8027_v49  ;;  %v4435_v34 = vrot.slane %v7946_v33, 5  ;;  %v3848_v36 = vshll.u32 %v8017_v51, 16  ;;  %v3852_v26 = vshrl.u32 %v8017_v51, 16  ;;  %9147 = vst [vmem:[#allocation24_spill] sm:$0xff] %v8046_v35  ;;  %v3817_v33 = vrot.slane %v3815_v60, 4 }
 0x117   : > { %9142 = vst [vmem:[#allocation20_spill] sm:$0xff] %v7993_v16  ;;  %5929 = vmatprep.mubr.msk.bf16.mxu1 %vm715_vm3, %v9143_v56  ;;  %v8035_v56 = vld [vmem:[%s6334_s9 + $0x74] sm:$0x1]  ;;  %v3820_v37 = vrot.slane %v3818_v8, 5  ;;  %v8048_v50 = vrot.slane %v3824_v11, 5  ;;  %v3830_v7 = vrot.slane %v3828_v14, 4  ;;  %v9148_v54 = vcombine.low %v7601_v30, %v7617_v55  ;;  %v8076_v49 = vpop.f32.mrf.mxu0 }
 0x118   : > { %v8038_v58 = vpop.f32.mrf.mxu1  ;;  %v4434_v16 = vrot.slane %v4432_v19, 4  ;;  %v8061_v60 = vld [vmem:[%s6334_s9 + $0x80] sm:$0x1]  ;;  %v8064_v8 = vld [vmem:[%s6334_s9 + $0x6c] sm:$0xe]  ;;  %v3863_v11 = vshrl.u32 %v5454_v44, 16 }
 0x119   : > { %9146 = vst [vmem:[#allocation23_spill] sm:$0xff] %v8038_v58  ;;  %v8057_v58 = vsel %vm6664_vm7, %v5530_v42, %v4432_v19  ;;  %v3866_v14 = vshll.u32 %v5454_v44, 16  ;;  %v3876_v24 = vshrl.u32 %v8043_v4, 16  ;;  %v3841_v19 = vrot.slane %v3839_v46, 4  ;;  %9150 = vst [vmem:[#allocation26_spill] sm:$0xff] %v8076_v49 }
 0x11a   : > { %v8072_v42 = vpop.f32.mrf.mxu1  ;;  %v3844_v35 = vrot.slane %v3842_v3, 5  ;;  %v8074_v18 = vrot.slane %v3848_v36, 5  ;;  %v3854_v10 = vrot.slane %v3852_v26, 4  ;;  %v9151_v44 = vcombine.low %v7621_v15, %v7649_v32  ;;  %v8095_v32 = vld [vmem:[%s6334_s9 + $0x8c] sm:$0x1] }
 0x11b   : > { %5964 = vmatmul.mubr.msk.bf16.gmra.mxu0 %vm715_vm3, %v6154_v41  ;;  %v3834_v41 = vshll.u32 %v8035_v56, 16  ;;  %9149 = vst [vmem:[#allocation25_spill] sm:$0xff] %v8072_v42  ;;  %v3821_v30 = vor.u32 %v3820_v37, %v3817_v33  ;;  %v3831_v55 = vor.u32 %v3830_v7, %v8048_v50  ;;  %v3858_v46 = vshll.u32 %v8061_v60, 16  ;;  %v5516_v33 = vld [vmem:[%s6334_s9 + $0x78] sm:$0xe] }
 0x11c   : > { %5967 = vmatprep.mubr.msk.bf16.mxu0 %vm715_vm3, %v6155_v59  ;;  %v3872_v59 = vshll.u32 %v8043_v4, 16  ;;  %v8086_v3 = vrot.slane %v3807_v45, 4  ;;  %v8090_v36 = vsel %vm6664_vm7, %v4434_v16, %v4435_v34  ;;  %v5531_v26 = vrot.slane %v8064_v8, 9  ;;  %v8100_v42 = vpop.f32.mrf.mxu1  ;;  %v5457_v8 = vld [vmem:[%s6334_s9 + $0x90] sm:$0xf] }
 0x11d   : > { %v4446_v15 = vrot.slane %v8017_v51, 5  ;;  %v3865_v37 = vrot.slane %v3863_v11, 4  ;;  %v3868_v7 = vrot.slane %v3866_v14, 5  ;;  %9152 = vst [vmem:[#allocation27_spill] sm:$0xff] %v8100_v42  ;;  %v3836_v45 = vrot.slane %v3834_v41, 5 }
 0x11e   : > { %5930 = vmatmul.mubr.msk.bf16.gmra.mxu1 %vm715_vm3, %v9148_v54  ;;  %v4439_v54 = vrot.slane %v7979_v2, 5  ;;  %v8098_v2 = vrot.slane %v3872_v59, 5  ;;  %v4442_v49 = vrot.slane %v8035_v56, 5  ;;  %v3845_v16 = vor.u32 %v3844_v35, %v3841_v19  ;;  %v8109_v59 = vld [vmem:[%s6334_s9 + $0x94] sm:$0xf] }
 0x11f   : > { %5933 = vmatprep.mubr.msk.bf16.mxu1 %vm715_vm3, %v9151_v44  ;;  %v3878_v44 = vrot.slane %v3876_v24, 4  ;;  %v3855_v34 = vor.u32 %v3854_v10, %v8074_v18  ;;  %v3822_v51 = vrot.slane %v3821_v30, 4  ;;  %v3832_v11 = vrot.slane %v3831_v55, 4 }
 0x120   : > { %v4441_v62 = vrot.slane %v4439_v54, 4  ;;  %v3860_v14 = vrot.slane %v3858_v46, 5  ;;  %v9153_v24 = vcombine.low %v7742_v61, %v7746_v40  ;;  %v5532_v56 = vrot.slane %v5516_v33, 9 }
 0x121   : > { %v4448_v35 = vrot.slane %v4446_v15, 4  ;;  %v4449_v10 = vrot.slane %v8061_v60, 5  ;;  %v3882_v41 = vshll.u32 %v8095_v32, 16  ;;  %v3879_v30 = vor.u32 %v3878_v44, %v8098_v2 }
 0x122   : > { %v3887_v55 = vshrl.u32 %v5457_v8, 16  ;;  %v3890_v46 = vshll.u32 %v5457_v8, 16  ;;  %v9155_v61 = vcombine.low %v7661_v9, %v7666_v47  ;;  %v3846_v40 = vrot.slane %v3845_v16, 4 }
 0x123   : > { %v8105_v28 = vpop.f32.mrf.mxu0  ;;  %5968 = vmatmul.mubr.msk.bf16.gmra.mxu0 %vm715_vm3, %v6156_v13  ;;  %v3869_v13 = vor.u32 %v3868_v7, %v3865_v37  ;;  %v3856_v33 = vrot.slane %v3855_v34, 4  ;;  %v3896_v60 = vshll.u32 %v8109_v59, 16  ;;  %v3813_v37 = vsel %vm6378_vm4, %v8086_v3, %v8031_v25 }
 0x124   : > { %6007 = vmatprep.mubr.msk.bf16.mxu0 %vm715_vm3, %v9153_v24  ;;  %v3900_v24 = vshrl.u32 %v8109_v59, 16  ;;  %v3827_v9 = vsel %vm6378_vm4, %v3822_v51, %v8048_v50  ;;  %v8141_v47 = vsel %vm6664_vm7, %v5531_v26, %v4439_v54  ;;  %v8145_v7 = vsel %vm6664_vm7, %v4441_v62, %v4442_v49  ;;  %v5517_v54 = vld [vmem:[%s6334_s9 + $0x84] sm:$0xe]  ;;  %v9194_v31 = vld [vmem:[#allocation27_spill] sm:$0xff] }
 0x125   : > { %v8117_v19 = vpop.f32.mrf.mxu0  ;;  %v8153_v25 = vsel %vm6664_vm7, %v5532_v56, %v4446_v15  ;;  %v8157_v50 = vsel %vm6664_vm7, %v4448_v35, %v4449_v10  ;;  %v3884_v3 = vrot.slane %v3882_v41, 5  ;;  %v3870_v62 = vrot.slane %v3869_v13, 4  ;;  %v8181_v13 = vld [vmem:[%s6334_s9 + $0x98] sm:$0x1] }
 0x126   : > { %9154 = vst [vmem:[#allocation28_spill] sm:$0xff] %v8117_v19  ;;  %v8120_v42 = vpop.f32.mrf.mxu1  ;;  %5934 = vmatmul.mubr.msk.bf16.gmra.mxu1 %vm715_vm3, %v9155_v61  ;;  %v3880_v49 = vrot.slane %v3879_v30, 4  ;;  %v3889_v16 = vrot.slane %v3887_v55, 4  ;;  %v3892_v34 = vrot.slane %v3890_v46, 5  ;;  %v3851_v15 = vsel %vm6378_vm4, %v3846_v40, %v8074_v18  ;;  %v5460_v30 = vld [vmem:[%s6334_s9 + $0x9c] sm:$0xf] }
 0x127   : > { %v8128_v19 = vpop.f32.mrf.mxu0  ;;  %5973 = vmatprep.mubr.msk.bf16.mxu1 %vm715_vm3, %v7812_v27  ;;  %v3837_v27 = vsel %vm6378_vm4, %v3832_v11, %v3836_v45  ;;  %v3861_v45 = vsel %vm6378_vm4, %v3856_v33, %v3860_v14  ;;  %v8169_v51 = vrot.slane %v3896_v60, 5  ;;  %v3902_v11 = vrot.slane %v3900_v24, 4  ;;  %v8212_v24 = vld [vmem:[%s6334_s9 + $0xa0] sm:$0xf] }
 0x128   : > { %v8147_v44 = vpop.f32.mrf.mxu1  ;;  %v9156_v35 = vcombine.low %v7782_v48, %v7786_v38  ;;  %v5546_v10 = vcombine.low %v8005_v43, %v8022_v17  ;;  %v5547_v41 = vcombine.low %v8057_v58, %v8090_v36  ;;  %v5533_v18 = vrot.slane %v5517_v54, 9 }
 0x129   : > { %v8160_v26 = vpop.f32.mrf.mxu0  ;;  %v4453_v14 = vrot.slane %v8043_v4, 5  ;;  %v9157_v48 = vcombine.low %v7865_v6, %v7869_v22  ;;  %v9158_v38 = vsel %vm6378_vm4, %v8024_v29, %v7983_v39  ;;  %v8197_v61 = vcombine.low %v3827_v9, %v3837_v27  ;;  %v5518_v29 = vld [vmem:[%s6334_s9 + $0x90] sm:$0xe]  ;;  %v9165_v4 = vld [vmem:[#allocation5_spill] sm:$0xff] }
 0x12a   : > { %v8162_v8 = vpop.f32.mrf.mxu1  ;;  %v8195_v46 = vcombine.low %v9158_v38, %v3813_v37  ;;  %v8203_v60 = vcombine.low %v3851_v15, %v3861_v45  ;;  %v3875_v6 = vsel %vm6378_vm4, %v3870_v62, %v8098_v2  ;;  %v3885_v22 = vsel %vm6378_vm4, %v3880_v49, %v3884_v3 }
 0x12b   : > { %v5805_v56 = vpop.f32.mrf.mxu0  ;;  %6008 = vmatmul.mubr.msk.bf16.vlgmr.msra.gmra.mxu0 %vm715_vm3, %v9156_v35  ;;  %v3893_v39 = vor.u32 %v3892_v34, %v3889_v16  ;;  %v3903_v9 = vor.u32 %v3902_v11, %v8169_v51  ;;  %v3906_v27 = vshll.u32 %v8181_v13, 16  ;;  %v3911_v54 = vshrl.u32 %v5460_v30, 16 }
 0x12c   : > { %v8184_v55 = vpop.f32.mrf.mxu1  ;;  %6011 = vmatprep.mubr.msk.bf16.mxu0 %vm715_vm3, %v9157_v48  ;;  %v3914_v15 = vshll.u32 %v5460_v30, 16  ;;  %v8223_v3 = vsel %vm6664_vm7, %v5533_v18, %v4453_v14  ;;  %v4455_v62 = vrot.slane %v4453_v14, 4  ;;  %v4456_v49 = vrot.slane %v8095_v32, 5 }
 0x12d   : > { %v1519_v33 = vpop.f32.mrf.mxu0  ;;  %v5534_v16 = vrot.slane %v5518_v29, 9  ;;  %v4460_v34 = vrot.slane %v8109_v59, 5  ;;  %v3920_v11 = vshll.u32 %v8212_v24, 16  ;;  %v3924_v35 = vshrl.u32 %v8212_v24, 16 }
 0x12e   : > { %v5771_v37 = vpop.f32.mrf.mxu1  ;;  %5974 = vmatmul.mubr.msk.bf16.vlgmr.msra.gmra.mxu1 %vm715_vm3, %v7814_v57  ;;  %v8232_v48 = vcombine.low %v3875_v6, %v3885_v22  ;;  %v8234_v18 = vrot.slane %v3893_v39, 4  ;;  %v3904_v32 = vrot.slane %v3903_v9, 4  ;;  %v3908_v38 = vrot.slane %v3906_v27, 5  ;;  %v5463_v22 = vld [vmem:[%s6334_s9 + $0xa8] sm:$0xf] }
 0x12f   : > { %v1103_v45 = vadd.f32 %v5771_v37, %v7710_v5  ;;  %v5806_v2 = vpop.f32.mrf.mxu0  ;;  %5977 = vmatprep.mubr.msk.bf16.mxu1 %vm715_vm3, %v7961_v23  ;;  %v3913_v29 = vrot.slane %v3911_v54, 4  ;;  %v3916_v59 = vrot.slane %v3914_v15, 5  ;;  %v4463_v6 = vrot.slane %v8181_v13, 5  ;;  %v8260_v27 = vld [vmem:[%s6334_s9 + $0xac] sm:$0xf] }
 0x130   : > { %v1094_v57 = vpop.f32.mrf.mxu1  ;;  %v3926_v9 = vrot.slane %v3924_v35, 4  ;;  %v9162_v35 = vld [vmem:[#allocation11_spill] sm:$0xff] }
 0x131   : > { %v8229_v5 = vadd.f32 %v5805_v56, %v1103_v45  ;;  %v1095_v23 = vadd.f32 %v1094_v57, %v7734_v20  ;;  %v1522_v30 = vpop.f32.mrf.mxu0  ;;  %v9159_v45 = vcombine.low %v7902_v63, %v7928_v52  ;;  %v8245_v20 = vsel %vm6664_vm7, %v4455_v62, %v4456_v49  ;;  %v5519_v62 = vld [vmem:[%s6334_s9 + $0x9c] sm:$0xe] }
 0x132   : > { %v5772_v14 = vpop.f32.mrf.mxu1  ;;  %v4462_v63 = vrot.slane %v4460_v34, 4  ;;  %v8257_v52 = vrot.slane %v3920_v11, 5  ;;  %v4467_v49 = vrot.slane %v8212_v24, 5  ;;  %v3944_v24 = vshll.u32 %v8260_v27, 16 }
 0x133   : > { %v8236_v37 = vadd.f32 %v1519_v33, %v1095_v23  ;;  %v1106_v40 = vadd.f32 %v5772_v14, %v7753_v53  ;;  %v5809_v56 = vpop.f32.mrf.mxu0  ;;  %6012 = vmatmul.mubr.msk.bf16.gmra.mxu0 %vm715_vm3, %v9159_v45  ;;  %v9160_v33 = vcombine.low %v7967_v21, %v7971_v1  ;;  %v8255_v53 = vsel %vm6664_vm7, %v5534_v16, %v4460_v34  ;;  %v5462_v1 = vld [vmem:[%s6334_s9 + $0xa4] sm:$0x1]  ;;  %v9161_v16 = vld [vmem:[#allocation14_spill] sm:$0xff] }
 0x134   : > { %v1097_v39 = vpop.f32.mrf.mxu1  ;;  %v3899_v21 = vsel %vm6378_vm4, %v8234_v18, %v8169_v51  ;;  %v3935_v34 = vshrl.u32 %v5463_v22, 16  ;;  %v9163_v51 = vld [vmem:[#allocation19_spill] sm:$0xff]  ;;  %v3948_v18 = vshrl.u32 %v8260_v27, 16 }
 0x135   : > { %6015 = vmatprep.mubr.msk.bf16.mxu0 %vm715_vm3, %v9160_v33  ;;  %v8262_v54 = vadd.f32 %v5806_v2, %v1106_v40  ;;  %v1098_v13 = vadd.f32 %v1097_v39, %v7798_v12  ;;  %v1535_v15 = vpop.f32.mrf.mxu0  ;;  %v3909_v40 = vsel %vm6378_vm4, %v3904_v32, %v3908_v38  ;;  %v3917_v2 = vor.u32 %v3916_v59, %v3913_v29  ;;  %v9164_v59 = vld [vmem:[#allocation15_spill] sm:$0xff] }
 0x136   : > { %v5775_v57 = vpop.f32.mrf.mxu1  ;;  %5978 = vmatmul.mubr.msk.bf16.gmra.mxu1 %vm715_vm3, %v9161_v16  ;;  %v3938_v12 = vshll.u32 %v5463_v22, 16  ;;  %v8285_v39 = vsel %vm6664_vm7, %v4462_v63, %v4463_v6  ;;  %v3927_v32 = vor.u32 %v3926_v9, %v8257_v52  ;;  %v3930_v38 = vshll.u32 %v5462_v1, 16 }
 0x137   : > { %v8276_v11 = vadd.f32 %v1522_v30, %v1098_v13  ;;  %v1119_v23 = vadd.f32 %v5775_v57, %v9162_v35  ;;  %v5810_v14 = vpop.f32.mrf.mxu0  ;;  %5981 = vmatprep.mubr.msk.bf16.mxu1 %vm715_vm3, %v9163_v51  ;;  %v5535_v30 = vrot.slane %v5519_v62, 9  ;;  %v4469_v13 = vrot.slane %v4467_v49, 4 }
 0x138   : > { %v1110_v45 = vpop.f32.mrf.mxu1  ;;  %v4470_v57 = vrot.slane %v5462_v1, 5  ;;  %v8293_v51 = vrot.slane %v3917_v2, 4  ;;  %v3937_v6 = vrot.slane %v3935_v34, 4  ;;  %v3940_v63 = vrot.slane %v3938_v12, 5  ;;  %v8303_v1 = vld [vmem:[%s6334_s9 + $0xb0] sm:$0x1] }
 0x139   : > { %v8288_v29 = vadd.f32 %v5809_v56, %v1119_v23  ;;  %v1111_v22 = vadd.f32 %v1110_v45, %v9164_v59  ;;  %v1538_v33 = vpop.f32.mrf.mxu0  ;;  %v8305_v23 = vrot.slane %v3944_v24, 5  ;;  %v3950_v2 = vrot.slane %v3948_v18, 4  ;;  %v9166_v12 = vld [vmem:[#allocation17_spill] sm:$0xff] }
 0x13a   : > { %v5776_v16 = vpop.f32.mrf.mxu1  ;;  %v8315_v43 = vrot.slane %v3927_v32, 4  ;;  %v8317_v17 = vrot.slane %v3930_v38, 5  ;;  %v8325_v58 = vsel %vm6664_vm7, %v5535_v30, %v4467_v49  ;;  %v8329_v36 = vsel %vm6664_vm7, %v4469_v13, %v4470_v57  ;;  %v8341_v30 = vld [vmem:[%s6334_s9 + $0xb8] sm:$0xf] }
 0x13b   : > { %v8295_v9 = vadd.f32 %v1535_v15, %v1111_v22  ;;  %v1122_v62 = vadd.f32 %v5776_v16, %v9165_v4  ;;  %v5813_v56 = vpop.f32.mrf.mxu0  ;;  %6016 = vmatmul.mubr.msk.bf16.gmra.mxu0 %vm715_vm3, %v5546_v10  ;;  %v8311_v15 = vcombine.low %v3899_v21, %v3909_v40  ;;  %v5520_v10 = vld [vmem:[%s6334_s9 + $0xa8] sm:$0xe]  ;;  %v3941_v32 = vor.u32 %v3940_v63, %v3937_v6  ;;  %v9168_v22 = vld [vmem:[#allocation12_spill] sm:$0xff] }
 0x13c   : > { %v1113_v45 = vpop.f32.mrf.mxu1  ;;  %6019 = vmatprep.mubr.msk.bf16.mxu0 %vm715_vm3, %v5547_v41  ;;  %v5466_v41 = vld [vmem:[%s6334_s9 + $0xb4] sm:$0xf]  ;;  %v9167_v40 = vld [vmem:[#allocation22_spill] sm:$0xff]  ;;  %v3954_v38 = vshll.u32 %v8303_v1, 16  ;;  %v4474_v49 = vrot.slane %v8260_v27, 5  ;;  %v3951_v16 = vor.u32 %v3950_v2, %v8305_v23  ;;  %v3933_v27 = vsel %vm6378_vm4, %v8315_v43, %v8317_v17 }
 0x13d   : > { %v8320_v34 = vadd.f32 %v5810_v14, %v1122_v62  ;;  %v1114_v24 = vadd.f32 %v1113_v45, %v9166_v12  ;;  %v1551_v18 = vpop.f32.mrf.mxu0  ;;  %v5536_v62 = vrot.slane %v5520_v10, 9  ;;  %v3959_v6 = vshrl.u32 %v5466_v41, 16 }
 0x13e   : > { %v5779_v21 = vpop.f32.mrf.mxu1  ;;  %5982 = vmatmul.mubr.msk.bf16.gmra.mxu1 %vm715_vm3, %v9167_v40  ;;  %v3962_v63 = vshll.u32 %v5466_v41, 16  ;;  %v3968_v2 = vshll.u32 %v8341_v30, 16  ;;  %v3972_v10 = vshrl.u32 %v8341_v30, 16  ;;  %v5469_v40 = vld [vmem:[%s6334_s9 + $0xc0] sm:$0xf]  ;;  %v3942_v4 = vrot.slane %v3941_v32, 4 }
 0x13f   : > { %v8343_v59 = vadd.f32 %v1538_v33, %v1114_v24  ;;  %v1135_v13 = vadd.f32 %v5779_v21, %v9168_v22  ;;  %v5814_v57 = vpop.f32.mrf.mxu0  ;;  %5985 = vmatprep.mubr.msk.bf16.mxu1 %vm715_vm3, %v8195_v46  ;;  %v9170_v24 = vld [vmem:[#allocation21_spill] sm:$0xff]  ;;  %v3956_v43 = vrot.slane %v3954_v38, 5  ;;  %v4476_v17 = vrot.slane %v4474_v49, 4 }
 0x140   : > { %v1126_v45 = vpop.f32.mrf.mxu1  ;;  %v4477_v33 = vrot.slane %v8303_v1, 5  ;;  %v8371_v14 = vsel %vm6664_vm7, %v5536_v62, %v4474_v49  ;;  %v8374_v32 = vld [vmem:[%s6334_s9 + $0xc4] sm:$0xf]  ;;  %v9174_v1 = vcombine.low %v8153_v25, %v8157_v50  ;;  %v8386_v62 = vrot.slane %v3968_v2, 5 }
 0x141   : > { %v8355_v12 = vadd.f32 %v5813_v56, %v1135_v13  ;;  %v1127_v21 = vadd.f32 %v1126_v45, %v9170_v24  ;;  %v1554_v46 = vpop.f32.mrf.mxu0  ;;  %v9172_v56 = vld [vmem:[#allocation24_spill] sm:$0xff]  ;;  %v9173_v45 = vcombine.low %v8141_v47, %v8145_v7  ;;  %v3952_v24 = vrot.slane %v3951_v16, 4  ;;  %v9175_v16 = vld [vmem:[#allocation26_spill] sm:$0xff] }
 0x142   : > { %v5780_v22 = vpop.f32.mrf.mxu1  ;;  %v3983_v47 = vshrl.u32 %v5469_v40, 16  ;;  %v3986_v7 = vshll.u32 %v5469_v40, 16  ;;  %v3947_v25 = vsel %vm6378_vm4, %v3942_v4, %v8305_v23  ;;  %v8395_v50 = vsel %vm6664_vm7, %v4476_v17, %v4477_v33  ;;  %v5521_v40 = vld [vmem:[%s6334_s9 + $0xb4] sm:$0xe] }
 0x143   : > { %9169 = vst [vmem:[#allocation14_spill] sm:$0xff] %v8355_v12  ;;  %v8362_v35 = vadd.f32 %v1551_v18, %v1127_v21  ;;  %v1138_v41 = vadd.f32 %v5780_v22, %v9172_v56  ;;  %v5817_v13 = vpop.f32.mrf.mxu0  ;;  %6020 = vmatmul.mubr.msk.bf16.gmra.mxu0 %vm715_vm3, %v9173_v45  ;;  %v8381_v18 = vld [vmem:[%s6334_s9 + $0xbc] sm:$0x1]  ;;  %v3961_v21 = vrot.slane %v3959_v6, 4  ;;  %v3964_v22 = vrot.slane %v3962_v63, 5 }
 0x144   : > { %v1129_v38 = vpop.f32.mrf.mxu1  ;;  %6023 = vmatprep.mubr.msk.bf16.mxu0 %vm715_vm3, %v9174_v1  ;;  %v3996_v6 = vshrl.u32 %v8374_v32, 16  ;;  %v3978_v23 = vshll.u32 %v8381_v18, 16  ;;  %v4481_v17 = vrot.slane %v8341_v30, 5  ;;  %v9176_v1 = vld [vmem:[#allocation28_spill] sm:$0xff] }
 0x145   : > { %9171 = vst [vmem:[#allocation11_spill] sm:$0xff] %v8362_v35  ;;  %v8383_v56 = vadd.f32 %v5814_v57, %v1138_v41  ;;  %v1130_v45 = vadd.f32 %v1129_v38, %v9175_v16  ;;  %v1567_v49 = vpop.f32.mrf.mxu0  ;;  %v3974_v35 = vrot.slane %v3972_v10, 4  ;;  %v3992_v57 = vshll.u32 %v8374_v32, 16 }
 0x146   : > { %v5783_v12 = vpop.f32.mrf.mxu1  ;;  %5986 = vmatmul.mubr.msk.bf16.gmra.mxu1 %vm715_vm3, %v8197_v61  ;;  %v3957_v61 = vsel %vm6378_vm4, %v3952_v24, %v3956_v43  ;;  %v3965_v33 = vor.u32 %v3964_v22, %v3961_v21  ;;  %v3985_v41 = vrot.slane %v3983_v47, 4  ;;  %v3988_v38 = vrot.slane %v3986_v7, 5 }
 0x147   : > { %v8399_v63 = vadd.f32 %v1554_v46, %v1130_v45  ;;  %v1151_v2 = vadd.f32 %v5783_v12, %v8105_v28  ;;  %v5818_v10 = vpop.f32.mrf.mxu0  ;;  %5989 = vmatprep.mubr.msk.bf16.mxu1 %vm715_vm3, %v8203_v60  ;;  %v9177_v60 = vsel %vm6378_vm4, %v8293_v51, %v8257_v52  ;;  %v3975_v24 = vor.u32 %v3974_v35, %v8386_v62 }
 0x148   : > { %v1142_v4 = vpop.f32.mrf.mxu1  ;;  %v8417_v43 = vcombine.low %v9177_v60, %v3933_v27  ;;  %v8420_v30 = vcombine.low %v3947_v25, %v3957_v61  ;;  %v8424_v22 = vrot.slane %v3992_v57, 5  ;;  %v3998_v47 = vrot.slane %v3996_v6, 4  ;;  %v5471_v27 = vld [vmem:[%s6334_s9 + $0xc8] sm:$0x1] }
 0x149   : > { %v8409_v46 = vadd.f32 %v5817_v13, %v1151_v2  ;;  %v1143_v28 = vadd.f32 %v1142_v4, %v9176_v1  ;;  %v1570_v12 = vpop.f32.mrf.mxu0  ;;  %v5553_v13 = vcombine.low %v8371_v14, %v8395_v50  ;;  %v9178_v52 = vcombine.low %v8223_v3, %v8245_v20  ;;  %v5472_v14 = vld [vmem:[%s6334_s9 + $0xcc] sm:$0xf]  ;;  %v8445_v20 = vld [vmem:[%s6334_s9 + $0xd0] sm:$0xf]  ;;  %v5522_v4 = vld [vmem:[%s6334_s9 + $0xc0] sm:$0xe] }
 0x14a   : > { %v5784_v21 = vpop.f32.mrf.mxu1  ;;  %v8433_v35 = vrot.slane %v3978_v23, 5  ;;  %v5537_v51 = vrot.slane %v5521_v40, 9  ;;  %v9179_v50 = vcombine.low %v8255_v53, %v8285_v39  ;;  %v4484_v57 = vrot.slane %v8381_v18, 5 }
 0x14b   : > { %v8426_v7 = vadd.f32 %v1567_v49, %v1143_v28  ;;  %v1154_v16 = vadd.f32 %v5784_v21, %v8128_v19  ;;  %v5821_v45 = vpop.f32.mrf.mxu0  ;;  %6024 = vmatmul.mubr.msk.bf16.gmra.mxu0 %vm715_vm3, %v9178_v52  ;;  %v8441_v49 = vrot.slane %v3965_v33, 4  ;;  %v4483_v19 = vrot.slane %v4481_v17, 4 }
 0x14c   : > { %v1145_v25 = vpop.f32.mrf.mxu1  ;;  %6027 = vmatprep.mubr.msk.bf16.mxu0 %vm715_vm3, %v9179_v50  ;;  %v3989_v3 = vor.u32 %v3988_v38, %v3985_v41  ;;  %v8450_v23 = vrot.slane %v3975_v24, 4  ;;  %v4488_v53 = vrot.slane %v8374_v32, 5  ;;  %v3999_v33 = vor.u32 %v3998_v47, %v8424_v22 }
 0x14d   : > { %v8447_v6 = vadd.f32 %v5818_v10, %v1154_v16  ;;  %v1146_v2 = vadd.f32 %v1145_v25, %v8160_v26  ;;  %v1583_v61 = vpop.f32.mrf.mxu0  ;;  %v4002_v18 = vshll.u32 %v5471_v27, 16  ;;  %v4007_v40 = vshrl.u32 %v5472_v14, 16  ;;  %v9182_v10 = vld [vmem:[#allocation7_spill] sm:$0xff]  ;;  %v9183_v16 = vld [vmem:[#allocation6_spill] sm:$0xff] }
 0x14e   : > { %v5787_v39 = vpop.f32.mrf.mxu1  ;;  %5990 = vmatmul.mubr.msk.bf16.gmra.mxu1 %vm715_vm3, %v8232_v48  ;;  %v4010_v41 = vshll.u32 %v5472_v14, 16  ;;  %v4016_v28 = vshll.u32 %v8445_v20, 16  ;;  %v4020_v32 = vshrl.u32 %v8445_v20, 16  ;;  %v4482_v48 = vsel %vm6664_vm7, %v5537_v51, %v4481_v17  ;;  %v9184_v17 = vld [vmem:[#allocation9_spill] sm:$0xff] }
 0x14f   : > { %9180 = vst [vmem:[#allocation19_spill] sm:$0xff] %v8447_v6  ;;  %v8457_v38 = vadd.f32 %v1570_v12, %v1146_v2  ;;  %v1167_v1 = vadd.f32 %v5787_v39, %v9182_v10  ;;  %v5822_v26 = vpop.f32.mrf.mxu0  ;;  %5993 = vmatprep.mubr.msk.bf16.mxu1 %vm715_vm3, %v8311_v15  ;;  %v4485_v24 = vsel %vm6664_vm7, %v4483_v19, %v4484_v57  ;;  %v3990_v21 = vrot.slane %v3989_v3, 4 }
 0x150   : > { %v1158_v60 = vpop.f32.mrf.mxu1  ;;  %v5538_v12 = vrot.slane %v5522_v4, 9  ;;  %v4490_v25 = vrot.slane %v4488_v53, 4  ;;  %v4491_v15 = vrot.slane %v5471_v27, 5  ;;  %v4000_v2 = vrot.slane %v3999_v33, 4  ;;  %v5474_v33 = vld [vmem:[%s6334_s9 + $0xd4] sm:$0x1] }
 0x151   : > { %9181 = vst [vmem:[#allocation15_spill] sm:$0xff] %v8457_v38  ;;  %v8468_v47 = vadd.f32 %v5821_v45, %v1167_v1  ;;  %v1159_v52 = vadd.f32 %v1158_v60, %v9183_v16  ;;  %v1586_v14 = vpop.f32.mrf.mxu0  ;;  %v4004_v39 = vrot.slane %v4002_v18, 5  ;;  %v4009_v10 = vrot.slane %v4007_v40, 4  ;;  %v9186_v18 = vld [vmem:[#allocation8_spill] sm:$0xff] }
 0x152   : > { %v5788_v50 = vpop.f32.mrf.mxu1  ;;  %v4012_v38 = vrot.slane %v4010_v41, 5  ;;  %v9185_v45 = vcombine.low %v8325_v58, %v8329_v36  ;;  %v8478_v57 = vrot.slane %v4016_v28, 5  ;;  %v4022_v27 = vrot.slane %v4020_v32, 4 }
 0x153   : > { %v8471_v6 = vadd.f32 %v1583_v61, %v1159_v52  ;;  %v1170_v51 = vadd.f32 %v5788_v50, %v9184_v17  ;;  %v5825_v19 = vpop.f32.mrf.mxu0  ;;  %v3971_v61 = vsel %vm6378_vm4, %v8441_v49, %v8386_v62  ;;  %v3981_v4 = vsel %vm6378_vm4, %v8450_v23, %v8433_v35  ;;  %v5523_v62 = vld [vmem:[%s6334_s9 + $0xcc] sm:$0xe]  ;;  %s8809_s9 = scalar_lea.vmem [#allocation2], %s5035_s8 }
 0x154   : > { %6028 = vmatmul.mubr.msk.bf16.gmra.mxu0 %vm715_vm3, %v9185_v45  ;;  %v1161_v3 = vpop.f32.mrf.mxu1  ;;  %v4495_v58 = vrot.slane %v8445_v20, 5  ;;  %v4492_v1 = vsel %vm6664_vm7, %v4490_v25, %v4491_v15  ;;  %v5554_v35 = vcombine.low %v4482_v48, %v4485_v24  ;;  %v3995_v20 = vsel %vm6378_vm4, %v3990_v21, %v8424_v22  ;;  %v9188_v25 = vld [vmem:[#allocation13_spill] sm:$0xff]  ;;  %s4914_s11 = sshll.u32 %s8809_s9, 4  ;;  %s8952_s11 = int_to_ptr.vmem [resolvable:$true] %s4914_s11 }
 0x155   : > { %6031 = vmatprep.mubr.msk.bf16.mxu0 %vm715_vm3, %v5553_v13  ;;  %v8491_v36 = vadd.f32 %v5822_v26, %v1170_v51  ;;  %v1162_v40 = vadd.f32 %v1161_v3, %v9186_v18  ;;  %v1599_v41 = vpop.f32.mrf.mxu0  ;;  %v4489_v13 = vsel %vm6664_vm7, %v5538_v12, %v4488_v53  ;;  %v4005_v23 = vsel %vm6378_vm4, %v4000_v2, %v4004_v39  ;;  %v9187_v53 = vld [vmem:[#allocation10_spill] sm:$0xff]  ;;  %s6159_s23 = scalar_lea.vmem %s8952_s11, 4096  ;;  %p6166_p1 = scmp.lt.s32.totalorder %s8952_s11, %s6164_s27 }
 0x156   : > { %v5791_v49 = vpop.f32.mrf.mxu1  ;;  %5994 = vmatmul.mubr.msk.bf16.gmra.mxu1 %vm715_vm3, %v8417_v43  ;;  %v4013_v26 = vor.u32 %v4012_v38, %v4009_v10  ;;  %v4023_v12 = vor.u32 %v4022_v27, %v8478_v57  ;;  %v4026_v43 = vshll.u32 %v5474_v33, 16  ;;  %v5555_v24 = vcombine.low %v4489_v13, %v4492_v1  ;;  %p6160_p12 = scmp.ne.s32.totalorder %s8952_s11, %s6159_s23  ;;  %p6167_p2 = scmp.lt.s32.totalorder %s6165_s28, %s6159_s23 }
 0x157   : > { %v8506_v28 = vadd.f32 %v1586_v14, %v1162_v40  ;;  %v1183_v32 = vadd.f32 %v5791_v49, %v9187_v53  ;;  %v5826_v60 = vpop.f32.mrf.mxu0  ;;  %5997 = vmatprep.mubr.msk.bf16.mxu1 %vm715_vm3, %v8420_v30  ;;  %v5539_v16 = vrot.slane %v5523_v62, 9  ;;  %v4497_v52 = vrot.slane %v4495_v58, 4  ;;  %v9189_v30 = vld [vmem:[#allocation16_spill] sm:$0xff] }
 0x158   : > { %v1174_v48 = vpop.f32.mrf.mxu1  ;;  %v4498_v22 = vrot.slane %v5474_v33, 5  ;;  %v5489_v50 = vcombine.low %v3971_v61, %v3981_v4  ;;  %v5490_v2 = vcombine.low %v3995_v20, %v4005_v23  ;;  %v4014_v39 = vrot.slane %v4013_v26, 4  ;;  %v9190_v33 = vld [vmem:[#allocation18_spill] sm:$0xff]  ;;  %v9191_v62 = vld [vmem:[#allocation20_spill] sm:$0xff]  ;;  %v9192_v26 = vld [vmem:[#allocation23_spill] sm:$0xff]  ;;  %p6161_p13 = pnand %p6160_p12, %p6300_p4  ;;  %p6168_p3 = por %p6167_p2, %p6166_p1 }
 0x159   : > { %v8512_v21 = vadd.f32 %v5825_v19, %v1183_v32  ;;  %v1175_v38 = vadd.f32 %v1174_v48, %v9188_v25  ;;  %v1602_v14 = vpop.f32.mrf.mxu0  ;;  %v4024_v45 = vrot.slane %v4023_v12, 4  ;;  %v4028_v27 = vrot.slane %v4026_v43, 5  ;;  %v9193_v43 = vld [vmem:[#allocation25_spill] sm:$0xff] }
 0x15a   : > { %v5792_v15 = vpop.f32.mrf.mxu1  ;;  %v4496_v19 = vsel %vm6664_vm7, %v5539_v16, %v4495_v58  ;;  %v4499_v61 = vsel %vm6664_vm7, %v4497_v52, %v4498_v22  ;;  %v4019_v13 = vsel %vm6378_vm4, %v4014_v39, %v8478_v57  ;;  %p6162_p0 = pneg %p6161_p13 }
 0x15b   : > { %v8515_v10 = vadd.f32 %v1599_v41, %v1175_v38  ;;  %v1186_v17 = vadd.f32 %v5792_v15, %v9189_v30  ;;  %v5829_v51 = vpop.f32.mrf.mxu0  ;;  %v4029_v0 = vsel %vm6378_vm4, %v4024_v45, %v4028_v27 }
 0x15c   : > { %6032 = vmatmul.mubr.msk.bf16.gmra.mxu0 %vm715_vm3, %v5554_v35  ;;  %v1177_v3 = vpop.f32.mrf.mxu1  ;;  %v5556_v35 = vcombine.low %v4496_v19, %v4499_v61  ;;  %v5491_v12 = vcombine.low %v4019_v13, %v4029_v0  ;;  %p6169_p5 = pnand %p6168_p3, %p6162_p0 }
 0x15d   : > { %6035 = vmatprep.mubr.msk.bf16.mxu0 %vm715_vm3, %v5555_v24  ;;  %v8524_v4 = vadd.f32 %v5826_v60, %v1186_v17  ;;  %v1178_v18 = vadd.f32 %v1177_v3, %v9190_v33  ;;  %v1615_v40 = vpop.f32.mrf.mxu0 }
 0x15e   : > { %v5795_v41 = vpop.f32.mrf.mxu1  ;;  %5998 = vmatmul.mubr.msk.bf16.gmra.mxu1 %vm715_vm3, %v5489_v50 }
 0x15f   : > { %v8531_v1 = vadd.f32 %v1602_v14, %v1178_v18  ;;  %v1199_v49 = vadd.f32 %v5795_v41, %v9191_v62  ;;  %v5830_v58 = vpop.f32.mrf.mxu0  ;;  %6001 = vmatprep.mubr.msk.bf16.mxu1 %vm715_vm3, %v5490_v2 }
 0x160   : > { %v1190_v20 = vpop.f32.mrf.mxu1 }
 0x161   : > { %v8537_v23 = vadd.f32 %v5829_v51, %v1199_v49  ;;  %v1191_v53 = vadd.f32 %v1190_v20, %v9192_v26  ;;  %v1618_v32 = vpop.f32.mrf.mxu0 }
 0x162   : > { %v5796_v60 = vpop.f32.mrf.mxu1 }
 0x163   : > { %v8540_v57 = vadd.f32 %v1615_v40, %v1191_v53  ;;  %v1202_v48 = vadd.f32 %v5796_v60, %v9193_v43  ;;  %v5833_v24 = vpop.f32.mrf.mxu0 }
 0x164   : > { %6036 = vmatmul.mubr.msk.bf16.gmra.mxu0 %vm715_vm3, %v5556_v35  ;;  %v1193_v16 = vpop.f32.mrf.mxu1 }
 0x165   : > { %v8544_v52 = vadd.f32 %v5830_v58, %v1202_v48  ;;  %v1194_v22 = vadd.f32 %v1193_v16, %v9194_v31  ;;  %v1631_v25 = vpop.f32.mrf.mxu0 }
 0x166   : > { %v5799_v38 = vpop.f32.mrf.mxu1  ;;  %6002 = vmatmul.mubr.msk.bf16.gmra.mxu1 %vm715_vm3, %v5491_v12 }
 0x167   : > { %v8548_v14 = vadd.f32 %v1618_v32, %v1194_v22  ;;  %v1215_v15 = vadd.f32 %v5799_v38, %v8120_v42  ;;  %v5834_v50 = vpop.f32.mrf.mxu0 }
 0x168   : > { %v1206_v2 = vpop.f32.mrf.mxu1 }
 0x169   : > { %v8551_v39 = vadd.f32 %v5833_v24, %v1215_v15  ;;  %v1207_v30 = vadd.f32 %v1206_v2, %v8147_v44  ;;  %v1634_v17 = vpop.f32.mrf.mxu0 }
 0x16a   : > { %v5800_v51 = vpop.f32.mrf.mxu1 }
 0x16b   : > { %v8554_v45 = vadd.f32 %v1631_v25, %v1207_v30  ;;  %v1218_v27 = vadd.f32 %v5800_v51, %v8162_v8  ;;  %v5873_v3 = vpop.f32.mrf.mxu0  ;;  %v9195_v30 = vld [vmem:[#allocation14_spill] sm:$0xff] }
 0x16c   : > { %v1209_v19 = vpop.f32.mrf.mxu1 }
 0x16d   : > { %v8557_v61 = vadd.f32 %v5834_v50, %v1218_v27  ;;  %v1210_v33 = vadd.f32 %v1209_v19, %v8184_v55  ;;  %v2607_v18 = vpop.f32.mrf.mxu0 }
 0x16e   : > { %v5839_v42 = vpop.f32.mrf.mxu1 }
 0x16f   : > { %v8560_v40 = vadd.f32 %v1634_v17, %v1210_v33  ;;  %v2010_v41 = vadd.f32 %v5839_v42, %v8229_v5  ;;  %v5874_v13 = vpop.f32.mrf.mxu0 }
 0x170   : > { %v1881_v44 = vpop.f32.mrf.mxu1 }
 0x171   : > { %v8563_v62 = vadd.f32 %v5873_v3, %v2010_v41  ;;  %v2008_v49 = vadd.f32 %v1881_v44, %v8236_v37  ;;  %v2610_v58 = vpop.f32.mrf.mxu0  ;;  %v9196_v3 = vld [vmem:[#allocation11_spill] sm:$0xff] }
 0x172   : > { %v5840_v8 = vpop.f32.mrf.mxu1 }
 0x173   : > { %v8566_v0 = vadd.f32 %v2607_v18, %v2008_v49  ;;  %v2011_v35 = vadd.f32 %v5840_v8, %v8262_v54  ;;  %v5877_v20 = vpop.f32.mrf.mxu0 }
 0x174   : > { %v1884_v55 = vpop.f32.mrf.mxu1 }
 0x175   : > { %v8569_v26 = vadd.f32 %v5874_v13, %v2011_v35  ;;  %v2009_v53 = vadd.f32 %v1884_v55, %v8276_v11  ;;  %v2623_v32 = vpop.f32.mrf.mxu0 }
 0x176   : > { %v5843_v5 = vpop.f32.mrf.mxu1 }
 0x177   : > { %v8572_v60 = vadd.f32 %v2610_v58, %v2009_v53  ;;  %v2014_v12 = vadd.f32 %v5843_v5, %v8288_v29  ;;  %v5878_v43 = vpop.f32.mrf.mxu0 }
 0x178   : > { %v1897_v37 = vpop.f32.mrf.mxu1 }
 0x179   : > { %v8575_v48 = vadd.f32 %v5877_v20, %v2014_v12  ;;  %v2012_v24 = vadd.f32 %v1897_v37, %v8295_v9  ;;  %v2626_v16 = vpop.f32.mrf.mxu0 }
 0x17a   : > { %v5844_v54 = vpop.f32.mrf.mxu1 }
 0x17b   : > { %v8578_v31 = vadd.f32 %v2623_v32, %v2012_v24  ;;  %v2015_v22 = vadd.f32 %v5844_v54, %v8320_v34  ;;  %v5881_v25 = vpop.f32.mrf.mxu0  ;;  %v9198_v54 = vld [vmem:[#allocation15_spill] sm:$0xff] }
 0x17c   : > { %v1900_v11 = vpop.f32.mrf.mxu1 }
 0x17d   : > { %v8581_v38 = vadd.f32 %v5878_v43, %v2015_v22  ;;  %v2013_v15 = vadd.f32 %v1900_v11, %v8343_v59  ;;  %v2639_v50 = vpop.f32.mrf.mxu0  ;;  %v9197_v43 = vld [vmem:[#allocation19_spill] sm:$0xff] }
 0x17e   : > { %v5847_v29 = vpop.f32.mrf.mxu1 }
 0x17f   : > { %v8584_v2 = vadd.f32 %v2626_v16, %v2013_v15  ;;  %v2018_v17 = vadd.f32 %v5847_v29, %v9195_v30  ;;  %v5882_v51 = vpop.f32.mrf.mxu0 }
 0x180   : > { %v1913_v9 = vpop.f32.mrf.mxu1 }
 0x181   : > { %v8587_v27 = vadd.f32 %v5881_v25, %v2018_v17  ;;  %v2016_v19 = vadd.f32 %v1913_v9, %v9196_v3  ;;  %v2642_v33 = vpop.f32.mrf.mxu0 }
 0x182   : > { %v5848_v34 = vpop.f32.mrf.mxu1 }
 0x183   : > { %v8590_v18 = vadd.f32 %v2639_v50, %v2016_v19  ;;  %v2019_v42 = vadd.f32 %v5848_v34, %v8383_v56  ;;  %v5885_v41 = vpop.f32.mrf.mxu0 }
 0x184   : > { %v1916_v59 = vpop.f32.mrf.mxu1 }
 0x185   : > { %v8593_v13 = vadd.f32 %v5882_v51, %v2019_v42  ;;  %v2017_v44 = vadd.f32 %v1916_v59, %v8399_v63  ;;  %v2655_v49 = vpop.f32.mrf.mxu0 }
 0x186   : > { %v5851_v58 = vpop.f32.mrf.mxu1 }
 0x187   : > { %v8596_v8 = vadd.f32 %v2642_v33, %v2017_v44  ;;  %v2022_v35 = vadd.f32 %v5851_v58, %v8409_v46  ;;  %v5886_v20 = vpop.f32.mrf.mxu0 }
 0x188   : > { %v1929_v55 = vpop.f32.mrf.mxu1 }
 0x189   : > { %v8599_v53 = vadd.f32 %v5885_v41, %v2022_v35  ;;  %v2020_v32 = vadd.f32 %v1929_v55, %v8426_v7  ;;  %v2658_v5 = vpop.f32.mrf.mxu0 }
 0x18a   : > { %v5852_v56 = vpop.f32.mrf.mxu1 }
 0x18b   : > { %v8602_v12 = vadd.f32 %v2655_v49, %v2020_v32  ;;  %v2023_v37 = vadd.f32 %v5852_v56, %v9197_v43  ;;  %v5889_v24 = vpop.f32.mrf.mxu0 }
 0x18c   : > { %v1932_v63 = vpop.f32.mrf.mxu1 }
 0x18d   : > { %v8605_v16 = vadd.f32 %v5886_v20, %v2023_v37  ;;  %v2021_v22 = vadd.f32 %v1932_v63, %v9198_v54  ;;  %v2671_v25 = vpop.f32.mrf.mxu0 }
 0x18e   : > { %v5855_v46 = vpop.f32.mrf.mxu1 }
 0x18f   : > { %v8608_v11 = vadd.f32 %v2658_v5, %v2021_v22  ;;  %v2026_v15 = vadd.f32 %v5855_v46, %v8468_v47  ;;  %v5890_v50 = vpop.f32.mrf.mxu0 }
 0x190   : > { %v1945_v7 = vpop.f32.mrf.mxu1 }
 0x191   : > { %v8611_v29 = vadd.f32 %v5889_v24, %v2026_v15  ;;  %v2024_v30 = vadd.f32 %v1945_v7, %v8471_v6  ;;  %v2674_v17 = vpop.f32.mrf.mxu0 }
 0x192   : > { %v5856_v51 = vpop.f32.mrf.mxu1 }
 0x193   : > { %v8614_v9 = vadd.f32 %v2671_v25, %v2024_v30  ;;  %v2027_v3 = vadd.f32 %v5856_v51, %v8491_v36  ;;  %v5893_v19 = vpop.f32.mrf.mxu0 }
 0x194   : > { %v1948_v33 = vpop.f32.mrf.mxu1 }
 0x195   : > { %v8617_v34 = vadd.f32 %v5890_v50, %v2027_v3  ;;  %v2025_v42 = vadd.f32 %v1948_v33, %v8506_v28  ;;  %v2687_v41 = vpop.f32.mrf.mxu0 }
 0x196   : > { %v5859_v47 = vpop.f32.mrf.mxu1 }
 0x197   : > { %9199 = vst [vmem:[#allocation5_spill] sm:$0xff] %v8617_v34  ;;  %v8620_v59 = vadd.f32 %v2674_v17, %v2025_v42  ;;  %v2030_v44 = vadd.f32 %v5859_v47, %v8512_v21  ;;  %v5894_v49 = vpop.f32.mrf.mxu0 }
 0x198   : > { %v1961_v6 = vpop.f32.mrf.mxu1 }
 0x199   : > { %9200 = vst [vmem:[#allocation17_spill] sm:$0xff] %v8620_v59  ;;  %v8623_v58 = vadd.f32 %v5893_v19, %v2030_v44  ;;  %v2028_v35 = vadd.f32 %v1961_v6, %v8515_v10  ;;  %v2690_v20 = vpop.f32.mrf.mxu0 }
 0x19a   : > { %v5860_v36 = vpop.f32.mrf.mxu1 }
 0x19b   : > { %9201 = vst [vmem:[#allocation22_spill] sm:$0xff] %v8623_v58  ;;  %v8626_v55 = vadd.f32 %v2687_v41, %v2028_v35  ;;  %v2031_v32 = vadd.f32 %v5860_v36, %v8524_v4  ;;  %v5897_v5 = vpop.f32.mrf.mxu0 }
 0x19c   : > { %v1964_v28 = vpop.f32.mrf.mxu1 }
 0x19d   : > { %9202 = vst [vmem:[#allocation12_spill] sm:$0xff] %v8626_v55  ;;  %v8629_v56 = vadd.f32 %v5894_v49, %v2031_v32  ;;  %v2029_v43 = vadd.f32 %v1964_v28, %v8531_v1  ;;  %v2703_v37 = vpop.f32.mrf.mxu0 }
 0x19e   : > { %v5863_v21 = vpop.f32.mrf.mxu1 }
 0x19f   : > { %9203 = vst [vmem:[#allocation21_spill] sm:$0xff] %v8629_v56  ;;  %v8632_v24 = vadd.f32 %v2690_v20, %v2029_v43  ;;  %v2034_v63 = vadd.f32 %v5863_v21, %v8537_v23  ;;  %v5898_v54 = vpop.f32.mrf.mxu0 }
 0x1a0   : > { %v1977_v10 = vpop.f32.mrf.mxu1 }
 0x1a1   : > { %9204 = vst [vmem:[#allocation24_spill] sm:$0xff] %v8632_v24  ;;  %v8635_v22 = vadd.f32 %v5897_v5, %v2034_v63  ;;  %v2032_v25 = vadd.f32 %v1977_v10, %v8540_v57  ;;  %v2706_v46 = vpop.f32.mrf.mxu0 }
 0x1a2   : > { %v5864_v4 = vpop.f32.mrf.mxu1 }
 0x1a3   : > { %9205 = vst [vmem:[#allocation26_spill] sm:$0xff] %v8635_v22  ;;  %v8638_v15 = vadd.f32 %v2703_v37, %v2032_v25  ;;  %v2035_v50 = vadd.f32 %v5864_v4, %v8544_v52  ;;  %v5901_v7 = vpop.f32.mrf.mxu0 }
 0x1a4   : > { %v1980_v1 = vpop.f32.mrf.mxu1 }
 0x1a5   : > { %9206 = vst [vmem:[#allocation28_spill] sm:$0xff] %v8638_v15  ;;  %v8641_v30 = vadd.f32 %v5898_v54, %v2035_v50  ;;  %v2033_v17 = vadd.f32 %v1980_v1, %v8548_v14  ;;  %v2719_v51 = vpop.f32.mrf.mxu0 }
 0x1a6   : > { %v5867_v23 = vpop.f32.mrf.mxu1 }
 0x1a7   : > { %9207 = vst [vmem:[#allocation7_spill] sm:$0xff] %v8641_v30  ;;  %v8644_v3 = vadd.f32 %v2706_v46, %v2033_v17  ;;  %v2038_v19 = vadd.f32 %v5867_v23, %v8551_v39  ;;  %v5902_v33 = vpop.f32.mrf.mxu0 }
 0x1a8   : > { %v1993_v57 = vpop.f32.mrf.mxu1 }
 0x1a9   : > { %9208 = vst [vmem:[#allocation6_spill] sm:$0xff] %v8644_v3  ;;  %v8647_v42 = vadd.f32 %v5901_v7, %v2038_v19  ;;  %v2036_v41 = vadd.f32 %v1993_v57, %v8554_v45  ;;  %v2722_v47 = vpop.f32.mrf.mxu0 }
 0x1aa   : > { %v5868_v52 = vpop.f32.mrf.mxu1 }
 0x1ab   : > { %9209 = vst [vmem:[#allocation9_spill] sm:$0xff] %v8647_v42  ;;  %v8650_v44 = vadd.f32 %v2719_v51, %v2036_v41  ;;  %v2039_v49 = vadd.f32 %v5868_v52, %v8557_v61  ;;  %v8653_v6 = vpop.f32.mrf.mxu0 }
 0x1ac   : > { %v1996_v14 = vpop.f32.mrf.mxu1 }
 0x1ad   : > { %9210 = vst [vmem:[#allocation8_spill] sm:$0xff] %v8650_v44  ;;  %v8655_v35 = vadd.f32 %v5902_v33, %v2039_v49  ;;  %v2037_v20 = vadd.f32 %v1996_v14, %v8560_v40  ;;  %v8658_v39 = vpop.f32.mrf.mxu0 }
 0x1ae   : > { %v5907_v36 = vpop.f32.mrf.mxu1 }
 0x1af   : > { %9211 = vst [vmem:[#allocation10_spill] sm:$0xff] %v8655_v35  ;;  %v8660_v32 = vadd.f32 %v2722_v47, %v2037_v20  ;;  %v8662_v5 = vpop.f32.mrf.mxu0 }
 0x1b0   : > { %v3077_v45 = vpop.f32.mrf.mxu1 }
 0x1b1   : > { %9212 = vst [vmem:[#allocation13_spill] sm:$0xff] %v8660_v32  ;;  %v8664_v28 = vpop.f32.mrf.mxu0 }
 0x1b2   : > { %v5908_v43 = vpop.f32.mrf.mxu1 }
 0x1b3   : > { %v8666_v37 = vpop.f32.mrf.mxu0 }
 0x1b4   : > { %v8668_v61 = vpop.f32.mrf.mxu1 }
 0x1b5   : > { %v8670_v21 = vpop.f32.mrf.mxu0 }
 0x1b6   : > { %v8672_v63 = vpop.f32.mrf.mxu1 }
 0x1b7   : > { %v8674_v40 = vpop.f32.mrf.mxu0 }
 0x1b8   : > { %v8676_v54 = vpop.f32.mrf.mxu1 }
 0x1b9   : > { %v8678_v10 = vpop.f32.mrf.mxu0 }
 0x1ba   : > { %v8680_v25 = vpop.f32.mrf.mxu1 }
 0x1bb   : > { %v8682_v46 = vpop.f32.mrf.mxu0 }
 0x1bc   : > { %v8684_v4 = vpop.f32.mrf.mxu1 }
 0x1bd   : > { %v8686_v50 = vpop.f32.mrf.mxu0 }
 0x1be   : > { %v8688_v7 = vpop.f32.mrf.mxu1 }
 0x1bf   : > { %v8690_v1 = vpop.f32.mrf.mxu0 }
 0x1c0   : > { %v8692_v17 = vpop.f32.mrf.mxu1 }
 0x1c1   : > { %v8694_v51 = vpop.f32.mrf.mxu0 }
 0x1c2   : > { %v8696_v23 = vpop.f32.mrf.mxu1 }
 0x1c3   : > { %v8698_v19 = vpop.f32.mrf.mxu0 }
 0x1c4   : > { %v8700_v33 = vpop.f32.mrf.mxu1 }
 0x1c5   : > { %v8702_v57 = vpop.f32.mrf.mxu0 }
 0x1c6   : > { %v8704_v41 = vpop.f32.mrf.mxu1 }
 0x1c7   : > { %v8706_v47 = vpop.f32.mrf.mxu0 }
 0x1c8   : > { %v8708_v52 = vpop.f32.mrf.mxu1 }
 0x1c9   : > { %v8710_v49 = vpop.f32.mrf.mxu0 }
 0x1ca   : > { %v8712_v14 = vpop.f32.mrf.mxu1 }
 0x1cb   : > { %v8714_v20 = vpop.f32.mrf.mxu0 }
 0x1cc   : > { %v8716_v32 = vpop.f32.mrf.mxu1 }
 0x1cd   : > { %v8718_v35 = vpop.f32.mrf.mxu0 }
 0x1ce   : > { %9213 = vst [vmem:[#allocation16_spill] sm:$0xff] %v8718_v35  ;;  %v8720_v44 = vpop.f32.mrf.mxu1 }
 0x1cf   : > { %v8722_v42 = vpop.f32.mrf.mxu0 }
 0x1d0   : > { %9214 = vst [vmem:[#allocation18_spill] sm:$0xff] %v8722_v42  ;;  %v8724_v3 = vpop.f32.mrf.mxu1 }
 0x1d1   : > { %v8726_v30 = vpop.f32.mrf.mxu0 }
 0x1d2   : > { %9215 = vst [vmem:[#allocation20_spill] sm:$0xff] %v8726_v30  ;;  %v8728_v15 = vpop.f32.mrf.mxu1 }
 0x1d3   : > { %9216 = vst [vmem:[#allocation23_spill] sm:$0xff] %v8728_v15  ;;  %v8730_v22 = vpop.f32.mrf.mxu0 }
 0x1d4   : > { %9217 = vst [vmem:[#allocation25_spill] sm:$0xff] %v8730_v22  ;;  %v8732_v24 = vpop.f32.mrf.mxu1 }
 0x1d5   : > { %9218 = vst [vmem:[#allocation27_spill] sm:$0xff] %v8732_v24  ;;  %v8734_v56 = vpop.f32.mrf.mxu0 }
 0x1d6   : > { %9219 = vst [vmem:[#allocation14_spill] sm:$0xff] %v8734_v56  ;;  %v8736_v55 = vpop.f32.mrf.mxu1 }
 0x1d7   : > { %9220 = vst [vmem:[#allocation11_spill] sm:$0xff] %v8736_v55  ;;  %v8738_v58 = vpop.f32.mrf.mxu0 }
 0x1d8   : > { %9221 = vst [vmem:[#allocation19_spill] sm:$0xff] %v8738_v58  ;;  %v8740_v59 = vpop.f32.mrf.mxu1 }
 0x1d9   : > { %9222 = vst [vmem:[#allocation15_spill] sm:$0xff] %v8740_v59  ;;  %v8742_v35 = vpop.f32.mrf.mxu0 }
 0x1da   : > { %9223 = vst [vmem:[#allocation29_spill] sm:$0xff] %v8742_v35  ;;  %v8744_v42 = vpop.f32.mrf.mxu1 }
 0x1db   : > { %9224 = vst [vmem:[#allocation30_spill] sm:$0xff] %v8744_v42  ;;  %v8746_v34 = vpop.f32.mrf.mxu0 }
 0x1dc   : > { %9225 = vst [vmem:[#allocation31_spill] sm:$0xff] %v8746_v34  ;;  %v8748_v30 = vpop.f32.mrf.mxu1 }
 0x1dd   : > { %9226 = vst [vmem:[#allocation32_spill] sm:$0xff] %v8748_v30  ;;  %v8750_v15 = vpop.f32.mrf.mxu0 }
 0x1de   : > { %9227 = vst [vmem:[#allocation33_spill] sm:$0xff] %v8750_v15  ;;  %v8752_v22 = vpop.f32.mrf.mxu1 }
 0x1df   : > { %9228 = vst [vmem:[#allocation34_spill] sm:$0xff] %v8752_v22  ;;  %v8754_v24 = vpop.f32.mrf.mxu0 }
 0x1e0   : > { %9229 = vst [vmem:[#allocation35_spill] sm:$0xff] %v8754_v24  ;;  %v8756_v56 = vpop.f32.mrf.mxu1  ;;  %v3206_v24 = vadd.f32 %v5907_v36, %v8563_v62  ;;  %v3205_v62 = vadd.f32 %v8668_v61, %v8572_v60  ;;  %v3208_v60 = vadd.f32 %v8676_v54, %v8578_v31 }
 0x1e1   : > { %9230 = vst [vmem:[#allocation36_spill] sm:$0xff] %v8756_v56  ;;  %v8758_v55 = vpop.f32.mrf.mxu0 }
 0x1e2   : > { %9231 = vst [vmem:[#allocation37_spill] sm:$0xff] %v8758_v55  ;;  %v8760_v58 = vpop.f32.mrf.mxu1  ;;  %v3570_v54 = vadd.f32 %v8670_v21, %v3208_v60  ;;  %v3214_v21 = vadd.f32 %v8688_v7, %v8587_v27 }
 0x1e3   : > { %9232 = vst [vmem:[#allocation38_spill] sm:$0xff] %v8760_v58  ;;  %v8762_v59 = vpop.f32.mrf.mxu0  ;;  %v3204_v58 = vadd.f32 %v3077_v45, %v8566_v0  ;;  %v3210_v0 = vadd.f32 %v8672_v63, %v8575_v48  ;;  %v8793_v45 = vld [vmem:[%s9005_s2] ss:$0 sm:$0xff] }
 0x1e4   : > { %9233 = vst [vmem:[#allocation39_spill] sm:$0xff] %v8762_v59  ;;  %v8764_v35 = vpop.f32.mrf.mxu1 }
 0x1e5   : > { %9234 = vst [vmem:[#allocation40_spill] sm:$0xff] %v8764_v35  ;;  %v8766_v34 = vpop.f32.mrf.mxu0 }
 0x1e6   : > { %9235 = vst [vmem:[#allocation41_spill] sm:$0xff] %v8766_v34  ;;  %v8768_v30 = vpop.f32.mrf.mxu1  ;;  %v3568_v34 = vadd.f32 %v8653_v6, %v3206_v24 }
 0x1e7   : > { %9236 = vst [vmem:[#allocation42_spill] sm:$0xff] %v8768_v30  ;;  %v8770_v15 = vpop.f32.mrf.mxu0  ;;  %v3207_v30 = vadd.f32 %v5908_v43, %v8569_v26 }
 0x1e8   : > { %9237 = vst [vmem:[#allocation43_spill] sm:$0xff] %v8770_v15  ;;  %v8772_v22 = vpop.f32.mrf.mxu1 }
 0x1e9   : > { %9238 = vst [vmem:[#allocation44_spill] sm:$0xff] %v8772_v22  ;;  %v8775_v56 = vpop.f32.mrf.mxu0  ;;  %v3566_v22 = vadd.f32 %v8658_v39, %v3204_v58  ;;  %v3569_v26 = vadd.f32 %v8662_v5, %v3207_v30  ;;  %v3211_v30 = vadd.f32 %v8680_v25, %v8581_v38 }
 0x1ea   : > { %9239 = vst [vmem:[#allocation45_spill] sm:$0xff] %v8775_v56  ;;  %v8777_v55 = vpop.f32.mrf.mxu1 }
 0x1eb   : > { %v6009_v59 = vpop.f32.mrf.mxu0 }
 0x1ec   : > { %v8780_v42 = vpop.f32.mrf.mxu1 }
 0x1ed   : > { %9240 = vst [vmem:[#allocation46_spill] sm:$0xff] %v8780_v42  ;;  %v4635_v35 = vpop.f32.mrf.mxu0  ;;  %v3572_v42 = vadd.f32 %v8666_v37, %v3210_v0  ;;  %v3573_v0 = vadd.f32 %v8674_v40, %v3211_v30 }
 0x1ee   : > { %v5975_v15 = vpop.f32.mrf.mxu1 }
 0x1ef   : > { %v4294_v36 = vadd.f32 %v5975_v15, %v3568_v34  ;;  %v6010_v56 = vpop.f32.mrf.mxu0  ;;  %v3567_v15 = vadd.f32 %v8664_v28, %v3205_v62  ;;  %v3209_v28 = vadd.f32 %v8684_v4, %v8584_v2 }
 0x1f0   : > { %v4165_v24 = vpop.f32.mrf.mxu1 }
 0x1f1   : > { %v4764_v6 = vadd.f32 %v6009_v59, %v4294_v36  ;;  %v4292_v58 = vadd.f32 %v4165_v24, %v3566_v22  ;;  %v4638_v39 = vpop.f32.mrf.mxu0 }
 0x1f2   : > { %v5976_v34 = vpop.f32.mrf.mxu1 }
 0x1f3   : > { %v4803_v48 = vadd.f32 %v8793_v45, %v4764_v6  ;;  %v4762_v43 = vadd.f32 %v4635_v35, %v4292_v58  ;;  %v4295_v61 = vadd.f32 %v5976_v34, %v3569_v26  ;;  %v6013_v63 = vpop.f32.mrf.mxu0  ;;  %v3571_v34 = vadd.f32 %v8678_v10, %v3209_v28 }
 0x1f4   : > { %v4168_v5 = vpop.f32.mrf.mxu1  ;;  %v3218_v28 = vadd.f32 %v8704_v41, %v8599_v53 }
 0x1f5   : > { %v4835_v59 = vmax.f32 %v4803_v48, 0.0  ;;  %v4801_v22 = vadd.f32 %v8793_v45, %v4762_v43  ;;  %v4765_v36 = vadd.f32 %v6010_v56, %v4295_v61  ;;  %v4293_v24 = vadd.f32 %v4168_v5, %v3567_v15  ;;  %v4651_v31 = vpop.f32.mrf.mxu0 }
 0x1f6   : > { %v5979_v35 = vpop.f32.mrf.mxu1  ;;  %v3576_v43 = vadd.f32 %v8682_v46, %v3214_v21  ;;  %v3215_v61 = vadd.f32 %v8696_v23, %v8593_v13 }
 0x1f7   : > { %4867 = vst [vmem:[%s8809_s9 + $0x10] sm:$0xff] %v4835_v59  ;;  %v4833_v37 = vmax.f32 %v4801_v22, 0.0  ;;  %v4804_v38 = vadd.f32 %v8793_v45, %v4765_v36  ;;  %v4763_v25 = vadd.f32 %v4638_v39, %v4293_v24  ;;  %v4298_v62 = vadd.f32 %v5979_v35, %v3572_v42  ;;  %v6014_v56 = vpop.f32.mrf.mxu0 }
 0x1f8   : > { %v4181_v26 = vpop.f32.mrf.mxu1  ;;  %v3212_v42 = vadd.f32 %v8692_v17, %v8590_v18  ;;  %v3213_v22 = vadd.f32 %v8700_v33, %v8596_v8 }
 0x1f9   : > { %4865 = vst [vmem:[%s8809_s9] sm:$0xff] %v4833_v37  ;;  %v4836_v2 = vmax.f32 %v4804_v38, 0.0  ;;  %v4802_v4 = vadd.f32 %v8793_v45, %v4763_v25  ;;  %v4768_v6 = vadd.f32 %v6013_v63, %v4298_v62  ;;  %v4296_v58 = vadd.f32 %v4181_v26, %v3570_v54  ;;  %v4654_v60 = vpop.f32.mrf.mxu0 }
 0x1fa   : > { %v5980_v39 = vpop.f32.mrf.mxu1  ;;  %v3574_v59 = vadd.f32 %v8686_v50, %v3212_v42  ;;  %v3577_v54 = vadd.f32 %v8690_v1, %v3215_v61  ;;  %v3575_v25 = vadd.f32 %v8694_v51, %v3213_v22  ;;  %v3216_v62 = vadd.f32 %v8708_v52, %v8602_v12 }
 0x1fb   : > { %4868 = vst [vmem:[%s8809_s9 + $0x18] sm:$0xff] %v4836_v2  ;;  %v4834_v40 = vmax.f32 %v4802_v4, 0.0  ;;  %v4807_v15 = vadd.f32 %v8793_v45, %v4768_v6  ;;  %v4766_v27 = vadd.f32 %v4651_v31, %v4296_v58  ;;  %v4299_v7 = vadd.f32 %v5980_v39, %v3573_v0  ;;  %v6017_v48 = vpop.f32.mrf.mxu0 }
 0x1fc   : > { %v4184_v63 = vpop.f32.mrf.mxu1  ;;  %v3580_v26 = vadd.f32 %v8698_v19, %v3218_v28  ;;  %v3219_v2 = vadd.f32 %v8712_v14, %v8605_v16 }
 0x1fd   : > { %4866 = vst [vmem:[%s8809_s9 + $0x8] sm:$0xff] %v4834_v40  ;;  %v4839_v10 = vmax.f32 %v4807_v15, 0.0  ;;  %v4805_v30 = vadd.f32 %v8793_v45, %v4766_v27  ;;  %v4769_v18 = vadd.f32 %v6014_v56, %v4299_v7  ;;  %v4297_v17 = vadd.f32 %v4184_v63, %v3571_v34  ;;  %v4667_v5 = vpop.f32.mrf.mxu0 }
 0x1fe   : > { %v5983_v36 = vpop.f32.mrf.mxu1  ;;  %v3217_v34 = vadd.f32 %v8716_v32, %v8608_v11  ;;  %v3581_v15 = vadd.f32 %v8706_v47, %v3219_v2  ;;  %v3222_v27 = vadd.f32 %v8720_v44, %v8611_v29  ;;  %v3220_v63 = vadd.f32 %v8724_v3, %v8614_v9 }
 0x1ff   : > { %4871 = vst [vmem:[%s8809_s9 + $0x30] sm:$0xff] %v4839_v10  ;;  %v4837_v46 = vmax.f32 %v4805_v30, 0.0  ;;  %v4808_v24 = vadd.f32 %v8793_v45, %v4769_v18  ;;  %v4767_v13 = vadd.f32 %v4654_v60, %v4297_v17  ;;  %v4302_v23 = vadd.f32 %v5983_v36, %v3576_v43  ;;  %v6018_v31 = vpop.f32.mrf.mxu0 }
 0x200   : > { %v4197_v35 = vpop.f32.mrf.mxu1  ;;  %v3578_v60 = vadd.f32 %v8702_v57, %v3216_v62  ;;  %v3579_v61 = vadd.f32 %v8710_v49, %v3217_v34  ;;  %v3584_v17 = vadd.f32 %v8714_v20, %v3222_v27  ;;  %v9247_v62 = vld [vmem:[#allocation22_spill] sm:$0xff] }
 0x201   : > { %4869 = vst [vmem:[%s8809_s9 + $0x20] sm:$0xff] %v4837_v46  ;;  %v4840_v50 = vmax.f32 %v4808_v24, 0.0  ;;  %v4806_v37 = vadd.f32 %v8793_v45, %v4767_v13  ;;  %v4772_v8 = vadd.f32 %v6017_v48, %v4302_v23  ;;  %v4300_v33 = vadd.f32 %v4197_v35, %v3574_v59  ;;  %v4670_v38 = vpop.f32.mrf.mxu0  ;;  %v9242_v59 = vld [vmem:[#allocation23_spill] sm:$0xff]  ;;  %v9243_v13 = vld [vmem:[#allocation16_spill] sm:$0xff] }
 0x202   : > { %v5984_v56 = vpop.f32.mrf.mxu1  ;;  %v3582_v23 = vadd.f32 %v9243_v13, %v3220_v63 }
 0x203   : > { %4872 = vst [vmem:[%s8809_s9 + $0x38] sm:$0xff] %v4840_v50  ;;  %v4838_v1 = vmax.f32 %v4806_v37, 0.0  ;;  %v4811_v0 = vadd.f32 %v8793_v45, %v4772_v8  ;;  %v4770_v53 = vadd.f32 %v4667_v5, %v4300_v33  ;;  %v4303_v41 = vadd.f32 %v5984_v56, %v3577_v54  ;;  %v6021_v21 = vpop.f32.mrf.mxu0  ;;  %v9241_v5 = vld [vmem:[#allocation5_spill] sm:$0xff]  ;;  %v9245_v54 = vld [vmem:[#allocation27_spill] sm:$0xff] }
 0x204   : > { %v4200_v4 = vpop.f32.mrf.mxu1  ;;  %v3223_v22 = vadd.f32 %v9242_v59, %v9241_v5  ;;  %v9248_v56 = vld [vmem:[#allocation11_spill] sm:$0xff] }
 0x205   : > { %4870 = vst [vmem:[%s8809_s9 + $0x28] sm:$0xff] %v4838_v1  ;;  %v4843_v51 = vmax.f32 %v4811_v0, 0.0  ;;  %v4809_v6 = vadd.f32 %v8793_v45, %v4770_v53  ;;  %v4773_v12 = vadd.f32 %v6018_v31, %v4303_v41  ;;  %v4301_v52 = vadd.f32 %v4200_v4, %v3575_v25  ;;  %v4683_v58 = vpop.f32.mrf.mxu0  ;;  %v9244_v31 = vld [vmem:[#allocation17_spill] sm:$0xff]  ;;  %v9249_v4 = vld [vmem:[#allocation20_spill] sm:$0xff] }
 0x206   : > { %v5987_v42 = vpop.f32.mrf.mxu1  ;;  %v3221_v28 = vadd.f32 %v9245_v54, %v9244_v31  ;;  %v3226_v1 = vadd.f32 %v9248_v56, %v9247_v62 }
 0x207   : > { %4875 = vst [vmem:[%s8809_s9 + $0x50] sm:$0xff] %v4843_v51  ;;  %v4841_v19 = vmax.f32 %v4809_v6, 0.0  ;;  %v4812_v39 = vadd.f32 %v8793_v45, %v4773_v12  ;;  %v4771_v16 = vadd.f32 %v4670_v38, %v4301_v52  ;;  %v4306_v14 = vadd.f32 %v5987_v42, %v3580_v26  ;;  %v6022_v40 = vpop.f32.mrf.mxu0  ;;  %v9246_v38 = vld [vmem:[#allocation18_spill] sm:$0xff]  ;;  %v9250_v6 = vld [vmem:[#allocation12_spill] sm:$0xff]  ;;  %v9251_v12 = vld [vmem:[#allocation15_spill] sm:$0xff] }
 0x208   : > { %v4213_v7 = vpop.f32.mrf.mxu1  ;;  %v3585_v25 = vadd.f32 %v9246_v38, %v3223_v22  ;;  %v3583_v51 = vadd.f32 %v9249_v4, %v3221_v28  ;;  %v3224_v52 = vadd.f32 %v9251_v12, %v9250_v6  ;;  %v9258_v22 = vld [vmem:[#allocation19_spill] sm:$0xff]  ;;  %v9261_v28 = vld [vmem:[#allocation29_spill] sm:$0xff] }
 0x209   : > { %4873 = vst [vmem:[%s8809_s9 + $0x40] sm:$0xff] %v4841_v19  ;;  %v4844_v57 = vmax.f32 %v4812_v39, 0.0  ;;  %v4810_v48 = vadd.f32 %v8793_v45, %v4771_v16  ;;  %v4776_v11 = vadd.f32 %v6021_v21, %v4306_v14  ;;  %v4304_v32 = vadd.f32 %v4213_v7, %v3578_v60  ;;  %v4686_v43 = vpop.f32.mrf.mxu0  ;;  %v9252_v16 = vld [vmem:[#allocation25_spill] sm:$0xff] }
 0x20a   : > { %v5988_v10 = vpop.f32.mrf.mxu1  ;;  %v3588_v14 = vadd.f32 %v9252_v16, %v3226_v1  ;;  %v9264_v1 = vld [vmem:[#allocation31_spill] sm:$0xff] }
 0x20b   : > { %4876 = vst [vmem:[%s8809_s9 + $0x58] sm:$0xff] %v4844_v57  ;;  %v4842_v47 = vmax.f32 %v4810_v48, 0.0  ;;  %v4815_v30 = vadd.f32 %v8793_v45, %v4776_v11  ;;  %v4774_v29 = vadd.f32 %v4683_v58, %v4304_v32  ;;  %v4307_v44 = vadd.f32 %v5988_v10, %v3581_v15  ;;  %v6025_v18 = vpop.f32.mrf.mxu0  ;;  %v9254_v15 = vld [vmem:[#allocation30_spill] sm:$0xff]  ;;  %v9256_v10 = vld [vmem:[#allocation24_spill] sm:$0xff] }
 0x20c   : > { %v4216_v36 = vpop.f32.mrf.mxu1 }
 0x20d   : > { %4874 = vst [vmem:[%s8809_s9 + $0x48] sm:$0xff] %v4842_v47  ;;  %v4847_v49 = vmax.f32 %v4815_v30, 0.0  ;;  %v4813_v46 = vadd.f32 %v8793_v45, %v4774_v29  ;;  %v4777_v9 = vadd.f32 %v6022_v40, %v4307_v44  ;;  %v4305_v3 = vadd.f32 %v4216_v36, %v3579_v61  ;;  %v4699_v24 = vpop.f32.mrf.mxu0  ;;  %v9253_v40 = vld [vmem:[#allocation21_spill] sm:$0xff]  ;;  %v9255_v61 = vld [vmem:[#allocation14_spill] sm:$0xff]  ;;  %v9257_v47 = vld [vmem:[#allocation32_spill] sm:$0xff] }
 0x20e   : > { %v5991_v35 = vpop.f32.mrf.mxu1  ;;  %v3227_v27 = vadd.f32 %v9254_v15, %v9253_v40  ;;  %v3586_v63 = vadd.f32 %v9255_v61, %v3224_v52  ;;  %v3225_v30 = vadd.f32 %v9257_v47, %v9256_v10  ;;  %v9267_v52 = vld [vmem:[#allocation33_spill] sm:$0xff] }
 0x20f   : > { %4879 = vst [vmem:[%s8809_s9 + $0x70] sm:$0xff] %v4847_v49  ;;  %v4845_v20 = vmax.f32 %v4813_v46, 0.0  ;;  %v4816_v50 = vadd.f32 %v8793_v45, %v4777_v9  ;;  %v4775_v37 = vadd.f32 %v4686_v43, %v4305_v3  ;;  %v4310_v8 = vadd.f32 %v5991_v35, %v3584_v17  ;;  %v6026_v33 = vpop.f32.mrf.mxu0  ;;  %v9259_v49 = vld [vmem:[#allocation26_spill] sm:$0xff] }
 0x210   : > { %v4229_v0 = vpop.f32.mrf.mxu1  ;;  %v3589_v36 = vadd.f32 %v9258_v22, %v3227_v27  ;;  %v9260_v46 = vld [vmem:[#allocation34_spill] sm:$0xff]  ;;  %v3587_v35 = vadd.f32 %v9261_v28, %v3225_v30  ;;  %v9270_v27 = vld [vmem:[#allocation35_spill] sm:$0xff]  ;;  %v9273_v30 = vld [vmem:[#allocation37_spill] sm:$0xff] }
 0x211   : > { %4877 = vst [vmem:[%s8809_s9 + $0x60] sm:$0xff] %v4845_v20  ;;  %v4848_v53 = vmax.f32 %v4816_v50, 0.0  ;;  %v4814_v41 = vadd.f32 %v8793_v45, %v4775_v37  ;;  %v4780_v21 = vadd.f32 %v6025_v18, %v4310_v8  ;;  %v4308_v26 = vadd.f32 %v4229_v0, %v3582_v23  ;;  %v4702_v2 = vpop.f32.mrf.mxu0  ;;  %v9262_v20 = vld [vmem:[#allocation28_spill] sm:$0xff] }
 0x212   : > { %v5992_v58 = vpop.f32.mrf.mxu1  ;;  %v3230_v9 = vadd.f32 %v9260_v46, %v9259_v49  ;;  %v9263_v50 = vld [vmem:[#allocation36_spill] sm:$0xff] }
 0x213   : > { %4880 = vst [vmem:[%s8809_s9 + $0x78] sm:$0xff] %v4848_v53  ;;  %v4846_v60 = vmax.f32 %v4814_v41, 0.0  ;;  %v4819_v34 = vadd.f32 %v8793_v45, %v4780_v21  ;;  %v4778_v42 = vadd.f32 %v4699_v24, %v4308_v26  ;;  %v4311_v19 = vadd.f32 %v5992_v58, %v3585_v25  ;;  %v9265_v53 = vld [vmem:[#allocation7_spill] sm:$0xff]  ;;  %v9266_v41 = vld [vmem:[#allocation38_spill] sm:$0xff] }
 0x214   : > { %v6029_v39 = vpop.f32.mrf.mxu0  ;;  %v4232_v7 = vpop.f32.mrf.mxu1  ;;  %v3228_v37 = vadd.f32 %v9263_v50, %v9262_v20  ;;  %v3592_v0 = vadd.f32 %v9264_v1, %v3230_v9  ;;  %v3231_v21 = vadd.f32 %v9266_v41, %v9265_v53  ;;  %v9276_v9 = vld [vmem:[#allocation39_spill] sm:$0xff]  ;;  %v9278_v20 = vld [vmem:[#allocation41_spill] sm:$0xff] }
 0x215   : > { %4878 = vst [vmem:[%s8809_s9 + $0x68] sm:$0xff] %v4846_v60  ;;  %v4851_v57 = vmax.f32 %v4819_v34, 0.0  ;;  %v4817_v48 = vadd.f32 %v8793_v45, %v4778_v42  ;;  %v4781_v11 = vadd.f32 %v6026_v33, %v4311_v19  ;;  %v4309_v32 = vadd.f32 %v4232_v7, %v3583_v51  ;;  %v9268_v60 = vld [vmem:[#allocation6_spill] sm:$0xff]  ;;  %v9269_v34 = vld [vmem:[#allocation40_spill] sm:$0xff] }
 0x216   : > { %v4715_v43 = vpop.f32.mrf.mxu0  ;;  %v5995_v29 = vpop.f32.mrf.mxu1  ;;  %v3590_v58 = vadd.f32 %v9267_v52, %v3228_v37  ;;  %v3229_v42 = vadd.f32 %v9269_v34, %v9268_v60  ;;  %v3593_v7 = vadd.f32 %v9270_v27, %v3231_v21  ;;  %v9279_v37 = vld [vmem:[#allocation13_spill] sm:$0xff] }
 0x217   : > { %4883 = vst [vmem:[%s8809_s9 + $0x90] sm:$0xff] %v4851_v57  ;;  %v4849_v44 = vmax.f32 %v4817_v48, 0.0  ;;  %v4820_v18 = vadd.f32 %v8793_v45, %v4781_v11  ;;  %v4779_v17 = vadd.f32 %v4702_v2, %v4309_v32  ;;  %v4314_v5 = vadd.f32 %v5995_v29, %v3588_v14  ;;  %v9271_v57 = vld [vmem:[#allocation9_spill] sm:$0xff]  ;;  %v9272_v48 = vld [vmem:[#allocation42_spill] sm:$0xff] }
 0x218   : > { %v6030_v59 = vpop.f32.mrf.mxu0  ;;  %v4245_v3 = vpop.f32.mrf.mxu1  ;;  %v3234_v11 = vadd.f32 %v9272_v48, %v9271_v57  ;;  %v3591_v29 = vadd.f32 %v9273_v30, %v3229_v42 }
 0x219   : > { %4881 = vst [vmem:[%s8809_s9 + $0x80] sm:$0xff] %v4849_v44  ;;  %v4852_v24 = vmax.f32 %v4820_v18, 0.0  ;;  %v4818_v13 = vadd.f32 %v8793_v45, %v4779_v17  ;;  %v4784_v23 = vadd.f32 %v6029_v39, %v4314_v5  ;;  %v4312_v31 = vadd.f32 %v4245_v3, %v3586_v63  ;;  %v9274_v44 = vld [vmem:[#allocation8_spill] sm:$0xff] }
 0x21a   : > { %v4718_v54 = vpop.f32.mrf.mxu0  ;;  %v5996_v8 = vpop.f32.mrf.mxu1  ;;  %v9275_v18 = vld [vmem:[#allocation44_spill] sm:$0xff]  ;;  %v3596_v3 = vadd.f32 %v9276_v9, %v3234_v11 }
 0x21b   : > { %4884 = vst [vmem:[%s8809_s9 + $0x98] sm:$0xff] %v4852_v24  ;;  %v4850_v33 = vmax.f32 %v4818_v13, 0.0  ;;  %v4823_v38 = vadd.f32 %v8793_v45, %v4784_v23  ;;  %v4782_v25 = vadd.f32 %v4715_v43, %v4312_v31  ;;  %v4315_v62 = vadd.f32 %v5996_v8, %v3589_v36  ;;  %v9277_v24 = vld [vmem:[#allocation10_spill] sm:$0xff] }
 0x21c   : > { %v6033_v56 = vpop.f32.mrf.mxu0  ;;  %v4248_v26 = vpop.f32.mrf.mxu1  ;;  %v3232_v17 = vadd.f32 %v9275_v18, %v9274_v44  ;;  %v3235_v13 = vadd.f32 %v8777_v55, %v9277_v24  ;;  %v9280_v8 = vld [vmem:[#allocation46_spill] sm:$0xff] }
 0x21d   : > { %4882 = vst [vmem:[%s8809_s9 + $0x88] sm:$0xff] %v4850_v33  ;;  %v4855_v2 = vmax.f32 %v4823_v38, 0.0  ;;  %v4821_v4 = vadd.f32 %v8793_v45, %v4782_v25  ;;  %v4785_v51 = vadd.f32 %v6030_v59, %v4315_v62  ;;  %v4313_v6 = vadd.f32 %v4248_v26, %v3587_v35 }
 0x21e   : > { %v4731_v12 = vpop.f32.mrf.mxu0  ;;  %v5999_v19 = vpop.f32.mrf.mxu1  ;;  %v3594_v50 = vadd.f32 %v9278_v20, %v3232_v17  ;;  %v3233_v33 = vadd.f32 %v9280_v8, %v9279_v37 }
 0x21f   : > { %4887 = vst [vmem:[%s8809_s9 + $0xb0] sm:$0xff] %v4855_v2  ;;  %v4853_v39 = vmax.f32 %v4821_v4, 0.0  ;;  %v4824_v16 = vadd.f32 %v8793_v45, %v4785_v51  ;;  %v4783_v14 = vadd.f32 %v4718_v54, %v4313_v6  ;;  %v4318_v40 = vadd.f32 %v5999_v19, %v3592_v0  ;;  %v9281_v0 = vld [vmem:[#allocation43_spill] sm:$0xff]  ;;  %v9282_v51 = vld [vmem:[#allocation45_spill] sm:$0xff] }
 0x220   : > { %v6034_v15 = vpop.f32.mrf.mxu0  ;;  %v4261_v32 = vpop.f32.mrf.mxu1  ;;  %v3597_v53 = vadd.f32 %v9281_v0, %v3235_v13  ;;  %v3595_v6 = vadd.f32 %v9282_v51, %v3233_v33 }
 0x221   : > { %4885 = vst [vmem:[%s8809_s9 + $0xa0] sm:$0xff] %v4853_v39  ;;  %v4856_v43 = vmax.f32 %v4824_v16, 0.0  ;;  %v4822_v61 = vadd.f32 %v8793_v45, %v4783_v14  ;;  %v4788_v63 = vadd.f32 %v6033_v56, %v4318_v40  ;;  %v4316_v10 = vadd.f32 %v4261_v32, %v3590_v58 }
 0x222   : > { %v4734_v47 = vpop.f32.mrf.mxu0  ;;  %v6000_v5 = vpop.f32.mrf.mxu1 }
 0x223   : > { %4888 = vst [vmem:[%s8809_s9 + $0xb8] sm:$0xff] %v4856_v43  ;;  %v4854_v59 = vmax.f32 %v4822_v61, 0.0  ;;  %v4827_v22 = vadd.f32 %v8793_v45, %v4788_v63  ;;  %v4786_v36 = vadd.f32 %v4731_v12, %v4316_v10  ;;  %v4319_v49 = vadd.f32 %v6000_v5, %v3593_v7 }
 0x224   : > { %v6037_v46 = vpop.f32.mrf.mxu0  ;;  %v4264_v23 = vpop.f32.mrf.mxu1 }
 0x225   : > { %4886 = vst [vmem:[%s8809_s9 + $0xa8] sm:$0xff] %v4854_v59  ;;  %v4859_v31 = vmax.f32 %v4827_v22, 0.0  ;;  %v4825_v54 = vadd.f32 %v8793_v45, %v4786_v36  ;;  %v4789_v28 = vadd.f32 %v6034_v15, %v4319_v49  ;;  %v4317_v35 = vadd.f32 %v4264_v23, %v3591_v29 }
 0x226   : > { %v6003_v38 = vpop.f32.mrf.mxu1  ;;  %v4747_v25 = vpop.f32.mrf.mxu0 }
 0x227   : > { %4891 = vst [vmem:[%s8809_s9 + $0xd0] sm:$0xff] %v4859_v31  ;;  %v4857_v62 = vmax.f32 %v4825_v54, 0.0  ;;  %v4828_v55 = vadd.f32 %v8793_v45, %v4789_v28  ;;  %v4787_v56 = vadd.f32 %v4734_v47, %v4317_v35  ;;  %v4322_v1 = vadd.f32 %v6003_v38, %v3596_v3 }
 0x228   : > { %v4277_v41 = vpop.f32.mrf.mxu1  ;;  %v6038_v52 = vpop.f32.mrf.mxu0 }
 0x229   : > { %4889 = vst [vmem:[%s8809_s9 + $0xc0] sm:$0xff] %v4857_v62  ;;  %v4860_v21 = vmax.f32 %v4828_v55, 0.0  ;;  %v4826_v26 = vadd.f32 %v8793_v45, %v4787_v56  ;;  %v4792_v2 = vadd.f32 %v6037_v46, %v4322_v1  ;;  %v4320_v4 = vadd.f32 %v4277_v41, %v3594_v50 }
 0x22a   : > { %v6004_v12 = vpop.f32.mrf.mxu1  ;;  %v4750_v15 = vpop.f32.mrf.mxu0 }
 0x22b   : > { %4892 = vst [vmem:[%s8809_s9 + $0xd8] sm:$0xff] %v4860_v21  ;;  %v4858_v58 = vmax.f32 %v4826_v26, 0.0  ;;  %v4831_v60 = vadd.f32 %v8793_v45, %v4792_v2  ;;  %v4790_v34 = vadd.f32 %v4747_v25, %v4320_v4  ;;  %v4323_v42 = vadd.f32 %v6004_v12, %v3597_v53 }
 0x22c   : > { %v4280_v19 = vpop.f32.mrf.mxu1 }
 0x22d   : > { %4890 = vst [vmem:[%s8809_s9 + $0xc8] sm:$0xff] %v4858_v58  ;;  %v4863_v39 = vmax.f32 %v4831_v60, 0.0  ;;  %v4829_v16 = vadd.f32 %v8793_v45, %v4790_v34  ;;  %v4793_v14 = vadd.f32 %v6038_v52, %v4323_v42  ;;  %v4321_v40 = vadd.f32 %v4280_v19, %v3595_v6 }
 0x22f   : > { %4895 = vst [vmem:[%s8809_s9 + $0xf0] sm:$0xff] %v4863_v39  ;;  %v4861_v27 = vmax.f32 %v4829_v16, 0.0  ;;  %v4832_v7 = vadd.f32 %v8793_v45, %v4793_v14  ;;  %v4791_v57 = vadd.f32 %v4750_v15, %v4321_v40 }
 0x231   : > { %4893 = vst [vmem:[%s8809_s9 + $0xe0] sm:$0xff] %v4861_v27  ;;  %v4864_v48 = vmax.f32 %v4832_v7, 0.0  ;;  %v4830_v11 = vadd.f32 %v8793_v45, %v4791_v57 }
 0x233   : > { %4896 = vst [vmem:[%s8809_s9 + $0xf8] sm:$0xff] %v4864_v48  ;;  %v4862_v32 = vmax.f32 %v4830_v11, 0.0 }
 0x235   : > { %4894 = vst [vmem:[%s8809_s9 + $0xe8] sm:$0xff] %v4862_v32 }
 0x236   : > { %6172 = shalt.err (!%p6169_p5)
}
 0x237   : > { %s6173_s29 = scalar_lea.hbm %s8950_s21, 4096  ;;  %s6177_s5 = scalar_lea.hbm %s9006_s3, 8192 }
 0x238   : > { %p6174_p6 = scmp.ne.s32.totalorder %s8950_s21, %s6173_s29  ;;  %p6178_p10 = scmp.lt.s32.totalorder %s8950_s21, %s9006_s3 }
 0x239   : > { %p6179_p11 = scmp.lt.s32.totalorder %s6177_s5, %s6173_s29 }
 0x23a   : > { %p6175_p7 = pnand %p6174_p6, %p6300_p4 }
 0x23b   : > { %p6180_p12 = por %p6179_p11, %p6178_p10 }
 0x23c   : > { %p6176_p9 = pneg %p6175_p7 }
 0x23e   : > { %p6181_p13 = pnand %p6180_p12, %p6176_p9 }
 0x240   : > { %6184 = shalt.err (!%p6181_p13)
}
 0x241   : > { %s6238_s8 = smov 128   ;;  %s6239_s9 = smov 8  }
 0x242   : > { %6052 = dma.vmem_to_hbm [thread:$0]  (%p6300_p4), %s8952_s11, 4096, %s8950_s21, %s8958_s15, %s6238_s8, %s6238_s8, %s6239_s9  }
 0x243 PF: > { %p6058_p0 = scmp.ge.s32.totalorder %s6235_s17, 2  ;;  %s4929_s10 = sand.u32 1, %s6215_s12  }
 0x244   : > { %s4930_s18 = scalar_lea.sflag [#allocation3], %s4929_s10 }
 0x245   : > { %p6055_p1 = pnand %p6058_p0, %p6307_p8 }
 0x247   : > { %p6056_p2 = pneg %p6055_p1 }
 0x249   : > { %6210 = dma.done.wait (%p6056_p2), %s4930_s18, 4096  }
 0x24a   : > { %6212 = vsyncadd (%p6056_p2), %s4930_s18, 4294963200  ;;  %s16_s17 = sadd.s32 1, %s6235_s17   ;;  %s9283_s12 = smov %s6219_s13 }
 0x24b   : > { %p13_p3 = scmp.ge.s32.totalorder %s16_s17, 4   ;;  %s9284_s13 = smov %s6223_s14 }
 0x24c   : > { %s9285_s14 = smov %s6313_s25  ;;  %s9286_s15 = smov %s6231_s16 }
 0x24d   : > { %s9287_s16 = smov %s9289_s20  ;;  %15 = sbr.rel (!%p13_p3) target bundleno = 4 (0x4), region = 84 }
 0x252   :  { %4935 = vsyncpa [#allocation3], 1 }
 0x253   :  { %4937 = vsyncpa [#allocation3 + $0x1], 1 }

</bundles_post_ra>
